<compile_context>
chip_gen: v7x
topology: tpu7x:2x2x1
jax: 0.10.0
libtpu: 0.0.40
codegen_flags: <defaults>
</compile_context>

<pallas_src>
import jax
import jax.numpy as jnp
from jax import lax
from jax.experimental import pallas as pl
from jax.experimental.pallas import tpu as pltpu

# Hyperparameters mirroring the PyTorch module
SENT_LEN = 10      # sentenceLength
EMBED_DIM = 10     # embedDim
HIDDEN = 100       # nn.LSTM(embedDim, 100)
HP = 128           # hidden padded to a full lane width (zero padding, numerically exact)
VOCAB = 50         # vocabSize (synthetic)
VP = 128           # vocab padded for a lane-dense one-hot gather
TARGET = 50        # targetDim (synthetic)
TP = 128           # target padded to a full lane width
BATCH = 8          # number of windows per batch == LSTM time dimension
NEG_INF = -1e30


def model_kernel(idx_ref, gproj_ref, whh_t_ref, wlin_ref, blin_ref,
                 out_ref, hout_ref, cout_ref,
                 gx_scr, y_scr):
    B, L, _ = idx_ref.shape          # (time, lstm-batch, 1)
    VPk = gproj_ref.shape[0]
    HPk = whh_t_ref.shape[0]

    # --- fused embedding gather + input projection (independent of the recurrence) ---
    # one-hot (L, VP) x (VP, 4*HP) dot per time step; all B dots are independent and
    # pipeline through the MXU ahead of / underneath the serial loop.
    gproj = gproj_ref[...]
    iota_v = lax.broadcasted_iota(jnp.int32, (L, VPk), 1)
    for t in range(B):
        oh = (iota_v == idx_ref[t]).astype(jnp.float32)                    # (L, VP)
        gx_scr[t] = jnp.dot(oh, gproj, preferred_element_type=jnp.float32)  # (L, 4*HP)

    whh_t = whh_t_ref[...]            # (HP, 4*HP), load once

    # --- LSTM recurrence over the "time" axis (the batch of windows, per the PyTorch quirk) ---
    # i/f/o gate columns of gproj / whh_t were pre-scaled by 0.5 at prep time, so a single
    # tanh over all 4*HP gate lanes implements both sigmoid (0.5*(tanh(x/2)+1)) and tanh gates.
    def step(t, carry):
        h, c = carry
        gates = gx_scr[t] + jnp.dot(h, whh_t, preferred_element_type=jnp.float32)  # (L, 4*HP)
        tg = jnp.tanh(gates)                              # single streamed EUP pass
        i_g = 0.5 * (tg[:, 0 * HPk:1 * HPk] + 1.0)
        f_g = 0.5 * (tg[:, 1 * HPk:2 * HPk] + 1.0)
        g_g = tg[:, 2 * HPk:3 * HPk]
        o_g = 0.5 * (tg[:, 3 * HPk:4 * HPk] + 1.0)
        c_new = f_g * c + i_g * g_g
        h_new = o_g * jnp.tanh(c_new)
        y_scr[t] = h_new                                  # lstm output at "time" t  (L, HP)
        return h_new, c_new

    h0 = jnp.zeros((L, HPk), jnp.float32)
    c0 = jnp.zeros((L, HPk), jnp.float32)
    h, c = lax.fori_loop(0, B, step, (h0, c0), unroll=True)

    # --- Linear over the flattened (SENT_LEN * HIDDEN) features ---
    # tree-reduced sum of L lane-aligned (B, HP) x (HP, TP) matmuls (independent -> pipelined).
    parts = [jnp.dot(y_scr[:, l, :], wlin_ref[l], preferred_element_type=jnp.float32)
             for l in range(L)]
    while len(parts) > 1:
        nxt = [parts[i] + parts[i + 1] for i in range(0, len(parts) - 1, 2)]
        if len(parts) % 2 == 1:
            nxt.append(parts[-1])
        parts = nxt
    # padded logit lanes carry NEG_INF via the cached bias -> they vanish in the softmax sum.
    logits = parts[0] + blin_ref[...]                     # (B, TP), lane dense

    # LogSoftmax(dim=1)
    m = jnp.max(logits, axis=1, keepdims=True)
    z = logits - m
    lse = jnp.log(jnp.sum(jnp.exp(z), axis=1, keepdims=True))
    out_ref[...] = z - lse
    hout_ref[...] = h
    cout_ref[...] = c


def prepare_params(params):
    """One-time parameter preparation (padding / transposing / gate-scale folding).

    Run once and cache; the per-call forward only consumes the returned tensors."""
    H, E, L, T, V = HIDDEN, EMBED_DIM, SENT_LEN, TARGET, VOCAB
    # PyTorch LSTM gate order: i, f, g, o.  Fold the sigmoid half-scale into i/f/o columns.
    gate_scale = jnp.array([0.5, 0.5, 1.0, 0.5], jnp.float32)

    wih4 = params["wih"].reshape(4, H, E)
    b4 = (params["bih"] + params["bhh"]).reshape(4, H)

    # Fused per-token table: gproj[v] = emb[v] @ Wih^T + (bih + bhh), gate-scaled, zero-padded.
    gtab = (jnp.einsum("ve,ghe->vgh", params["emb"], wih4) + b4[None]) \
        * gate_scale[None, :, None]                                        # (V, 4, H)
    gproj = jnp.zeros((VP, 4, HP), jnp.float32).at[:V, :, :H].set(gtab).reshape(VP, 4 * HP)

    whh4 = params["whh"].reshape(4, H, H) * gate_scale[:, None, None]
    whh_p = jnp.zeros((4, HP, HP), jnp.float32).at[:, :H, :H].set(whh4)
    whh_t = jnp.transpose(whh_p, (2, 0, 1)).reshape(HP, 4 * HP)            # (HP, 4*HP)

    wlin3 = jnp.transpose(params["wlin"]).reshape(L, H, T)                 # (L, H, T)
    wlin_p = jnp.zeros((L, HP, TP), jnp.float32).at[:, :H, :T].set(wlin3)
    # Padded output lanes get NEG_INF through the bias -> no in-kernel masking needed.
    blin_p = jnp.full((1, TP), NEG_INF, jnp.float32).at[0, :T].set(params["blin"])

    return {"gproj": gproj, "whh_t": whh_t, "wlin_p": wlin_p, "blin_p": blin_p}


def model_forward(x_idx, prepped):
    B, L = x_idx.shape
    idx3 = x_idx.reshape(B, L, 1).astype(jnp.int32)

    vmem = pl.BlockSpec(memory_space=pltpu.MemorySpace.VMEM)
    out_shapes = (
        jax.ShapeDtypeStruct((B, TP), jnp.float32),
        jax.ShapeDtypeStruct((L, HP), jnp.float32),
        jax.ShapeDtypeStruct((L, HP), jnp.float32),
    )
    fn = pl.pallas_call(
        model_kernel,
        out_shape=out_shapes,
        in_specs=[vmem] * 5,
        out_specs=(vmem, vmem, vmem),
        scratch_shapes=[
            pltpu.VMEM((B, L, 4 * HP), jnp.float32),   # hoisted input projection, per step
            pltpu.VMEM((B, L, HP), jnp.float32),       # lstm outputs y
        ],
    )
    logp_p, h_p, c_p = fn(idx3, prepped["gproj"], prepped["whh_t"],
                          prepped["wlin_p"], prepped["blin_p"])

    # Slice the (exactly-zero / masked) padded lanes back off; restore (1, L, H) state shape.
    logp = logp_p[:, :TARGET]
    h = h_p[:, :HIDDEN].reshape(1, L, HIDDEN)
    c = c_p[:, :HIDDEN].reshape(1, L, HIDDEN)
    return logp, (h, c)


def ref_forward(x_idx, params):
    # Pure-JAX reference mirroring PyTorch semantics exactly.
    emb = params["emb"][x_idx]
    B, L, E = emb.shape
    H = HIDDEN
    h = jnp.zeros((L, H), jnp.float32)
    c = jnp.zeros((L, H), jnp.float32)
    ys = []
    for t in range(B):
        gates = (emb[t] @ params["wih"].T + params["bih"]
                 + h @ params["whh"].T + params["bhh"])
        i = jax.nn.sigmoid(gates[:, 0 * H:1 * H])
        f = jax.nn.sigmoid(gates[:, 1 * H:2 * H])
        g = jnp.tanh(gates[:, 2 * H:3 * H])
        o = jax.nn.sigmoid(gates[:, 3 * H:4 * H])
        c = f * c + i * g
        h = o * jnp.tanh(c)
        ys.append(h)
    y = jnp.stack(ys).reshape(B, L * H)
    logits = y @ params["wlin"].T + params["blin"]
    return jax.nn.log_softmax(logits, axis=1), h, c


if __name__ == "__main__":
    key = jax.random.PRNGKey(0)
    keys = jax.random.split(key, 7)
    params = {
        "emb":  jax.random.normal(keys[0], (VOCAB, EMBED_DIM), jnp.float32) * 0.1,
        "wih":  jax.random.normal(keys[1], (4 * HIDDEN, EMBED_DIM), jnp.float32) * 0.1,
        "whh":  jax.random.normal(keys[2], (4 * HIDDEN, HIDDEN), jnp.float32) * 0.1,
        "bih":  jax.random.normal(keys[3], (4 * HIDDEN,), jnp.float32) * 0.1,
        "bhh":  jax.random.normal(keys[4], (4 * HIDDEN,), jnp.float32) * 0.1,
        "wlin": jax.random.normal(keys[5], (TARGET, HIDDEN * SENT_LEN), jnp.float32) * 0.05,
        "blin": jax.random.normal(keys[6], (TARGET,), jnp.float32) * 0.1,
    }
    x_idx = jax.random.randint(jax.random.PRNGKey(1), (BATCH, SENT_LEN), 0, VOCAB,
                               dtype=jnp.int32)

    # One-time parameter prep (cached); the jitted forward only sees padded tensors.
    prepped = jax.tree_util.tree_map(jax.block_until_ready, prepare_params(params))

    fwd = jax.jit(model_forward)
    logp, (h, c) = fwd(x_idx, prepped)
    jax.block_until_ready((logp, h, c))

    ref_logp, ref_h, ref_c = ref_forward(x_idx, params)
    assert jnp.allclose(logp, ref_logp, atol=1e-4, rtol=1e-4)
    assert jnp.allclose(h.reshape(SENT_LEN, HIDDEN), ref_h, atol=1e-4, rtol=1e-4)
    assert jnp.allclose(c.reshape(SENT_LEN, HIDDEN), ref_c, atol=1e-4, rtol=1e-4)
    print("KERNEL_OK")
</pallas_src>

<mosaic_0001>
module attributes {stable_mosaic.version = 11 : i64} {
  func.func @model_kernel(%arg0: memref<8x10x1xi32, #tpu.memory_space<vmem>>, %arg1: memref<128x512xf32, #tpu.memory_space<vmem>>, %arg2: memref<128x512xf32, #tpu.memory_space<vmem>>, %arg3: memref<10x128x128xf32, #tpu.memory_space<vmem>>, %arg4: memref<1x128xf32, #tpu.memory_space<vmem>>, %arg5: memref<8x128xf32, #tpu.memory_space<vmem>>, %arg6: memref<10x128xf32, #tpu.memory_space<vmem>>, %arg7: memref<10x128xf32, #tpu.memory_space<vmem>>, %arg8: memref<8x10x512xf32, #tpu.memory_space<vmem>>, %arg9: memref<8x10x128xf32, #tpu.memory_space<vmem>>) attributes {dimension_semantics = [], scalar_prefetch = 0 : i64, scratch_operands = 2 : i64, tpu.core_type = #tpu.core_type<tc>} {
    %c0 = arith.constant 0 : index
    %c0_0 = arith.constant 0 : index
    %0 = vector.load %arg1[%c0, %c0_0] : memref<128x512xf32, #tpu.memory_space<vmem>>, vector<128x512xf32>
    %1 = tpu.iota {dimensions = array<i32: 1>} : vector<10x128xi32>
    %c0_1 = arith.constant 0 : index
    %c0_2 = arith.constant 0 : index
    %c0_3 = arith.constant 0 : index
    %2 = vector.load %arg0[%c0_1, %c0_2, %c0_3] : memref<8x10x1xi32, #tpu.memory_space<vmem>>, vector<1x10x1xi32>
    %3 = vector.shape_cast %2 : vector<1x10x1xi32> to vector<10x1xi32>
    %4 = vector.broadcast %3 : vector<10x1xi32> to vector<10x128xi32>
    %5 = arith.cmpi eq, %1, %4 : vector<10x128xi32>
    %6 = arith.extui %5 : vector<10x128xi1> to vector<10x128xi32>
    %7 = arith.sitofp %6 : vector<10x128xi32> to vector<10x128xf32>
    %cst = arith.constant dense<0.000000e+00> : vector<10x512xf32>
    %8 = tpu.matmul %7, %0, %cst {dimension_numbers = #tpu.dot_dimension_numbers<[1], [0], [0], [1], [0, 0, 1, 1], [], []>} : vector<10x128xf32>, vector<128x512xf32>, vector<10x512xf32> -> vector<10x512xf32>
    %c0_4 = arith.constant 0 : index
    %c0_5 = arith.constant 0 : index
    %c0_6 = arith.constant 0 : index
    %9 = vector.load %arg8[%c0_4, %c0_5, %c0_6] : memref<8x10x512xf32, #tpu.memory_space<vmem>>, vector<1x10x512xf32>
    %10 = vector.shape_cast %9 : vector<1x10x512xf32> to vector<10x512xf32>
    %11 = vector.shape_cast %8 : vector<10x512xf32> to vector<1x10x512xf32>
    tpu.vector_store %arg8[%c0_4, %c0_5, %c0_6], %11 {strides = array<i32>} : memref<8x10x512xf32, #tpu.memory_space<vmem>>, vector<1x10x512xf32>,
    %c1 = arith.constant 1 : index
    %c0_7 = arith.constant 0 : index
    %c0_8 = arith.constant 0 : index
    %12 = vector.load %arg0[%c1, %c0_7, %c0_8] : memref<8x10x1xi32, #tpu.memory_space<vmem>>, vector<1x10x1xi32>
    %13 = vector.shape_cast %12 : vector<1x10x1xi32> to vector<10x1xi32>
    %14 = vector.broadcast %13 : vector<10x1xi32> to vector<10x128xi32>
    %15 = arith.cmpi eq, %1, %14 : vector<10x128xi32>
    %16 = arith.extui %15 : vector<10x128xi1> to vector<10x128xi32>
    %17 = arith.sitofp %16 : vector<10x128xi32> to vector<10x128xf32>
    %cst_9 = arith.constant dense<0.000000e+00> : vector<10x512xf32>
    %18 = tpu.matmul %17, %0, %cst_9 {dimension_numbers = #tpu.dot_dimension_numbers<[1], [0], [0], [1], [0, 0, 1, 1], [], []>} : vector<10x128xf32>, vector<128x512xf32>, vector<10x512xf32> -> vector<10x512xf32>
    %c1_10 = arith.constant 1 : index
    %c0_11 = arith.constant 0 : index
    %c0_12 = arith.constant 0 : index
    %19 = vector.load %arg8[%c1_10, %c0_11, %c0_12] : memref<8x10x512xf32, #tpu.memory_space<vmem>>, vector<1x10x512xf32>
    %20 = vector.shape_cast %19 : vector<1x10x512xf32> to vector<10x512xf32>
    %21 = vector.shape_cast %18 : vector<10x512xf32> to vector<1x10x512xf32>
    tpu.vector_store %arg8[%c1_10, %c0_11, %c0_12], %21 {strides = array<i32>} : memref<8x10x512xf32, #tpu.memory_space<vmem>>, vector<1x10x512xf32>,
    %c2 = arith.constant 2 : index
    %c0_13 = arith.constant 0 : index
    %c0_14 = arith.constant 0 : index
    %22 = vector.load %arg0[%c2, %c0_13, %c0_14] : memref<8x10x1xi32, #tpu.memory_space<vmem>>, vector<1x10x1xi32>
    %23 = vector.shape_cast %22 : vector<1x10x1xi32> to vector<10x1xi32>
    %24 = vector.broadcast %23 : vector<10x1xi32> to vector<10x128xi32>
    %25 = arith.cmpi eq, %1, %24 : vector<10x128xi32>
    %26 = arith.extui %25 : vector<10x128xi1> to vector<10x128xi32>
    %27 = arith.sitofp %26 : vector<10x128xi32> to vector<10x128xf32>
    %cst_15 = arith.constant dense<0.000000e+00> : vector<10x512xf32>
    %28 = tpu.matmul %27, %0, %cst_15 {dimension_numbers = #tpu.dot_dimension_numbers<[1], [0], [0], [1], [0, 0, 1, 1], [], []>} : vector<10x128xf32>, vector<128x512xf32>, vector<10x512xf32> -> vector<10x512xf32>
    %c2_16 = arith.constant 2 : index
    %c0_17 = arith.constant 0 : index
    %c0_18 = arith.constant 0 : index
    %29 = vector.load %arg8[%c2_16, %c0_17, %c0_18] : memref<8x10x512xf32, #tpu.memory_space<vmem>>, vector<1x10x512xf32>
    %30 = vector.shape_cast %29 : vector<1x10x512xf32> to vector<10x512xf32>
    %31 = vector.shape_cast %28 : vector<10x512xf32> to vector<1x10x512xf32>
    tpu.vector_store %arg8[%c2_16, %c0_17, %c0_18], %31 {strides = array<i32>} : memref<8x10x512xf32, #tpu.memory_space<vmem>>, vector<1x10x512xf32>,
    %c3 = arith.constant 3 : index
    %c0_19 = arith.constant 0 : index
    %c0_20 = arith.constant 0 : index
    %32 = vector.load %arg0[%c3, %c0_19, %c0_20] : memref<8x10x1xi32, #tpu.memory_space<vmem>>, vector<1x10x1xi32>
    %33 = vector.shape_cast %32 : vector<1x10x1xi32> to vector<10x1xi32>
    %34 = vector.broadcast %33 : vector<10x1xi32> to vector<10x128xi32>
    %35 = arith.cmpi eq, %1, %34 : vector<10x128xi32>
    %36 = arith.extui %35 : vector<10x128xi1> to vector<10x128xi32>
    %37 = arith.sitofp %36 : vector<10x128xi32> to vector<10x128xf32>
    %cst_21 = arith.constant dense<0.000000e+00> : vector<10x512xf32>
    %38 = tpu.matmul %37, %0, %cst_21 {dimension_numbers = #tpu.dot_dimension_numbers<[1], [0], [0], [1], [0, 0, 1, 1], [], []>} : vector<10x128xf32>, vector<128x512xf32>, vector<10x512xf32> -> vector<10x512xf32>
    %c3_22 = arith.constant 3 : index
    %c0_23 = arith.constant 0 : index
    %c0_24 = arith.constant 0 : index
    %39 = vector.load %arg8[%c3_22, %c0_23, %c0_24] : memref<8x10x512xf32, #tpu.memory_space<vmem>>, vector<1x10x512xf32>
    %40 = vector.shape_cast %39 : vector<1x10x512xf32> to vector<10x512xf32>
    %41 = vector.shape_cast %38 : vector<10x512xf32> to vector<1x10x512xf32>
    tpu.vector_store %arg8[%c3_22, %c0_23, %c0_24], %41 {strides = array<i32>} : memref<8x10x512xf32, #tpu.memory_space<vmem>>, vector<1x10x512xf32>,
    %c4 = arith.constant 4 : index
    %c0_25 = arith.constant 0 : index
    %c0_26 = arith.constant 0 : index
    %42 = vector.load %arg0[%c4, %c0_25, %c0_26] : memref<8x10x1xi32, #tpu.memory_space<vmem>>, vector<1x10x1xi32>
    %43 = vector.shape_cast %42 : vector<1x10x1xi32> to vector<10x1xi32>
    %44 = vector.broadcast %43 : vector<10x1xi32> to vector<10x128xi32>
    %45 = arith.cmpi eq, %1, %44 : vector<10x128xi32>
    %46 = arith.extui %45 : vector<10x128xi1> to vector<10x128xi32>
    %47 = arith.sitofp %46 : vector<10x128xi32> to vector<10x128xf32>
    %cst_27 = arith.constant dense<0.000000e+00> : vector<10x512xf32>
    %48 = tpu.matmul %47, %0, %cst_27 {dimension_numbers = #tpu.dot_dimension_numbers<[1], [0], [0], [1], [0, 0, 1, 1], [], []>} : vector<10x128xf32>, vector<128x512xf32>, vector<10x512xf32> -> vector<10x512xf32>
    %c4_28 = arith.constant 4 : index
    %c0_29 = arith.constant 0 : index
    %c0_30 = arith.constant 0 : index
    %49 = vector.load %arg8[%c4_28, %c0_29, %c0_30] : memref<8x10x512xf32, #tpu.memory_space<vmem>>, vector<1x10x512xf32>
    %50 = vector.shape_cast %49 : vector<1x10x512xf32> to vector<10x512xf32>
    %51 = vector.shape_cast %48 : vector<10x512xf32> to vector<1x10x512xf32>
    tpu.vector_store %arg8[%c4_28, %c0_29, %c0_30], %51 {strides = array<i32>} : memref<8x10x512xf32, #tpu.memory_space<vmem>>, vector<1x10x512xf32>,
    %c5 = arith.constant 5 : index
    %c0_31 = arith.constant 0 : index
    %c0_32 = arith.constant 0 : index
    %52 = vector.load %arg0[%c5, %c0_31, %c0_32] : memref<8x10x1xi32, #tpu.memory_space<vmem>>, vector<1x10x1xi32>
    %53 = vector.shape_cast %52 : vector<1x10x1xi32> to vector<10x1xi32>
    %54 = vector.broadcast %53 : vector<10x1xi32> to vector<10x128xi32>
    %55 = arith.cmpi eq, %1, %54 : vector<10x128xi32>
    %56 = arith.extui %55 : vector<10x128xi1> to vector<10x128xi32>
    %57 = arith.sitofp %56 : vector<10x128xi32> to vector<10x128xf32>
    %cst_33 = arith.constant dense<0.000000e+00> : vector<10x512xf32>
    %58 = tpu.matmul %57, %0, %cst_33 {dimension_numbers = #tpu.dot_dimension_numbers<[1], [0], [0], [1], [0, 0, 1, 1], [], []>} : vector<10x128xf32>, vector<128x512xf32>, vector<10x512xf32> -> vector<10x512xf32>
    %c5_34 = arith.constant 5 : index
    %c0_35 = arith.constant 0 : index
    %c0_36 = arith.constant 0 : index
    %59 = vector.load %arg8[%c5_34, %c0_35, %c0_36] : memref<8x10x512xf32, #tpu.memory_space<vmem>>, vector<1x10x512xf32>
    %60 = vector.shape_cast %59 : vector<1x10x512xf32> to vector<10x512xf32>
    %61 = vector.shape_cast %58 : vector<10x512xf32> to vector<1x10x512xf32>
    tpu.vector_store %arg8[%c5_34, %c0_35, %c0_36], %61 {strides = array<i32>} : memref<8x10x512xf32, #tpu.memory_space<vmem>>, vector<1x10x512xf32>,
    %c6 = arith.constant 6 : index
    %c0_37 = arith.constant 0 : index
    %c0_38 = arith.constant 0 : index
    %62 = vector.load %arg0[%c6, %c0_37, %c0_38] : memref<8x10x1xi32, #tpu.memory_space<vmem>>, vector<1x10x1xi32>
    %63 = vector.shape_cast %62 : vector<1x10x1xi32> to vector<10x1xi32>
    %64 = vector.broadcast %63 : vector<10x1xi32> to vector<10x128xi32>
    %65 = arith.cmpi eq, %1, %64 : vector<10x128xi32>
    %66 = arith.extui %65 : vector<10x128xi1> to vector<10x128xi32>
    %67 = arith.sitofp %66 : vector<10x128xi32> to vector<10x128xf32>
    %cst_39 = arith.constant dense<0.000000e+00> : vector<10x512xf32>
    %68 = tpu.matmul %67, %0, %cst_39 {dimension_numbers = #tpu.dot_dimension_numbers<[1], [0], [0], [1], [0, 0, 1, 1], [], []>} : vector<10x128xf32>, vector<128x512xf32>, vector<10x512xf32> -> vector<10x512xf32>
    %c6_40 = arith.constant 6 : index
    %c0_41 = arith.constant 0 : index
    %c0_42 = arith.constant 0 : index
    %69 = vector.load %arg8[%c6_40, %c0_41, %c0_42] : memref<8x10x512xf32, #tpu.memory_space<vmem>>, vector<1x10x512xf32>
    %70 = vector.shape_cast %69 : vector<1x10x512xf32> to vector<10x512xf32>
    %71 = vector.shape_cast %68 : vector<10x512xf32> to vector<1x10x512xf32>
    tpu.vector_store %arg8[%c6_40, %c0_41, %c0_42], %71 {strides = array<i32>} : memref<8x10x512xf32, #tpu.memory_space<vmem>>, vector<1x10x512xf32>,
    %c7 = arith.constant 7 : index
    %c0_43 = arith.constant 0 : index
    %c0_44 = arith.constant 0 : index
    %72 = vector.load %arg0[%c7, %c0_43, %c0_44] : memref<8x10x1xi32, #tpu.memory_space<vmem>>, vector<1x10x1xi32>
    %73 = vector.shape_cast %72 : vector<1x10x1xi32> to vector<10x1xi32>
    %74 = vector.broadcast %73 : vector<10x1xi32> to vector<10x128xi32>
    %75 = arith.cmpi eq, %1, %74 : vector<10x128xi32>
    %76 = arith.extui %75 : vector<10x128xi1> to vector<10x128xi32>
    %77 = arith.sitofp %76 : vector<10x128xi32> to vector<10x128xf32>
    %cst_45 = arith.constant dense<0.000000e+00> : vector<10x512xf32>
    %78 = tpu.matmul %77, %0, %cst_45 {dimension_numbers = #tpu.dot_dimension_numbers<[1], [0], [0], [1], [0, 0, 1, 1], [], []>} : vector<10x128xf32>, vector<128x512xf32>, vector<10x512xf32> -> vector<10x512xf32>
    %c7_46 = arith.constant 7 : index
    %c0_47 = arith.constant 0 : index
    %c0_48 = arith.constant 0 : index
    %79 = vector.load %arg8[%c7_46, %c0_47, %c0_48] : memref<8x10x512xf32, #tpu.memory_space<vmem>>, vector<1x10x512xf32>
    %80 = vector.shape_cast %79 : vector<1x10x512xf32> to vector<10x512xf32>
    %81 = vector.shape_cast %78 : vector<10x512xf32> to vector<1x10x512xf32>
    tpu.vector_store %arg8[%c7_46, %c0_47, %c0_48], %81 {strides = array<i32>} : memref<8x10x512xf32, #tpu.memory_space<vmem>>, vector<1x10x512xf32>,
    %c0_49 = arith.constant 0 : index
    %c0_50 = arith.constant 0 : index
    %82 = vector.load %arg2[%c0_49, %c0_50] : memref<128x512xf32, #tpu.memory_space<vmem>>, vector<128x512xf32>
    %cst_51 = arith.constant 0.000000e+00 : f32
    %83 = vector.broadcast %cst_51 : f32 to vector<10x128xf32>
    %cst_52 = arith.constant 0.000000e+00 : f32
    %84 = vector.broadcast %cst_52 : f32 to vector<10x128xf32>
    %c0_i32 = arith.constant 0 : i32
    %85 = arith.index_cast %c0_i32 : i32 to index
    %c0_53 = arith.constant 0 : index
    %c0_54 = arith.constant 0 : index
    %86 = vector.load %arg8[%85, %c0_53, %c0_54] : memref<8x10x512xf32, #tpu.memory_space<vmem>>, vector<1x10x512xf32>
    %87 = vector.shape_cast %86 : vector<1x10x512xf32> to vector<10x512xf32>
    %cst_55 = arith.constant dense<0.000000e+00> : vector<10x512xf32>
    %88 = tpu.matmul %83, %82, %cst_55 {dimension_numbers = #tpu.dot_dimension_numbers<[1], [0], [0], [1], [0, 0, 1, 1], [], []>} : vector<10x128xf32>, vector<128x512xf32>, vector<10x512xf32> -> vector<10x512xf32>
    %89 = arith.addf %87, %88 : vector<10x512xf32>
    %90 = math.tanh %89 : vector<10x512xf32>
    %91 = vector.extract_strided_slice %90 {offsets = [0, 0], sizes = [10, 128], strides = [1, 1]} : vector<10x512xf32> to vector<10x128xf32>
    %cst_56 = arith.constant 1.000000e+00 : f32
    %92 = vector.broadcast %cst_56 : f32 to vector<10x128xf32>
    %93 = arith.addf %91, %92 : vector<10x128xf32>
    %cst_57 = arith.constant 5.000000e-01 : f32
    %94 = vector.broadcast %cst_57 : f32 to vector<10x128xf32>
    %95 = arith.mulf %94, %93 : vector<10x128xf32>
    %96 = vector.extract_strided_slice %90 {offsets = [0, 128], sizes = [10, 128], strides = [1, 1]} : vector<10x512xf32> to vector<10x128xf32>
    %cst_58 = arith.constant 1.000000e+00 : f32
    %97 = vector.broadcast %cst_58 : f32 to vector<10x128xf32>
    %98 = arith.addf %96, %97 : vector<10x128xf32>
    %cst_59 = arith.constant 5.000000e-01 : f32
    %99 = vector.broadcast %cst_59 : f32 to vector<10x128xf32>
    %100 = arith.mulf %99, %98 : vector<10x128xf32>
    %101 = vector.extract_strided_slice %90 {offsets = [0, 256], sizes = [10, 128], strides = [1, 1]} : vector<10x512xf32> to vector<10x128xf32>
    %102 = vector.extract_strided_slice %90 {offsets = [0, 384], sizes = [10, 128], strides = [1, 1]} : vector<10x512xf32> to vector<10x128xf32>
    %cst_60 = arith.constant 1.000000e+00 : f32
    %103 = vector.broadcast %cst_60 : f32 to vector<10x128xf32>
    %104 = arith.addf %102, %103 : vector<10x128xf32>
    %cst_61 = arith.constant 5.000000e-01 : f32
    %105 = vector.broadcast %cst_61 : f32 to vector<10x128xf32>
    %106 = arith.mulf %105, %104 : vector<10x128xf32>
    %107 = arith.mulf %100, %84 : vector<10x128xf32>
    %108 = arith.mulf %95, %101 : vector<10x128xf32>
    %109 = arith.addf %107, %108 : vector<10x128xf32>
    %110 = math.tanh %109 : vector<10x128xf32>
    %111 = arith.mulf %106, %110 : vector<10x128xf32>
    %112 = arith.index_cast %c0_i32 : i32 to index
    %c0_62 = arith.constant 0 : index
    %c0_63 = arith.constant 0 : index
    %113 = vector.load %arg9[%112, %c0_62, %c0_63] : memref<8x10x128xf32, #tpu.memory_space<vmem>>, vector<1x10x128xf32>
    %114 = vector.shape_cast %113 : vector<1x10x128xf32> to vector<10x128xf32>
    %115 = vector.shape_cast %111 : vector<10x128xf32> to vector<1x10x128xf32>
    tpu.vector_store %arg9[%112, %c0_62, %c0_63], %115 {strides = array<i32>} : memref<8x10x128xf32, #tpu.memory_space<vmem>>, vector<1x10x128xf32>,
    %c1_i32 = arith.constant 1 : i32
    %116 = arith.index_cast %c1_i32 : i32 to index
    %c0_64 = arith.constant 0 : index
    %c0_65 = arith.constant 0 : index
    %117 = vector.load %arg8[%116, %c0_64, %c0_65] : memref<8x10x512xf32, #tpu.memory_space<vmem>>, vector<1x10x512xf32>
    %118 = vector.shape_cast %117 : vector<1x10x512xf32> to vector<10x512xf32>
    %cst_66 = arith.constant dense<0.000000e+00> : vector<10x512xf32>
    %119 = tpu.matmul %111, %82, %cst_66 {dimension_numbers = #tpu.dot_dimension_numbers<[1], [0], [0], [1], [0, 0, 1, 1], [], []>} : vector<10x128xf32>, vector<128x512xf32>, vector<10x512xf32> -> vector<10x512xf32>
    %120 = arith.addf %118, %119 : vector<10x512xf32>
    %121 = math.tanh %120 : vector<10x512xf32>
    %122 = vector.extract_strided_slice %121 {offsets = [0, 0], sizes = [10, 128], strides = [1, 1]} : vector<10x512xf32> to vector<10x128xf32>
    %cst_67 = arith.constant 1.000000e+00 : f32
    %123 = vector.broadcast %cst_67 : f32 to vector<10x128xf32>
    %124 = arith.addf %122, %123 : vector<10x128xf32>
    %cst_68 = arith.constant 5.000000e-01 : f32
    %125 = vector.broadcast %cst_68 : f32 to vector<10x128xf32>
    %126 = arith.mulf %125, %124 : vector<10x128xf32>
    %127 = vector.extract_strided_slice %121 {offsets = [0, 128], sizes = [10, 128], strides = [1, 1]} : vector<10x512xf32> to vector<10x128xf32>
    %cst_69 = arith.constant 1.000000e+00 : f32
    %128 = vector.broadcast %cst_69 : f32 to vector<10x128xf32>
    %129 = arith.addf %127, %128 : vector<10x128xf32>
    %cst_70 = arith.constant 5.000000e-01 : f32
    %130 = vector.broadcast %cst_70 : f32 to vector<10x128xf32>
    %131 = arith.mulf %130, %129 : vector<10x128xf32>
    %132 = vector.extract_strided_slice %121 {offsets = [0, 256], sizes = [10, 128], strides = [1, 1]} : vector<10x512xf32> to vector<10x128xf32>
    %133 = vector.extract_strided_slice %121 {offsets = [0, 384], sizes = [10, 128], strides = [1, 1]} : vector<10x512xf32> to vector<10x128xf32>
    %cst_71 = arith.constant 1.000000e+00 : f32
    %134 = vector.broadcast %cst_71 : f32 to vector<10x128xf32>
    %135 = arith.addf %133, %134 : vector<10x128xf32>
    %cst_72 = arith.constant 5.000000e-01 : f32
    %136 = vector.broadcast %cst_72 : f32 to vector<10x128xf32>
    %137 = arith.mulf %136, %135 : vector<10x128xf32>
    %138 = arith.mulf %131, %109 : vector<10x128xf32>
    %139 = arith.mulf %126, %132 : vector<10x128xf32>
    %140 = arith.addf %138, %139 : vector<10x128xf32>
    %141 = math.tanh %140 : vector<10x128xf32>
    %142 = arith.mulf %137, %141 : vector<10x128xf32>
    %143 = arith.index_cast %c1_i32 : i32 to index
    %c0_73 = arith.constant 0 : index
    %c0_74 = arith.constant 0 : index
    %144 = vector.load %arg9[%143, %c0_73, %c0_74] : memref<8x10x128xf32, #tpu.memory_space<vmem>>, vector<1x10x128xf32>
    %145 = vector.shape_cast %144 : vector<1x10x128xf32> to vector<10x128xf32>
    %146 = vector.shape_cast %142 : vector<10x128xf32> to vector<1x10x128xf32>
    tpu.vector_store %arg9[%143, %c0_73, %c0_74], %146 {strides = array<i32>} : memref<8x10x128xf32, #tpu.memory_space<vmem>>, vector<1x10x128xf32>,
    %c2_i32 = arith.constant 2 : i32
    %147 = arith.index_cast %c2_i32 : i32 to index
    %c0_75 = arith.constant 0 : index
    %c0_76 = arith.constant 0 : index
    %148 = vector.load %arg8[%147, %c0_75, %c0_76] : memref<8x10x512xf32, #tpu.memory_space<vmem>>, vector<1x10x512xf32>
    %149 = vector.shape_cast %148 : vector<1x10x512xf32> to vector<10x512xf32>
    %cst_77 = arith.constant dense<0.000000e+00> : vector<10x512xf32>
    %150 = tpu.matmul %142, %82, %cst_77 {dimension_numbers = #tpu.dot_dimension_numbers<[1], [0], [0], [1], [0, 0, 1, 1], [], []>} : vector<10x128xf32>, vector<128x512xf32>, vector<10x512xf32> -> vector<10x512xf32>
    %151 = arith.addf %149, %150 : vector<10x512xf32>
    %152 = math.tanh %151 : vector<10x512xf32>
    %153 = vector.extract_strided_slice %152 {offsets = [0, 0], sizes = [10, 128], strides = [1, 1]} : vector<10x512xf32> to vector<10x128xf32>
    %cst_78 = arith.constant 1.000000e+00 : f32
    %154 = vector.broadcast %cst_78 : f32 to vector<10x128xf32>
    %155 = arith.addf %153, %154 : vector<10x128xf32>
    %cst_79 = arith.constant 5.000000e-01 : f32
    %156 = vector.broadcast %cst_79 : f32 to vector<10x128xf32>
    %157 = arith.mulf %156, %155 : vector<10x128xf32>
    %158 = vector.extract_strided_slice %152 {offsets = [0, 128], sizes = [10, 128], strides = [1, 1]} : vector<10x512xf32> to vector<10x128xf32>
    %cst_80 = arith.constant 1.000000e+00 : f32
    %159 = vector.broadcast %cst_80 : f32 to vector<10x128xf32>
    %160 = arith.addf %158, %159 : vector<10x128xf32>
    %cst_81 = arith.constant 5.000000e-01 : f32
    %161 = vector.broadcast %cst_81 : f32 to vector<10x128xf32>
    %162 = arith.mulf %161, %160 : vector<10x128xf32>
    %163 = vector.extract_strided_slice %152 {offsets = [0, 256], sizes = [10, 128], strides = [1, 1]} : vector<10x512xf32> to vector<10x128xf32>
    %164 = vector.extract_strided_slice %152 {offsets = [0, 384], sizes = [10, 128], strides = [1, 1]} : vector<10x512xf32> to vector<10x128xf32>
    %cst_82 = arith.constant 1.000000e+00 : f32
    %165 = vector.broadcast %cst_82 : f32 to vector<10x128xf32>
    %166 = arith.addf %164, %165 : vector<10x128xf32>
    %cst_83 = arith.constant 5.000000e-01 : f32
    %167 = vector.broadcast %cst_83 : f32 to vector<10x128xf32>
    %168 = arith.mulf %167, %166 : vector<10x128xf32>
    %169 = arith.mulf %162, %140 : vector<10x128xf32>
    %170 = arith.mulf %157, %163 : vector<10x128xf32>
    %171 = arith.addf %169, %170 : vector<10x128xf32>
    %172 = math.tanh %171 : vector<10x128xf32>
    %173 = arith.mulf %168, %172 : vector<10x128xf32>
    %174 = arith.index_cast %c2_i32 : i32 to index
    %c0_84 = arith.constant 0 : index
    %c0_85 = arith.constant 0 : index
    %175 = vector.load %arg9[%174, %c0_84, %c0_85] : memref<8x10x128xf32, #tpu.memory_space<vmem>>, vector<1x10x128xf32>
    %176 = vector.shape_cast %175 : vector<1x10x128xf32> to vector<10x128xf32>
    %177 = vector.shape_cast %173 : vector<10x128xf32> to vector<1x10x128xf32>
    tpu.vector_store %arg9[%174, %c0_84, %c0_85], %177 {strides = array<i32>} : memref<8x10x128xf32, #tpu.memory_space<vmem>>, vector<1x10x128xf32>,
    %c3_i32 = arith.constant 3 : i32
    %178 = arith.index_cast %c3_i32 : i32 to index
    %c0_86 = arith.constant 0 : index
    %c0_87 = arith.constant 0 : index
    %179 = vector.load %arg8[%178, %c0_86, %c0_87] : memref<8x10x512xf32, #tpu.memory_space<vmem>>, vector<1x10x512xf32>
    %180 = vector.shape_cast %179 : vector<1x10x512xf32> to vector<10x512xf32>
    %cst_88 = arith.constant dense<0.000000e+00> : vector<10x512xf32>
    %181 = tpu.matmul %173, %82, %cst_88 {dimension_numbers = #tpu.dot_dimension_numbers<[1], [0], [0], [1], [0, 0, 1, 1], [], []>} : vector<10x128xf32>, vector<128x512xf32>, vector<10x512xf32> -> vector<10x512xf32>
    %182 = arith.addf %180, %181 : vector<10x512xf32>
    %183 = math.tanh %182 : vector<10x512xf32>
    %184 = vector.extract_strided_slice %183 {offsets = [0, 0], sizes = [10, 128], strides = [1, 1]} : vector<10x512xf32> to vector<10x128xf32>
    %cst_89 = arith.constant 1.000000e+00 : f32
    %185 = vector.broadcast %cst_89 : f32 to vector<10x128xf32>
    %186 = arith.addf %184, %185 : vector<10x128xf32>
    %cst_90 = arith.constant 5.000000e-01 : f32
    %187 = vector.broadcast %cst_90 : f32 to vector<10x128xf32>
    %188 = arith.mulf %187, %186 : vector<10x128xf32>
    %189 = vector.extract_strided_slice %183 {offsets = [0, 128], sizes = [10, 128], strides = [1, 1]} : vector<10x512xf32> to vector<10x128xf32>
    %cst_91 = arith.constant 1.000000e+00 : f32
    %190 = vector.broadcast %cst_91 : f32 to vector<10x128xf32>
    %191 = arith.addf %189, %190 : vector<10x128xf32>
    %cst_92 = arith.constant 5.000000e-01 : f32
    %192 = vector.broadcast %cst_92 : f32 to vector<10x128xf32>
    %193 = arith.mulf %192, %191 : vector<10x128xf32>
    %194 = vector.extract_strided_slice %183 {offsets = [0, 256], sizes = [10, 128], strides = [1, 1]} : vector<10x512xf32> to vector<10x128xf32>
    %195 = vector.extract_strided_slice %183 {offsets = [0, 384], sizes = [10, 128], strides = [1, 1]} : vector<10x512xf32> to vector<10x128xf32>
    %cst_93 = arith.constant 1.000000e+00 : f32
    %196 = vector.broadcast %cst_93 : f32 to vector<10x128xf32>
    %197 = arith.addf %195, %196 : vector<10x128xf32>
    %cst_94 = arith.constant 5.000000e-01 : f32
    %198 = vector.broadcast %cst_94 : f32 to vector<10x128xf32>
    %199 = arith.mulf %198, %197 : vector<10x128xf32>
    %200 = arith.mulf %193, %171 : vector<10x128xf32>
    %201 = arith.mulf %188, %194 : vector<10x128xf32>
    %202 = arith.addf %200, %201 : vector<10x128xf32>
    %203 = math.tanh %202 : vector<10x128xf32>
    %204 = arith.mulf %199, %203 : vector<10x128xf32>
    %205 = arith.index_cast %c3_i32 : i32 to index
    %c0_95 = arith.constant 0 : index
    %c0_96 = arith.constant 0 : index
    %206 = vector.load %arg9[%205, %c0_95, %c0_96] : memref<8x10x128xf32, #tpu.memory_space<vmem>>, vector<1x10x128xf32>
    %207 = vector.shape_cast %206 : vector<1x10x128xf32> to vector<10x128xf32>
    %208 = vector.shape_cast %204 : vector<10x128xf32> to vector<1x10x128xf32>
    tpu.vector_store %arg9[%205, %c0_95, %c0_96], %208 {strides = array<i32>} : memref<8x10x128xf32, #tpu.memory_space<vmem>>, vector<1x10x128xf32>,
    %c4_i32 = arith.constant 4 : i32
    %209 = arith.index_cast %c4_i32 : i32 to index
    %c0_97 = arith.constant 0 : index
    %c0_98 = arith.constant 0 : index
    %210 = vector.load %arg8[%209, %c0_97, %c0_98] : memref<8x10x512xf32, #tpu.memory_space<vmem>>, vector<1x10x512xf32>
    %211 = vector.shape_cast %210 : vector<1x10x512xf32> to vector<10x512xf32>
    %cst_99 = arith.constant dense<0.000000e+00> : vector<10x512xf32>
    %212 = tpu.matmul %204, %82, %cst_99 {dimension_numbers = #tpu.dot_dimension_numbers<[1], [0], [0], [1], [0, 0, 1, 1], [], []>} : vector<10x128xf32>, vector<128x512xf32>, vector<10x512xf32> -> vector<10x512xf32>
    %213 = arith.addf %211, %212 : vector<10x512xf32>
    %214 = math.tanh %213 : vector<10x512xf32>
    %215 = vector.extract_strided_slice %214 {offsets = [0, 0], sizes = [10, 128], strides = [1, 1]} : vector<10x512xf32> to vector<10x128xf32>
    %cst_100 = arith.constant 1.000000e+00 : f32
    %216 = vector.broadcast %cst_100 : f32 to vector<10x128xf32>
    %217 = arith.addf %215, %216 : vector<10x128xf32>
    %cst_101 = arith.constant 5.000000e-01 : f32
    %218 = vector.broadcast %cst_101 : f32 to vector<10x128xf32>
    %219 = arith.mulf %218, %217 : vector<10x128xf32>
    %220 = vector.extract_strided_slice %214 {offsets = [0, 128], sizes = [10, 128], strides = [1, 1]} : vector<10x512xf32> to vector<10x128xf32>
    %cst_102 = arith.constant 1.000000e+00 : f32
    %221 = vector.broadcast %cst_102 : f32 to vector<10x128xf32>
    %222 = arith.addf %220, %221 : vector<10x128xf32>
    %cst_103 = arith.constant 5.000000e-01 : f32
    %223 = vector.broadcast %cst_103 : f32 to vector<10x128xf32>
    %224 = arith.mulf %223, %222 : vector<10x128xf32>
    %225 = vector.extract_strided_slice %214 {offsets = [0, 256], sizes = [10, 128], strides = [1, 1]} : vector<10x512xf32> to vector<10x128xf32>
    %226 = vector.extract_strided_slice %214 {offsets = [0, 384], sizes = [10, 128], strides = [1, 1]} : vector<10x512xf32> to vector<10x128xf32>
    %cst_104 = arith.constant 1.000000e+00 : f32
    %227 = vector.broadcast %cst_104 : f32 to vector<10x128xf32>
    %228 = arith.addf %226, %227 : vector<10x128xf32>
    %cst_105 = arith.constant 5.000000e-01 : f32
    %229 = vector.broadcast %cst_105 : f32 to vector<10x128xf32>
    %230 = arith.mulf %229, %228 : vector<10x128xf32>
    %231 = arith.mulf %224, %202 : vector<10x128xf32>
    %232 = arith.mulf %219, %225 : vector<10x128xf32>
    %233 = arith.addf %231, %232 : vector<10x128xf32>
    %234 = math.tanh %233 : vector<10x128xf32>
    %235 = arith.mulf %230, %234 : vector<10x128xf32>
    %236 = arith.index_cast %c4_i32 : i32 to index
    %c0_106 = arith.constant 0 : index
    %c0_107 = arith.constant 0 : index
    %237 = vector.load %arg9[%236, %c0_106, %c0_107] : memref<8x10x128xf32, #tpu.memory_space<vmem>>, vector<1x10x128xf32>
    %238 = vector.shape_cast %237 : vector<1x10x128xf32> to vector<10x128xf32>
    %239 = vector.shape_cast %235 : vector<10x128xf32> to vector<1x10x128xf32>
    tpu.vector_store %arg9[%236, %c0_106, %c0_107], %239 {strides = array<i32>} : memref<8x10x128xf32, #tpu.memory_space<vmem>>, vector<1x10x128xf32>,
    %c5_i32 = arith.constant 5 : i32
    %240 = arith.index_cast %c5_i32 : i32 to index
    %c0_108 = arith.constant 0 : index
    %c0_109 = arith.constant 0 : index
    %241 = vector.load %arg8[%240, %c0_108, %c0_109] : memref<8x10x512xf32, #tpu.memory_space<vmem>>, vector<1x10x512xf32>
    %242 = vector.shape_cast %241 : vector<1x10x512xf32> to vector<10x512xf32>
    %cst_110 = arith.constant dense<0.000000e+00> : vector<10x512xf32>
    %243 = tpu.matmul %235, %82, %cst_110 {dimension_numbers = #tpu.dot_dimension_numbers<[1], [0], [0], [1], [0, 0, 1, 1], [], []>} : vector<10x128xf32>, vector<128x512xf32>, vector<10x512xf32> -> vector<10x512xf32>
    %244 = arith.addf %242, %243 : vector<10x512xf32>
    %245 = math.tanh %244 : vector<10x512xf32>
    %246 = vector.extract_strided_slice %245 {offsets = [0, 0], sizes = [10, 128], strides = [1, 1]} : vector<10x512xf32> to vector<10x128xf32>
    %cst_111 = arith.constant 1.000000e+00 : f32
    %247 = vector.broadcast %cst_111 : f32 to vector<10x128xf32>
    %248 = arith.addf %246, %247 : vector<10x128xf32>
    %cst_112 = arith.constant 5.000000e-01 : f32
    %249 = vector.broadcast %cst_112 : f32 to vector<10x128xf32>
    %250 = arith.mulf %249, %248 : vector<10x128xf32>
    %251 = vector.extract_strided_slice %245 {offsets = [0, 128], sizes = [10, 128], strides = [1, 1]} : vector<10x512xf32> to vector<10x128xf32>
    %cst_113 = arith.constant 1.000000e+00 : f32
    %252 = vector.broadcast %cst_113 : f32 to vector<10x128xf32>
    %253 = arith.addf %251, %252 : vector<10x128xf32>
    %cst_114 = arith.constant 5.000000e-01 : f32
    %254 = vector.broadcast %cst_114 : f32 to vector<10x128xf32>
    %255 = arith.mulf %254, %253 : vector<10x128xf32>
    %256 = vector.extract_strided_slice %245 {offsets = [0, 256], sizes = [10, 128], strides = [1, 1]} : vector<10x512xf32> to vector<10x128xf32>
    %257 = vector.extract_strided_slice %245 {offsets = [0, 384], sizes = [10, 128], strides = [1, 1]} : vector<10x512xf32> to vector<10x128xf32>
    %cst_115 = arith.constant 1.000000e+00 : f32
    %258 = vector.broadcast %cst_115 : f32 to vector<10x128xf32>
    %259 = arith.addf %257, %258 : vector<10x128xf32>
    %cst_116 = arith.constant 5.000000e-01 : f32
    %260 = vector.broadcast %cst_116 : f32 to vector<10x128xf32>
    %261 = arith.mulf %260, %259 : vector<10x128xf32>
    %262 = arith.mulf %255, %233 : vector<10x128xf32>
    %263 = arith.mulf %250, %256 : vector<10x128xf32>
    %264 = arith.addf %262, %263 : vector<10x128xf32>
    %265 = math.tanh %264 : vector<10x128xf32>
    %266 = arith.mulf %261, %265 : vector<10x128xf32>
    %267 = arith.index_cast %c5_i32 : i32 to index
    %c0_117 = arith.constant 0 : index
    %c0_118 = arith.constant 0 : index
    %268 = vector.load %arg9[%267, %c0_117, %c0_118] : memref<8x10x128xf32, #tpu.memory_space<vmem>>, vector<1x10x128xf32>
    %269 = vector.shape_cast %268 : vector<1x10x128xf32> to vector<10x128xf32>
    %270 = vector.shape_cast %266 : vector<10x128xf32> to vector<1x10x128xf32>
    tpu.vector_store %arg9[%267, %c0_117, %c0_118], %270 {strides = array<i32>} : memref<8x10x128xf32, #tpu.memory_space<vmem>>, vector<1x10x128xf32>,
    %c6_i32 = arith.constant 6 : i32
    %271 = arith.index_cast %c6_i32 : i32 to index
    %c0_119 = arith.constant 0 : index
    %c0_120 = arith.constant 0 : index
    %272 = vector.load %arg8[%271, %c0_119, %c0_120] : memref<8x10x512xf32, #tpu.memory_space<vmem>>, vector<1x10x512xf32>
    %273 = vector.shape_cast %272 : vector<1x10x512xf32> to vector<10x512xf32>
    %cst_121 = arith.constant dense<0.000000e+00> : vector<10x512xf32>
    %274 = tpu.matmul %266, %82, %cst_121 {dimension_numbers = #tpu.dot_dimension_numbers<[1], [0], [0], [1], [0, 0, 1, 1], [], []>} : vector<10x128xf32>, vector<128x512xf32>, vector<10x512xf32> -> vector<10x512xf32>
    %275 = arith.addf %273, %274 : vector<10x512xf32>
    %276 = math.tanh %275 : vector<10x512xf32>
    %277 = vector.extract_strided_slice %276 {offsets = [0, 0], sizes = [10, 128], strides = [1, 1]} : vector<10x512xf32> to vector<10x128xf32>
    %cst_122 = arith.constant 1.000000e+00 : f32
    %278 = vector.broadcast %cst_122 : f32 to vector<10x128xf32>
    %279 = arith.addf %277, %278 : vector<10x128xf32>
    %cst_123 = arith.constant 5.000000e-01 : f32
    %280 = vector.broadcast %cst_123 : f32 to vector<10x128xf32>
    %281 = arith.mulf %280, %279 : vector<10x128xf32>
    %282 = vector.extract_strided_slice %276 {offsets = [0, 128], sizes = [10, 128], strides = [1, 1]} : vector<10x512xf32> to vector<10x128xf32>
    %cst_124 = arith.constant 1.000000e+00 : f32
    %283 = vector.broadcast %cst_124 : f32 to vector<10x128xf32>
    %284 = arith.addf %282, %283 : vector<10x128xf32>
    %cst_125 = arith.constant 5.000000e-01 : f32
    %285 = vector.broadcast %cst_125 : f32 to vector<10x128xf32>
    %286 = arith.mulf %285, %284 : vector<10x128xf32>
    %287 = vector.extract_strided_slice %276 {offsets = [0, 256], sizes = [10, 128], strides = [1, 1]} : vector<10x512xf32> to vector<10x128xf32>
    %288 = vector.extract_strided_slice %276 {offsets = [0, 384], sizes = [10, 128], strides = [1, 1]} : vector<10x512xf32> to vector<10x128xf32>
    %cst_126 = arith.constant 1.000000e+00 : f32
    %289 = vector.broadcast %cst_126 : f32 to vector<10x128xf32>
    %290 = arith.addf %288, %289 : vector<10x128xf32>
    %cst_127 = arith.constant 5.000000e-01 : f32
    %291 = vector.broadcast %cst_127 : f32 to vector<10x128xf32>
    %292 = arith.mulf %291, %290 : vector<10x128xf32>
    %293 = arith.mulf %286, %264 : vector<10x128xf32>
    %294 = arith.mulf %281, %287 : vector<10x128xf32>
    %295 = arith.addf %293, %294 : vector<10x128xf32>
    %296 = math.tanh %295 : vector<10x128xf32>
    %297 = arith.mulf %292, %296 : vector<10x128xf32>
    %298 = arith.index_cast %c6_i32 : i32 to index
    %c0_128 = arith.constant 0 : index
    %c0_129 = arith.constant 0 : index
    %299 = vector.load %arg9[%298, %c0_128, %c0_129] : memref<8x10x128xf32, #tpu.memory_space<vmem>>, vector<1x10x128xf32>
    %300 = vector.shape_cast %299 : vector<1x10x128xf32> to vector<10x128xf32>
    %301 = vector.shape_cast %297 : vector<10x128xf32> to vector<1x10x128xf32>
    tpu.vector_store %arg9[%298, %c0_128, %c0_129], %301 {strides = array<i32>} : memref<8x10x128xf32, #tpu.memory_space<vmem>>, vector<1x10x128xf32>,
    %c7_i32 = arith.constant 7 : i32
    %302 = arith.index_cast %c7_i32 : i32 to index
    %c0_130 = arith.constant 0 : index
    %c0_131 = arith.constant 0 : index
    %303 = vector.load %arg8[%302, %c0_130, %c0_131] : memref<8x10x512xf32, #tpu.memory_space<vmem>>, vector<1x10x512xf32>
    %304 = vector.shape_cast %303 : vector<1x10x512xf32> to vector<10x512xf32>
    %cst_132 = arith.constant dense<0.000000e+00> : vector<10x512xf32>
    %305 = tpu.matmul %297, %82, %cst_132 {dimension_numbers = #tpu.dot_dimension_numbers<[1], [0], [0], [1], [0, 0, 1, 1], [], []>} : vector<10x128xf32>, vector<128x512xf32>, vector<10x512xf32> -> vector<10x512xf32>
    %306 = arith.addf %304, %305 : vector<10x512xf32>
    %307 = math.tanh %306 : vector<10x512xf32>
    %308 = vector.extract_strided_slice %307 {offsets = [0, 0], sizes = [10, 128], strides = [1, 1]} : vector<10x512xf32> to vector<10x128xf32>
    %cst_133 = arith.constant 1.000000e+00 : f32
    %309 = vector.broadcast %cst_133 : f32 to vector<10x128xf32>
    %310 = arith.addf %308, %309 : vector<10x128xf32>
    %cst_134 = arith.constant 5.000000e-01 : f32
    %311 = vector.broadcast %cst_134 : f32 to vector<10x128xf32>
    %312 = arith.mulf %311, %310 : vector<10x128xf32>
    %313 = vector.extract_strided_slice %307 {offsets = [0, 128], sizes = [10, 128], strides = [1, 1]} : vector<10x512xf32> to vector<10x128xf32>
    %cst_135 = arith.constant 1.000000e+00 : f32
    %314 = vector.broadcast %cst_135 : f32 to vector<10x128xf32>
    %315 = arith.addf %313, %314 : vector<10x128xf32>
    %cst_136 = arith.constant 5.000000e-01 : f32
    %316 = vector.broadcast %cst_136 : f32 to vector<10x128xf32>
    %317 = arith.mulf %316, %315 : vector<10x128xf32>
    %318 = vector.extract_strided_slice %307 {offsets = [0, 256], sizes = [10, 128], strides = [1, 1]} : vector<10x512xf32> to vector<10x128xf32>
    %319 = vector.extract_strided_slice %307 {offsets = [0, 384], sizes = [10, 128], strides = [1, 1]} : vector<10x512xf32> to vector<10x128xf32>
    %cst_137 = arith.constant 1.000000e+00 : f32
    %320 = vector.broadcast %cst_137 : f32 to vector<10x128xf32>
    %321 = arith.addf %319, %320 : vector<10x128xf32>
    %cst_138 = arith.constant 5.000000e-01 : f32
    %322 = vector.broadcast %cst_138 : f32 to vector<10x128xf32>
    %323 = arith.mulf %322, %321 : vector<10x128xf32>
    %324 = arith.mulf %317, %295 : vector<10x128xf32>
    %325 = arith.mulf %312, %318 : vector<10x128xf32>
    %326 = arith.addf %324, %325 : vector<10x128xf32>
    %327 = math.tanh %326 : vector<10x128xf32>
    %328 = arith.mulf %323, %327 : vector<10x128xf32>
    %329 = arith.index_cast %c7_i32 : i32 to index
    %c0_139 = arith.constant 0 : index
    %c0_140 = arith.constant 0 : index
    %330 = vector.load %arg9[%329, %c0_139, %c0_140] : memref<8x10x128xf32, #tpu.memory_space<vmem>>, vector<1x10x128xf32>
    %331 = vector.shape_cast %330 : vector<1x10x128xf32> to vector<10x128xf32>
    %332 = vector.shape_cast %328 : vector<10x128xf32> to vector<1x10x128xf32>
    tpu.vector_store %arg9[%329, %c0_139, %c0_140], %332 {strides = array<i32>} : memref<8x10x128xf32, #tpu.memory_space<vmem>>, vector<1x10x128xf32>,
    %c8_i32 = arith.constant 8 : i32
    %c0_141 = arith.constant 0 : index
    %c0_142 = arith.constant 0 : index
    %c0_143 = arith.constant 0 : index
    %333 = vector.load %arg9[%c0_141, %c0_142, %c0_143] : memref<8x10x128xf32, #tpu.memory_space<vmem>>, vector<8x1x128xf32>
    %334 = vector.shape_cast %333 : vector<8x1x128xf32> to vector<8x128xf32>
    %c0_144 = arith.constant 0 : index
    %c0_145 = arith.constant 0 : index
    %c0_146 = arith.constant 0 : index
    %335 = vector.load %arg3[%c0_144, %c0_145, %c0_146] : memref<10x128x128xf32, #tpu.memory_space<vmem>>, vector<1x128x128xf32>
    %336 = vector.shape_cast %335 : vector<1x128x128xf32> to vector<128x128xf32>
    %cst_147 = arith.constant dense<0.000000e+00> : vector<8x128xf32>
    %337 = tpu.matmul %334, %336, %cst_147 {dimension_numbers = #tpu.dot_dimension_numbers<[1], [0], [0], [1], [0, 0, 1, 1], [], []>} : vector<8x128xf32>, vector<128x128xf32>, vector<8x128xf32> -> vector<8x128xf32>
    %c0_148 = arith.constant 0 : index
    %c1_149 = arith.constant 1 : index
    %c0_150 = arith.constant 0 : index
    %338 = vector.load %arg9[%c0_148, %c1_149, %c0_150] : memref<8x10x128xf32, #tpu.memory_space<vmem>>, vector<8x1x128xf32>
    %339 = vector.shape_cast %338 : vector<8x1x128xf32> to vector<8x128xf32>
    %c1_151 = arith.constant 1 : index
    %c0_152 = arith.constant 0 : index
    %c0_153 = arith.constant 0 : index
    %340 = vector.load %arg3[%c1_151, %c0_152, %c0_153] : memref<10x128x128xf32, #tpu.memory_space<vmem>>, vector<1x128x128xf32>
    %341 = vector.shape_cast %340 : vector<1x128x128xf32> to vector<128x128xf32>
    %cst_154 = arith.constant dense<0.000000e+00> : vector<8x128xf32>
    %342 = tpu.matmul %339, %341, %cst_154 {dimension_numbers = #tpu.dot_dimension_numbers<[1], [0], [0], [1], [0, 0, 1, 1], [], []>} : vector<8x128xf32>, vector<128x128xf32>, vector<8x128xf32> -> vector<8x128xf32>
    %c0_155 = arith.constant 0 : index
    %c2_156 = arith.constant 2 : index
    %c0_157 = arith.constant 0 : index
    %343 = vector.load %arg9[%c0_155, %c2_156, %c0_157] : memref<8x10x128xf32, #tpu.memory_space<vmem>>, vector<8x1x128xf32>
    %344 = vector.shape_cast %343 : vector<8x1x128xf32> to vector<8x128xf32>
    %c2_158 = arith.constant 2 : index
    %c0_159 = arith.constant 0 : index
    %c0_160 = arith.constant 0 : index
    %345 = vector.load %arg3[%c2_158, %c0_159, %c0_160] : memref<10x128x128xf32, #tpu.memory_space<vmem>>, vector<1x128x128xf32>
    %346 = vector.shape_cast %345 : vector<1x128x128xf32> to vector<128x128xf32>
    %cst_161 = arith.constant dense<0.000000e+00> : vector<8x128xf32>
    %347 = tpu.matmul %344, %346, %cst_161 {dimension_numbers = #tpu.dot_dimension_numbers<[1], [0], [0], [1], [0, 0, 1, 1], [], []>} : vector<8x128xf32>, vector<128x128xf32>, vector<8x128xf32> -> vector<8x128xf32>
    %c0_162 = arith.constant 0 : index
    %c3_163 = arith.constant 3 : index
    %c0_164 = arith.constant 0 : index
    %348 = vector.load %arg9[%c0_162, %c3_163, %c0_164] : memref<8x10x128xf32, #tpu.memory_space<vmem>>, vector<8x1x128xf32>
    %349 = vector.shape_cast %348 : vector<8x1x128xf32> to vector<8x128xf32>
    %c3_165 = arith.constant 3 : index
    %c0_166 = arith.constant 0 : index
    %c0_167 = arith.constant 0 : index
    %350 = vector.load %arg3[%c3_165, %c0_166, %c0_167] : memref<10x128x128xf32, #tpu.memory_space<vmem>>, vector<1x128x128xf32>
    %351 = vector.shape_cast %350 : vector<1x128x128xf32> to vector<128x128xf32>
    %cst_168 = arith.constant dense<0.000000e+00> : vector<8x128xf32>
    %352 = tpu.matmul %349, %351, %cst_168 {dimension_numbers = #tpu.dot_dimension_numbers<[1], [0], [0], [1], [0, 0, 1, 1], [], []>} : vector<8x128xf32>, vector<128x128xf32>, vector<8x128xf32> -> vector<8x128xf32>
    %c0_169 = arith.constant 0 : index
    %c4_170 = arith.constant 4 : index
    %c0_171 = arith.constant 0 : index
    %353 = vector.load %arg9[%c0_169, %c4_170, %c0_171] : memref<8x10x128xf32, #tpu.memory_space<vmem>>, vector<8x1x128xf32>
    %354 = vector.shape_cast %353 : vector<8x1x128xf32> to vector<8x128xf32>
    %c4_172 = arith.constant 4 : index
    %c0_173 = arith.constant 0 : index
    %c0_174 = arith.constant 0 : index
    %355 = vector.load %arg3[%c4_172, %c0_173, %c0_174] : memref<10x128x128xf32, #tpu.memory_space<vmem>>, vector<1x128x128xf32>
    %356 = vector.shape_cast %355 : vector<1x128x128xf32> to vector<128x128xf32>
    %cst_175 = arith.constant dense<0.000000e+00> : vector<8x128xf32>
    %357 = tpu.matmul %354, %356, %cst_175 {dimension_numbers = #tpu.dot_dimension_numbers<[1], [0], [0], [1], [0, 0, 1, 1], [], []>} : vector<8x128xf32>, vector<128x128xf32>, vector<8x128xf32> -> vector<8x128xf32>
    %c0_176 = arith.constant 0 : index
    %c5_177 = arith.constant 5 : index
    %c0_178 = arith.constant 0 : index
    %358 = vector.load %arg9[%c0_176, %c5_177, %c0_178] : memref<8x10x128xf32, #tpu.memory_space<vmem>>, vector<8x1x128xf32>
    %359 = vector.shape_cast %358 : vector<8x1x128xf32> to vector<8x128xf32>
    %c5_179 = arith.constant 5 : index
    %c0_180 = arith.constant 0 : index
    %c0_181 = arith.constant 0 : index
    %360 = vector.load %arg3[%c5_179, %c0_180, %c0_181] : memref<10x128x128xf32, #tpu.memory_space<vmem>>, vector<1x128x128xf32>
    %361 = vector.shape_cast %360 : vector<1x128x128xf32> to vector<128x128xf32>
    %cst_182 = arith.constant dense<0.000000e+00> : vector<8x128xf32>
    %362 = tpu.matmul %359, %361, %cst_182 {dimension_numbers = #tpu.dot_dimension_numbers<[1], [0], [0], [1], [0, 0, 1, 1], [], []>} : vector<8x128xf32>, vector<128x128xf32>, vector<8x128xf32> -> vector<8x128xf32>
    %c0_183 = arith.constant 0 : index
    %c6_184 = arith.constant 6 : index
    %c0_185 = arith.constant 0 : index
    %363 = vector.load %arg9[%c0_183, %c6_184, %c0_185] : memref<8x10x128xf32, #tpu.memory_space<vmem>>, vector<8x1x128xf32>
    %364 = vector.shape_cast %363 : vector<8x1x128xf32> to vector<8x128xf32>
    %c6_186 = arith.constant 6 : index
    %c0_187 = arith.constant 0 : index
    %c0_188 = arith.constant 0 : index
    %365 = vector.load %arg3[%c6_186, %c0_187, %c0_188] : memref<10x128x128xf32, #tpu.memory_space<vmem>>, vector<1x128x128xf32>
    %366 = vector.shape_cast %365 : vector<1x128x128xf32> to vector<128x128xf32>
    %cst_189 = arith.constant dense<0.000000e+00> : vector<8x128xf32>
    %367 = tpu.matmul %364, %366, %cst_189 {dimension_numbers = #tpu.dot_dimension_numbers<[1], [0], [0], [1], [0, 0, 1, 1], [], []>} : vector<8x128xf32>, vector<128x128xf32>, vector<8x128xf32> -> vector<8x128xf32>
    %c0_190 = arith.constant 0 : index
    %c7_191 = arith.constant 7 : index
    %c0_192 = arith.constant 0 : index
    %368 = vector.load %arg9[%c0_190, %c7_191, %c0_192] : memref<8x10x128xf32, #tpu.memory_space<vmem>>, vector<8x1x128xf32>
    %369 = vector.shape_cast %368 : vector<8x1x128xf32> to vector<8x128xf32>
    %c7_193 = arith.constant 7 : index
    %c0_194 = arith.constant 0 : index
    %c0_195 = arith.constant 0 : index
    %370 = vector.load %arg3[%c7_193, %c0_194, %c0_195] : memref<10x128x128xf32, #tpu.memory_space<vmem>>, vector<1x128x128xf32>
    %371 = vector.shape_cast %370 : vector<1x128x128xf32> to vector<128x128xf32>
    %cst_196 = arith.constant dense<0.000000e+00> : vector<8x128xf32>
    %372 = tpu.matmul %369, %371, %cst_196 {dimension_numbers = #tpu.dot_dimension_numbers<[1], [0], [0], [1], [0, 0, 1, 1], [], []>} : vector<8x128xf32>, vector<128x128xf32>, vector<8x128xf32> -> vector<8x128xf32>
    %c0_197 = arith.constant 0 : index
    %c8 = arith.constant 8 : index
    %c0_198 = arith.constant 0 : index
    %373 = vector.load %arg9[%c0_197, %c8, %c0_198] : memref<8x10x128xf32, #tpu.memory_space<vmem>>, vector<8x1x128xf32>
    %374 = vector.shape_cast %373 : vector<8x1x128xf32> to vector<8x128xf32>
    %c8_199 = arith.constant 8 : index
    %c0_200 = arith.constant 0 : index
    %c0_201 = arith.constant 0 : index
    %375 = vector.load %arg3[%c8_199, %c0_200, %c0_201] : memref<10x128x128xf32, #tpu.memory_space<vmem>>, vector<1x128x128xf32>
    %376 = vector.shape_cast %375 : vector<1x128x128xf32> to vector<128x128xf32>
    %cst_202 = arith.constant dense<0.000000e+00> : vector<8x128xf32>
    %377 = tpu.matmul %374, %376, %cst_202 {dimension_numbers = #tpu.dot_dimension_numbers<[1], [0], [0], [1], [0, 0, 1, 1], [], []>} : vector<8x128xf32>, vector<128x128xf32>, vector<8x128xf32> -> vector<8x128xf32>
    %c0_203 = arith.constant 0 : index
    %c9 = arith.constant 9 : index
    %c0_204 = arith.constant 0 : index
    %378 = vector.load %arg9[%c0_203, %c9, %c0_204] : memref<8x10x128xf32, #tpu.memory_space<vmem>>, vector<8x1x128xf32>
    %379 = vector.shape_cast %378 : vector<8x1x128xf32> to vector<8x128xf32>
    %c9_205 = arith.constant 9 : index
    %c0_206 = arith.constant 0 : index
    %c0_207 = arith.constant 0 : index
    %380 = vector.load %arg3[%c9_205, %c0_206, %c0_207] : memref<10x128x128xf32, #tpu.memory_space<vmem>>, vector<1x128x128xf32>
    %381 = vector.shape_cast %380 : vector<1x128x128xf32> to vector<128x128xf32>
    %cst_208 = arith.constant dense<0.000000e+00> : vector<8x128xf32>
    %382 = tpu.matmul %379, %381, %cst_208 {dimension_numbers = #tpu.dot_dimension_numbers<[1], [0], [0], [1], [0, 0, 1, 1], [], []>} : vector<8x128xf32>, vector<128x128xf32>, vector<8x128xf32> -> vector<8x128xf32>
    %383 = arith.addf %337, %342 : vector<8x128xf32>
    %384 = arith.addf %347, %352 : vector<8x128xf32>
    %385 = arith.addf %357, %362 : vector<8x128xf32>
    %386 = arith.addf %367, %372 : vector<8x128xf32>
    %387 = arith.addf %377, %382 : vector<8x128xf32>
    %388 = arith.addf %383, %384 : vector<8x128xf32>
    %389 = arith.addf %385, %386 : vector<8x128xf32>
    %390 = arith.addf %388, %389 : vector<8x128xf32>
    %391 = arith.addf %390, %387 : vector<8x128xf32>
    %c0_209 = arith.constant 0 : index
    %c0_210 = arith.constant 0 : index
    %392 = vector.load %arg4[%c0_209, %c0_210] : memref<1x128xf32, #tpu.memory_space<vmem>>, vector<1x128xf32>
    %393 = vector.broadcast %392 : vector<1x128xf32> to vector<8x128xf32>
    %394 = arith.addf %391, %393 : vector<8x128xf32>
    %cst_211 = arith.constant dense<0xFF800000> : vector<8xf32>
    %395 = vector.multi_reduction <maximumf>, %394, %cst_211 [1] : vector<8x128xf32> to vector<8xf32>
    %396 = vector.shape_cast %395 : vector<8xf32> to vector<8x1xf32>
    %397 = vector.broadcast %396 : vector<8x1xf32> to vector<8x128xf32>
    %398 = arith.subf %394, %397 : vector<8x128xf32>
    %399 = math.exp %398 : vector<8x128xf32>
    %cst_212 = arith.constant dense<0.000000e+00> : vector<8xf32>
    %400 = vector.multi_reduction <add>, %399, %cst_212 [1] : vector<8x128xf32> to vector<8xf32>
    %401 = vector.shape_cast %400 : vector<8xf32> to vector<8x1xf32>
    %402 = math.log %401 : vector<8x1xf32>
    %403 = vector.broadcast %402 : vector<8x1xf32> to vector<8x128xf32>
    %404 = arith.subf %398, %403 : vector<8x128xf32>
    %c0_213 = arith.constant 0 : index
    %c0_214 = arith.constant 0 : index
    %405 = vector.load %arg5[%c0_213, %c0_214] : memref<8x128xf32, #tpu.memory_space<vmem>>, vector<8x128xf32>
    tpu.vector_store %arg5[%c0_213, %c0_214], %404 {strides = array<i32>} : memref<8x128xf32, #tpu.memory_space<vmem>>, vector<8x128xf32>,
    %c0_215 = arith.constant 0 : index
    %c0_216 = arith.constant 0 : index
    %406 = vector.load %arg6[%c0_215, %c0_216] : memref<10x128xf32, #tpu.memory_space<vmem>>, vector<10x128xf32>
    tpu.vector_store %arg6[%c0_215, %c0_216], %328 {strides = array<i32>} : memref<10x128xf32, #tpu.memory_space<vmem>>, vector<10x128xf32>,
    %c0_217 = arith.constant 0 : index
    %c0_218 = arith.constant 0 : index
    %407 = vector.load %arg7[%c0_217, %c0_218] : memref<10x128xf32, #tpu.memory_space<vmem>>, vector<10x128xf32>
    tpu.vector_store %arg7[%c0_217, %c0_218], %326 {strides = array<i32>} : memref<10x128xf32, #tpu.memory_space<vmem>>, vector<10x128xf32>,
    return
  }
}

</mosaic_0001>

<bundles_post_ra>
// kernel: model_forward.1
= control target key start
LH: loop header
LB: loop body
LE: loop exit
PB: predicated region body
PF: predicated region fallthrough
CT: control target
= control target key end

     0   :  { %13 = vsyncpa [#allocation5], 0  ;;  %s7892_s0 = inlined_call_operand.vmem [shape: s32[8,10,1], index: 0, kind: input, shape index: {}]   ;;  %s7893_s1 = inlined_call_operand.hbm [shape: f32[128,512], index: 1, kind: input, shape index: {}]   ;;  %s7894_s2 = inlined_call_operand.hbm [shape: f32[128,512], index: 2, kind: input, shape index: {}]   ;;  %s7895_s3 = inlined_call_operand.hbm [shape: f32[10,128,128], index: 3, kind: input, shape index: {}]   ;;  %s7896_s4 = inlined_call_operand.vmem [shape: f32[1,128], index: 4, kind: input, shape index: {}]   ;;  %s7897_s5 = inlined_call_operand.hbm [shape: f32[8,128], index: 5, kind: output, shape index: {0}]   ;;  %s7898_s6 = inlined_call_operand.vmem [shape: f32[10,128], index: 6, kind: output, shape index: {1}]   ;;  %s7899_s7 = inlined_call_operand.vmem [shape: f32[10,128], index: 7, kind: output, shape index: {2}]  }
   0x1   :  { %14 = vsyncpa [#allocation8], 0 }
   0x2   :  { %15 = vsyncpa [#allocation6], 0  ;;  %s6629_s24 = smov [#allocation7]   ;;  %s6630_s26 = smov [#allocation4]  }
   0x3   :  { %s35_s25 = sshll.u32 %s6629_s24, 4  ;;  %s23_s27 = sshll.u32 %s6630_s26, 4  ;;  %s36_s25 = int_to_ptr.vmem [resolvable:$true] %s35_s25  ;;  %s6682_s27 = int_to_ptr.vmem [resolvable:$true] %s23_s27 }
   0x4   :  { %s6535_s30 = scalar_lea.hbm %s7894_s2, 8192 }
   0x5   :  { %p6536_p0 = scmp.ne.s32.totalorder %s7894_s2, %s6535_s30  ;;  %p6539_p1 = scmp.lt.u32.totalorder %s6535_s30, %s7894_s2 }
   0x7   :  { %p6541_p2 = pnand %p6539_p1, %p6536_p0 }
   0x9   :  { %6544 = shalt.err (!%p6541_p2)
}
   0xa   :  { %s6545_s12 = scalar_lea.vmem %s36_s25, 8192  ;;  %p6550_p4 = scmp.lt.s32.totalorder %s36_s25, %s36_s25 }
   0xb   :  { %p6546_p3 = scmp.ne.s32.totalorder %s36_s25, %s6545_s12  ;;  %p6551_p5 = scmp.lt.s32.totalorder %s6545_s12, %s6545_s12 }
   0xd   :  { %p6552_p6 = por %p6551_p5, %p6550_p4 }
   0xf   :  { %p6553_p7 = pnand %p6552_p6, %p6546_p3 }
  0x11   :  { %6556 = shalt.err (!%p6553_p7)
}
  0x12   :  { %s6631_s13 = smov 512   ;;  %s6632_s14 = smov 32  }
  0x13   :  { %41 = dma.hbm_to_vmem [thread:$0]  %s7894_s2, 8192, %s36_s25, [#allocation8], %s6631_s13, %s6631_s13, %s6632_s14  }
  0x14   :  { %s6557_s19 = scalar_lea.hbm %s7893_s1, 8192 }
  0x15   :  { %p6558_p8 = scmp.ne.s32.totalorder %s7893_s1, %s6557_s19  ;;  %p6561_p9 = scmp.lt.u32.totalorder %s6557_s19, %s7893_s1 }
  0x17   :  { %p6563_p10 = pnand %p6561_p9, %p6558_p8 }
  0x19   :  { %6566 = shalt.err (!%p6563_p10)
}
  0x1a   :  { %s6567_s24 = scalar_lea.vmem %s6682_s27, 8192  ;;  %p6572_p12 = scmp.lt.s32.totalorder %s6682_s27, %s6682_s27 }
  0x1b   :  { %p6568_p11 = scmp.ne.s32.totalorder %s6682_s27, %s6567_s24  ;;  %p6573_p13 = scmp.lt.s32.totalorder %s6567_s24, %s6567_s24 }
  0x1d   :  { %p6574_p0 = por %p6573_p13, %p6572_p12 }
  0x1f   :  { %p6575_p1 = pnand %p6574_p0, %p6568_p11 }
  0x21   :  { %6578 = shalt.err (!%p6575_p1)
}
  0x22   :  { %29 = dma.hbm_to_vmem [thread:$0]  %s7893_s1, 8192, %s6682_s27, [#allocation5], %s6631_s13, %s6631_s13, %s6632_s14  }
  0x23   :  { %s6633_s26 = smov [#allocation9]   ;;  %s6579_s8 = scalar_lea.hbm %s7895_s3, 20480 }
  0x24   :  { %s47_s28 = sshll.u32 %s6633_s26, 4  ;;  %p6580_p2 = scmp.ne.s32.totalorder %s7895_s3, %s6579_s8  ;;  %s48_s28 = int_to_ptr.vmem [resolvable:$true] %s47_s28 }
  0x25   :  { %p6583_p3 = scmp.lt.u32.totalorder %s6579_s8, %s7895_s3 }
  0x27   :  { %p6585_p4 = pnand %p6583_p3, %p6580_p2 }
  0x29   :  { %6588 = shalt.err (!%p6585_p4)
}
  0x2a   :  { %s6589_s15 = scalar_lea.vmem %s48_s28, 20480  ;;  %p6594_p6 = scmp.lt.s32.totalorder %s48_s28, %s48_s28 }
  0x2b   :  { %p6590_p5 = scmp.ne.s32.totalorder %s48_s28, %s6589_s15  ;;  %p6595_p7 = scmp.lt.s32.totalorder %s6589_s15, %s6589_s15 }
  0x2d   :  { %p6596_p8 = por %p6595_p7, %p6594_p6 }
  0x2f   :  { %p6597_p9 = pnand %p6596_p8, %p6590_p5 }
  0x31   :  { %6600 = shalt.err (!%p6597_p9)
}
  0x32   :  { %s6634_s1 = smov 128   ;;  %s6635_s27 = smov 8  }
  0x33   :  { %53 = dma.hbm_to_vmem [thread:$0]  %s7895_s3, 20480, %s48_s28, [#allocation8], %s6634_s1, %s6634_s1, %s6635_s27  }
  0x34   :  { %6623 = dma.done.wait [#allocation5], 8192  }
  0x35   :  { %6624 = vsyncadd [#allocation5], 4294959104 }
  0x36   :  { %6625 = dma.done.wait [#allocation8], 28672  }
  0x37   :  { %6626 = vsyncadd [#allocation8], 4294938624  ;;  %v6636_v0 = vmov 0   ;;  %v131_v1 = vld [vmem:[%s7892_s0] sm:$0xff]  ;;  %v4483_v2 = vld [vmem:[%s7892_s0 + $0x10] sm:$0xff]  ;;  %v6637_v5 = vmov 0.0  }
  0x38   :  { %6369 = vset.pattern.permute.xlu0 %v6636_v0  ;;  %6370 = vset.pattern.permute.xlu1 %v6636_v0  ;;  %v132_v3 = vld [vmem:[%s7892_s0 + $0x8] sm:$0x3]  ;;  %v4484_v4 = vld [vmem:[%s7892_s0 + $0x18] sm:$0x3]  ;;  %v4491_v6 = vld [vmem:[%s7892_s0 + $0x20] sm:$0xff]  ;;  %s6641_s28 = smov [#allocation10]  }
  0x39   :  { %134 = vperm.xlu0 %6369, %v131_v1   ;;  %311 = vperm.xlu1 %6370, %v4483_v2   ;;  %v4492_v7 = vld [vmem:[%s7892_s0 + $0x28] sm:$0x3]  ;;  %v68_v11 = vld [vmem:[#allocation4 + $0x18] sm:$0xff]  ;;  %v65_v13 = vld [vmem:[#allocation4] sm:$0xff]  ;;  %s4459_s29 = sshll.u32 %s6641_s28, 4  ;;  %s4460_s29 = int_to_ptr.vmem [resolvable:$true] %s4459_s29 }
  0x3a   :  { %209 = vmatprep.mubr.f32.mxu0 %v6637_v5  ;;  %286 = vmatprep.mubr.f32.mxu1 %v6637_v5  ;;  %v66_v8 = vld [vmem:[#allocation4 + $0x8] sm:$0xff]  ;;  %v72_v12 = vld [vmem:[#allocation4 + $0x38] sm:$0xff]  ;;  %v69_v15 = vld [vmem:[#allocation4 + $0x20] sm:$0xff]  ;;  %s6601_s30 = scalar_lea.vmem %s4460_s29, 128  ;;  %p6606_p11 = scmp.lt.s32.totalorder %s4460_s29, %s4460_s29 }
  0x3b   :  { %v70_v9 = vld [vmem:[#allocation4 + $0x28] sm:$0xff]  ;;  %v6747_v14 = vpack.c.bf16 %v72_v12, %v68_v11  ;;  %v67_v16 = vld [vmem:[#allocation4 + $0x10] sm:$0xff]  ;;  %v4500_v19 = vld [vmem:[%s7892_s0 + $0x38] sm:$0x3]  ;;  %v6756_v20 = vpack.c.bf16 %v69_v15, %v65_v13  ;;  %p6602_p10 = scmp.ne.s32.totalorder %s4460_s29, %s6601_s30  ;;  %p6607_p12 = scmp.lt.s32.totalorder %s6601_s30, %s6601_s30 }
  0x3c   :  { %v6745_v10 = vpack.c.bf16 %v70_v9, %v66_v8  ;;  %v71_v17 = vld [vmem:[#allocation4 + $0x30] sm:$0xff]  ;;  %v74_v22 = vld [vmem:[#allocation4 + $0x48] sm:$0xff]  ;;  %v76_v24 = vld [vmem:[#allocation4 + $0x58] sm:$0xff] }
  0x3d   :  { %137 = vperm.xlu0 %6369, %v132_v3   ;;  %314 = vperm.xlu1 %6370, %v4484_v4   ;;  %v4499_v18 = vld [vmem:[%s7892_s0 + $0x30] sm:$0xff]  ;;  %v6758_v21 = vpack.c.bf16 %v71_v17, %v67_v16  ;;  %v78_v23 = vld [vmem:[#allocation4 + $0x68] sm:$0xff]  ;;  %v80_v26 = vld [vmem:[#allocation4 + $0x78] sm:$0xff]  ;;  %p6608_p13 = por %p6607_p12, %p6606_p11 }
  0x3e   :  { %5061 = vmatprep.subr.bf16.mxu0 %v6745_v10  ;;  %v6760_v25 = vpack.c.bf16 %v78_v23, %v74_v22  ;;  %v73_v27 = vld [vmem:[#allocation4 + $0x40] sm:$0xff]  ;;  %5093 = vmatprep.subr.bf16.mxu1 %v6747_v14  ;;  %v6764_v29 = vpack.c.bf16 %v80_v26, %v76_v24  ;;  %v75_v31 = vld [vmem:[#allocation4 + $0x50] sm:$0xff]  ;;  %v82_v33 = vld [vmem:[#allocation4 + $0x88] sm:$0xff] }
  0x3f   :  { %v77_v28 = vld [vmem:[#allocation4 + $0x60] sm:$0xff]  ;;  %5063 = vmatpush1.bf16.msra.mxu0 %v6756_v20  ;;  %v79_v32 = vld [vmem:[#allocation4 + $0x70] sm:$0xff]  ;;  %5095 = vmatpush1.bf16.msra.mxu1 %v6758_v21  ;;  %v86_v35 = vld [vmem:[#allocation4 + $0xa8] sm:$0xff]  ;;  %p6609_p0 = pnand %p6608_p13, %p6602_p10 }
  0x40   :  { %v6766_v30 = vpack.c.bf16 %v77_v28, %v73_v27  ;;  %5065 = vmatprep.subr.bf16.mxu0 %v6760_v25  ;;  %v6770_v34 = vpack.c.bf16 %v79_v32, %v75_v31  ;;  %v84_v36 = vld [vmem:[#allocation4 + $0x98] sm:$0xff]  ;;  %v4507_v38 = vld [vmem:[%s7892_s0 + $0x40] sm:$0xff]  ;;  %5097 = vmatprep.subr.bf16.mxu1 %v6764_v29  ;;  %v6776_v39 = vpack.c.bf16 %v86_v35, %v82_v33  ;;  %v83_v43 = vld [vmem:[#allocation4 + $0x90] sm:$0xff] }
  0x41   :  { %489 = vperm.xlu0 %6369, %v4491_v6   ;;  %492 = vperm.xlu1 %6370, %v4492_v7   ;;  %v88_v37 = vld [vmem:[#allocation4 + $0xb8] sm:$0xff]  ;;  %v81_v41 = vld [vmem:[#allocation4 + $0x80] sm:$0xff]  ;;  %v87_v44 = vld [vmem:[#allocation4 + $0xb0] sm:$0xff] }
  0x42   :  { %v6778_v40 = vpack.c.bf16 %v88_v37, %v84_v36  ;;  %v85_v42 = vld [vmem:[#allocation4 + $0xa0] sm:$0xff]  ;;  %v90_v45 = vld [vmem:[#allocation4 + $0xc8] sm:$0xff]  ;;  %v92_v49 = vld [vmem:[#allocation4 + $0xd8] sm:$0xff]  ;;  %v6788_v51 = vpack.c.bf16 %v87_v44, %v83_v43 }
  0x43   :  { %v94_v46 = vld [vmem:[#allocation4 + $0xe8] sm:$0xff]  ;;  %5067 = vmatpush1.bf16.msra.mxu0 %v6766_v30  ;;  %v6784_v48 = vpack.c.bf16 %v85_v42, %v81_v41  ;;  %v96_v50 = vld [vmem:[#allocation4 + $0xf8] sm:$0xff]  ;;  %5099 = vmatpush1.bf16.msra.mxu1 %v6770_v34  ;;  %v89_v53 = vld [vmem:[#allocation4 + $0xc0] sm:$0xff] }
  0x44   :  { %v4508_v47 = vld [vmem:[%s7892_s0 + $0x48] sm:$0x3]  ;;  %5069 = vmatprep.subr.bf16.mxu0 %v6776_v39  ;;  %v6790_v52 = vpack.c.bf16 %v94_v46, %v90_v45  ;;  %v93_v54 = vld [vmem:[#allocation4 + $0xe0] sm:$0xff]  ;;  %v91_v55 = vld [vmem:[#allocation4 + $0xd0] sm:$0xff]  ;;  %5101 = vmatprep.subr.bf16.mxu1 %v6778_v40  ;;  %v6793_v56 = vpack.c.bf16 %v96_v50, %v92_v49 }
  0x45   :  { %667 = vperm.xlu0 %6369, %v4499_v18   ;;  %670 = vperm.xlu1 %6370, %v4500_v19   ;;  %v95_v57 = vld [vmem:[#allocation4 + $0xf0] sm:$0xff]  ;;  %v98_v58 = vld [vmem:[#allocation4 + $0x108] sm:$0xff]  ;;  %v100_v60 = vld [vmem:[#allocation4 + $0x118] sm:$0xff]  ;;  %v6802_v0 = vpack.c.bf16 %v93_v54, %v89_v53 }
  0x46   :  { %v102_v59 = vld [vmem:[#allocation4 + $0x128] sm:$0xff]  ;;  %v104_v61 = vld [vmem:[#allocation4 + $0x138] sm:$0xff]  ;;  %v4515_v62 = vld [vmem:[%s7892_s0 + $0x50] sm:$0xff]  ;;  %v6806_v1 = vpack.c.bf16 %v95_v57, %v91_v55 }
  0x47   :  { %v4516_v63 = vld [vmem:[%s7892_s0 + $0x58] sm:$0x3]  ;;  %5071 = vmatpush1.bf16.msra.mxu0 %v6784_v48  ;;  %5103 = vmatpush1.bf16.msra.mxu1 %v6788_v51  ;;  %v6808_v2 = vpack.c.bf16 %v102_v59, %v98_v58  ;;  %v97_v3 = vld [vmem:[#allocation4 + $0x100] sm:$0xff]  ;;  %v99_v6 = vld [vmem:[#allocation4 + $0x110] sm:$0xff]  ;;  %v6811_v7 = vpack.c.bf16 %v104_v61, %v100_v60 }
  0x48   :  { %5073 = vmatprep.subr.bf16.mxu0 %v6790_v52  ;;  %v101_v4 = vld [vmem:[#allocation4 + $0x120] sm:$0xff]  ;;  %5105 = vmatprep.subr.bf16.mxu1 %v6793_v56  ;;  %v103_v8 = vld [vmem:[#allocation4 + $0x130] sm:$0xff]  ;;  %v106_v9 = vld [vmem:[#allocation4 + $0x148] sm:$0xff] }
  0x49   :  { %845 = vperm.xlu0 %6369, %v4507_v38   ;;  %848 = vperm.xlu1 %6370, %v4508_v47   ;;  %v110_v11 = vld [vmem:[#allocation4 + $0x168] sm:$0xff]  ;;  %v108_v12 = vld [vmem:[#allocation4 + $0x158] sm:$0xff]  ;;  %v4523_v15 = vld [vmem:[%s7892_s0 + $0x60] sm:$0xff]  ;;  %v6820_v17 = vpack.c.bf16 %v101_v4, %v97_v3  ;;  %v6824_v18 = vpack.c.bf16 %v103_v8, %v99_v6  ;;  %v129_v4 = vlaneseq }
  0x4a   :  { %v112_v13 = vld [vmem:[#allocation4 + $0x178] sm:$0xff]  ;;  %v4524_v16 = vld [vmem:[%s7892_s0 + $0x68] sm:$0x3]  ;;  %v6826_v19 = vpack.c.bf16 %v110_v11, %v106_v9  ;;  %v105_v22 = vld [vmem:[#allocation4 + $0x140] sm:$0xff]  ;;  %v6638_v9 = vmov 1.0  }
  0x4b   :  { %5075 = vmatpush1.bf16.msra.mxu0 %v6802_v0  ;;  %5107 = vmatpush1.bf16.msra.mxu1 %v6806_v1  ;;  %v109_v23 = vld [vmem:[#allocation4 + $0x160] sm:$0xff]  ;;  %v107_v24 = vld [vmem:[#allocation4 + $0x150] sm:$0xff]  ;;  %v6829_v26 = vpack.c.bf16 %v112_v13, %v108_v12  ;;  %v114_v28 = vld [vmem:[#allocation4 + $0x188] sm:$0xff]  ;;  %v6873_v6 = vand.u32 127, %v129_v4 }
  0x4c   :  { %5077 = vmatprep.subr.bf16.mxu0 %v6808_v2  ;;  %5109 = vmatprep.subr.bf16.mxu1 %v6811_v7  ;;  %v111_v27 = vld [vmem:[#allocation4 + $0x170] sm:$0xff]  ;;  %v118_v31 = vld [vmem:[#allocation4 + $0x1a8] sm:$0xff]  ;;  %v116_v32 = vld [vmem:[#allocation4 + $0x198] sm:$0xff]  ;;  %v6838_v37 = vpack.c.bf16 %v109_v23, %v105_v22 }
  0x4d   :  { %1023 = vperm.xlu0 %6369, %v4515_v62   ;;  %1026 = vperm.xlu1 %6370, %v4516_v63   ;;  %v120_v33 = vld [vmem:[#allocation4 + $0x1b8] sm:$0xff]  ;;  %v4531_v35 = vld [vmem:[%s7892_s0 + $0x70] sm:$0xff]  ;;  %v6842_v38 = vpack.c.bf16 %v111_v27, %v107_v24  ;;  %v6844_v41 = vpack.c.bf16 %v118_v31, %v114_v28  ;;  %v113_v42 = vld [vmem:[#allocation4 + $0x180] sm:$0xff] }
  0x4e   :  { %v4532_v36 = vld [vmem:[%s7892_s0 + $0x78] sm:$0x3]  ;;  %v117_v43 = vld [vmem:[#allocation4 + $0x1a0] sm:$0xff]  ;;  %v115_v44 = vld [vmem:[#allocation4 + $0x190] sm:$0xff]  ;;  %v6847_v45 = vpack.c.bf16 %v120_v33, %v116_v32 }
  0x4f   :  { %5079 = vmatpush1.bf16.msra.mxu0 %v6820_v17  ;;  %5111 = vmatpush1.bf16.msra.mxu1 %v6824_v18  ;;  %v119_v46 = vld [vmem:[#allocation4 + $0x1b0] sm:$0xff]  ;;  %v122_v47 = vld [vmem:[#allocation4 + $0x1c8] sm:$0xff]  ;;  %v124_v50 = vld [vmem:[#allocation4 + $0x1d8] sm:$0xff]  ;;  %v6850_v54 = vpack.c.bf16 %v117_v43, %v113_v42 }
  0x50   :  { %5081 = vmatprep.subr.bf16.mxu0 %v6826_v19  ;;  %5113 = vmatprep.subr.bf16.mxu1 %v6829_v26  ;;  %v126_v49 = vld [vmem:[#allocation4 + $0x1e8] sm:$0xff]  ;;  %v128_v53 = vld [vmem:[#allocation4 + $0x1f8] sm:$0xff]  ;;  %v6854_v55 = vpack.c.bf16 %v119_v46, %v115_v44  ;;  %v121_v58 = vld [vmem:[#allocation4 + $0x1c0] sm:$0xff] }
  0x51   :  { %1201 = vperm.xlu0 %6369, %v4523_v15   ;;  %1204 = vperm.xlu1 %6370, %v4524_v16   ;;  %v6856_v57 = vpack.c.bf16 %v126_v49, %v122_v47  ;;  %v125_v59 = vld [vmem:[#allocation4 + $0x1e0] sm:$0xff]  ;;  %v6859_v60 = vpack.c.bf16 %v128_v53, %v124_v50  ;;  %v123_v61 = vld [vmem:[#allocation4 + $0x1d0] sm:$0xff]  ;;  %v1574_v43 = vld [vmem:[#allocation7 + $0xa8] sm:$0xff] }
  0x52   :  { %v127_v62 = vld [vmem:[#allocation4 + $0x1f0] sm:$0xff]  ;;  %v6862_v63 = vpack.c.bf16 %v125_v59, %v121_v58  ;;  %v1572_v44 = vld [vmem:[#allocation7 + $0x98] sm:$0xff]  ;;  %v1569_v50 = vld [vmem:[#allocation7 + $0x80] sm:$0xff] }
  0x53   :  { %5083 = vmatpush1.bf16.msra.mxu0 %v6838_v37  ;;  %5115 = vmatpush1.bf16.msra.mxu1 %v6842_v38  ;;  %v6866_v3 = vpack.c.bf16 %v127_v62, %v123_v61  ;;  %v1573_v53 = vld [vmem:[#allocation7 + $0xa0] sm:$0xff]  ;;  %v1575_v58 = vld [vmem:[#allocation7 + $0xb0] sm:$0xff]  ;;  %v1578_v59 = vld [vmem:[#allocation7 + $0xc8] sm:$0xff] }
  0x54   :  { %5085 = vmatprep.subr.bf16.mxu0 %v6844_v41  ;;  %5117 = vmatprep.subr.bf16.mxu1 %v6847_v45  ;;  %v1580_v61 = vld [vmem:[#allocation7 + $0xd8] sm:$0xff]  ;;  %v1577_v4 = vld [vmem:[#allocation7 + $0xc0] sm:$0xff] }
  0x55   :  { %1379 = vperm.xlu0 %6369, %v4531_v35   ;;  %1382 = vperm.xlu1 %6370, %v4532_v36   ;;  %v1565_v35 = vld [vmem:[#allocation7 + $0x60] sm:$0xff]  ;;  %v1563_v36 = vld [vmem:[#allocation7 + $0x50] sm:$0xff]  ;;  %v1584_v62 = vld [vmem:[#allocation7 + $0xf8] sm:$0xff] }
  0x57   :  { %5087 = vmatpush1.bf16.msra.mxu0 %v6850_v54  ;;  %5119 = vmatpush1.bf16.msra.mxu1 %v6854_v55 }
  0x58   :  { %5089 = vmatprep.subr.bf16.mxu0 %v6856_v57  ;;  %5121 = vmatprep.subr.bf16.mxu1 %v6859_v60 }
  0x5b   :  { %5091 = vmatpush1.bf16.msra.mxu0 %v6862_v63  ;;  %5123 = vmatpush1.bf16.msra.mxu1 %v6866_v3 }
  0x5c   :  { %5125 = vmatprep.subr.bf16.mxu0 %v6745_v10  ;;  %5157 = vmatprep.subr.bf16.mxu1 %v6747_v14 }
  0xb8   :  { %v135_v8 = vpop.permute.xlu0 %134  ;;  %v312_v12 = vpop.permute.xlu1 %311 }
  0xb9   :  { %vm139_vm0 = vcmp.eq.s32.totalorder %v6873_v6, %v135_v8  ;;  %vm316_vm2 = vcmp.eq.s32.totalorder %v6873_v6, %v312_v12  ;;  %v1579_v12 = vld [vmem:[#allocation7 + $0xd0] sm:$0xff] }
  0xba   :  { %4479 = vmatmul.mubr.msk.f32.vlgmr.msra.gmra.mrb[0].mxu0 %vm139_vm0, %v6638_v9  ;;  %4481 = vmatmul.mubr.msk.f32.vlgmr.msra.gmra.mrb[0].mxu1 %vm139_vm0, %v6638_v9  ;;  %vm3298_vm0 = vcmask 1041409  }
  0xbb   :  { %5127 = vmatpush1.bf16.msra.mxu0 %v6756_v20  ;;  %5159 = vmatpush1.bf16.msra.mxu1 %v6758_v21 }
  0xbc   :  { %v138_v11 = vpop.permute.xlu0 %137  ;;  %215 = vmatprep.mubr.f32.mxu0 %v6637_v5  ;;  %292 = vmatprep.mubr.f32.mxu1 %v6637_v5  ;;  %v315_v13 = vpop.permute.xlu1 %314 }
  0xbd   :  { %vm140_vm1 = vcmp.eq.s32.totalorder %v6873_v6, %v138_v11  ;;  %5129 = vmatprep.subr.bf16.mxu0 %v6760_v25  ;;  %5161 = vmatprep.subr.bf16.mxu1 %v6764_v29  ;;  %vm317_vm3 = vcmp.eq.s32.totalorder %v6873_v6, %v315_v13  ;;  %v7211_v11 = vpack.c.bf16 %v1584_v62, %v1580_v61  ;;  %v1586_v13 = vld [vmem:[#allocation7 + $0x108] sm:$0xff] }
  0xbe   :  { %4480 = vmatmul.mubr.msk.f32.gmra.mrb[2].mxu0 %vm140_vm1, %v6638_v9  ;;  %4482 = vmatmul.mubr.msk.f32.gmra.mrb[2].mxu1 %vm140_vm1, %v6638_v9  ;;  %vm3301_vm1 = vcmask 1042434  }
  0xbf   :  { %5131 = vmatpush1.bf16.msra.mxu0 %v6766_v30  ;;  %5163 = vmatpush1.bf16.msra.mxu1 %v6770_v34 }
  0xc0   :  { %5133 = vmatprep.subr.bf16.mxu0 %v6776_v39  ;;  %5165 = vmatprep.subr.bf16.mxu1 %v6778_v40  ;;  %v490_v15 = vpop.permute.xlu0 %489  ;;  %v493_v16 = vpop.permute.xlu1 %492 }
  0xc1   :  { %386 = vmatprep.mubr.f32.mxu0 %v6637_v5  ;;  %463 = vmatprep.mubr.f32.mxu1 %v6637_v5  ;;  %vm494_vm4 = vcmp.eq.s32.totalorder %v6873_v6, %v490_v15  ;;  %vm495_vm5 = vcmp.eq.s32.totalorder %v6873_v6, %v493_v16  ;;  %v1590_v15 = vld [vmem:[#allocation7 + $0x128] sm:$0xff]  ;;  %v1588_v16 = vld [vmem:[#allocation7 + $0x118] sm:$0xff] }
  0xc3   :  { %5135 = vmatpush1.bf16.msra.mxu0 %v6784_v48  ;;  %5167 = vmatpush1.bf16.msra.mxu1 %v6788_v51 }
  0xc4   :  { %5137 = vmatprep.subr.bf16.mxu0 %v6790_v52  ;;  %5169 = vmatprep.subr.bf16.mxu1 %v6793_v56  ;;  %v668_v22 = vpop.permute.xlu0 %667  ;;  %v671_v23 = vpop.permute.xlu1 %670 }
  0xc5   :  { %vm672_vm6 = vcmp.eq.s32.totalorder %v6873_v6, %v668_v22  ;;  %vm673_vm7 = vcmp.eq.s32.totalorder %v6873_v6, %v671_v23  ;;  %v1592_v22 = vld [vmem:[#allocation7 + $0x138] sm:$0xff] }
  0xc7   :  { %5139 = vmatpush1.bf16.msra.mxu0 %v6802_v0  ;;  %5171 = vmatpush1.bf16.msra.mxu1 %v6806_v1 }
  0xc8   :  { %5141 = vmatprep.subr.bf16.mxu0 %v6808_v2  ;;  %5173 = vmatprep.subr.bf16.mxu1 %v6811_v7  ;;  %v846_v24 = vpop.permute.xlu0 %845  ;;  %v849_v27 = vpop.permute.xlu1 %848 }
  0xc9   :  { %vm850_vm8 = vcmp.eq.s32.totalorder %v6873_v6, %v846_v24  ;;  %vm851_vm9 = vcmp.eq.s32.totalorder %v6873_v6, %v849_v27  ;;  %v1585_v27 = vld [vmem:[#allocation7 + $0x100] sm:$0xff] }
  0xcb   :  { %5143 = vmatpush1.bf16.msra.mxu0 %v6820_v17  ;;  %5175 = vmatpush1.bf16.msra.mxu1 %v6824_v18 }
  0xcc   :  { %5145 = vmatprep.subr.bf16.mxu0 %v6826_v19  ;;  %5177 = vmatprep.subr.bf16.mxu1 %v6829_v26  ;;  %v1024_v28 = vpop.permute.xlu0 %1023  ;;  %v1027_v31 = vpop.permute.xlu1 %1026 }
  0xcd   :  { %vm1028_vm10 = vcmp.eq.s32.totalorder %v6873_v6, %v1024_v28  ;;  %vm1029_vm11 = vcmp.eq.s32.totalorder %v6873_v6, %v1027_v31  ;;  %v1589_v28 = vld [vmem:[#allocation7 + $0x120] sm:$0xff]  ;;  %v7223_v31 = vpack.c.bf16 %v1590_v15, %v1586_v13 }
  0xcf   :  { %5147 = vmatpush1.bf16.msra.mxu0 %v6838_v37  ;;  %5179 = vmatpush1.bf16.msra.mxu1 %v6842_v38 }
  0xd0   :  { %5149 = vmatprep.subr.bf16.mxu0 %v6844_v41  ;;  %5181 = vmatprep.subr.bf16.mxu1 %v6847_v45  ;;  %v1202_v32 = vpop.permute.xlu0 %1201  ;;  %v1205_v33 = vpop.permute.xlu1 %1204 }
  0xd1   :  { %vm1206_vm12 = vcmp.eq.s32.totalorder %v6873_v6, %v1202_v32  ;;  %vm1207_vm13 = vcmp.eq.s32.totalorder %v6873_v6, %v1205_v33  ;;  %v7225_v32 = vpack.c.bf16 %v1592_v22, %v1588_v16  ;;  %v1587_v33 = vld [vmem:[#allocation7 + $0x110] sm:$0xff] }
  0xd3   :  { %5151 = vmatpush1.bf16.msra.mxu0 %v6850_v54  ;;  %5183 = vmatpush1.bf16.msra.mxu1 %v6854_v55 }
  0xd4   :  { %5153 = vmatprep.subr.bf16.mxu0 %v6856_v57  ;;  %5185 = vmatprep.subr.bf16.mxu1 %v6859_v60  ;;  %v1383_v46 = vpop.permute.xlu1 %1382 }
  0xd5   :  { %vm1385_vm15 = vcmp.eq.s32.totalorder %v6873_v6, %v1383_v46  ;;  %v1610_v46 = vld [vmem:[#allocation7 + $0x1c8] sm:$0xff] }
  0xd7   :  { %5155 = vmatpush1.bf16.msra.mxu0 %v6862_v63  ;;  %5187 = vmatpush1.bf16.msra.mxu1 %v6866_v3 }
  0xd8   :  { %5189 = vmatprep.subr.bf16.mxu0 %v6745_v10  ;;  %5221 = vmatprep.subr.bf16.mxu1 %v6747_v14 }
  0xda   :  { %4487 = vmatmul.mubr.msk.f32.vlgmr.msra.gmra.mrb[4].mxu0 %vm316_vm2, %v6638_v9  ;;  %4489 = vmatmul.mubr.msk.f32.vlgmr.msra.gmra.mrb[4].mxu1 %vm316_vm2, %v6638_v9  ;;  %vm3304_vm2 = vcmask 1043459  }
  0xdb   :  { %5191 = vmatpush1.bf16.msra.mxu0 %v6756_v20  ;;  %5223 = vmatpush1.bf16.msra.mxu1 %v6758_v21 }
  0xdc   :  { %392 = vmatprep.mubr.f32.mxu0 %v6637_v5  ;;  %469 = vmatprep.mubr.f32.mxu1 %v6637_v5 }
  0xdd   :  { %5193 = vmatprep.subr.bf16.mxu0 %v6760_v25  ;;  %5225 = vmatprep.subr.bf16.mxu1 %v6764_v29 }
  0xde   :  { %4488 = vmatmul.mubr.msk.f32.gmra.mrb[6].mxu0 %vm317_vm3, %v6638_v9  ;;  %4490 = vmatmul.mubr.msk.f32.gmra.mrb[6].mxu1 %vm317_vm3, %v6638_v9  ;;  %vm3307_vm3 = vcmask 1044484  }
  0xdf   :  { %5195 = vmatpush1.bf16.msra.mxu0 %v6766_v30  ;;  %5227 = vmatpush1.bf16.msra.mxu1 %v6770_v34 }
  0xe0   :  { %5197 = vmatprep.subr.bf16.mxu0 %v6776_v39  ;;  %5229 = vmatprep.subr.bf16.mxu1 %v6778_v40 }
  0xe1   :  { %564 = vmatprep.mubr.f32.mxu0 %v6637_v5  ;;  %641 = vmatprep.mubr.f32.mxu1 %v6637_v5 }
  0xe3   :  { %5199 = vmatpush1.bf16.msra.mxu0 %v6784_v48  ;;  %5231 = vmatpush1.bf16.msra.mxu1 %v6788_v51 }
  0xe4   :  { %5201 = vmatprep.subr.bf16.mxu0 %v6790_v52  ;;  %5233 = vmatprep.subr.bf16.mxu1 %v6793_v56 }
  0xe7   :  { %5203 = vmatpush1.bf16.msra.mxu0 %v6802_v0  ;;  %5235 = vmatpush1.bf16.msra.mxu1 %v6806_v1 }
  0xe8   :  { %5205 = vmatprep.subr.bf16.mxu0 %v6808_v2  ;;  %5237 = vmatprep.subr.bf16.mxu1 %v6811_v7 }
  0xeb   :  { %5207 = vmatpush1.bf16.msra.mxu0 %v6820_v17  ;;  %5239 = vmatpush1.bf16.msra.mxu1 %v6824_v18 }
  0xec   :  { %5209 = vmatprep.subr.bf16.mxu0 %v6826_v19  ;;  %5241 = vmatprep.subr.bf16.mxu1 %v6829_v26 }
  0xef   :  { %5211 = vmatpush1.bf16.msra.mxu0 %v6838_v37  ;;  %5243 = vmatpush1.bf16.msra.mxu1 %v6842_v38 }
  0xf0   :  { %5213 = vmatprep.subr.bf16.mxu0 %v6844_v41  ;;  %5245 = vmatprep.subr.bf16.mxu1 %v6847_v45 }
  0xf3   :  { %5215 = vmatpush1.bf16.msra.mxu0 %v6850_v54  ;;  %5247 = vmatpush1.bf16.msra.mxu1 %v6854_v55 }
  0xf4   :  { %5217 = vmatprep.subr.bf16.mxu0 %v6856_v57  ;;  %5249 = vmatprep.subr.bf16.mxu1 %v6859_v60 }
  0xf7   :  { %5219 = vmatpush1.bf16.msra.mxu0 %v6862_v63  ;;  %5251 = vmatpush1.bf16.msra.mxu1 %v6866_v3 }
  0xf8   :  { %5253 = vmatprep.subr.bf16.mxu0 %v6745_v10  ;;  %5285 = vmatprep.subr.bf16.mxu1 %v6747_v14 }
  0xfa   :  { %4495 = vmatmul.mubr.msk.f32.vlgmr.msra.gmra.mrb[8].mxu0 %vm494_vm4, %v6638_v9  ;;  %4497 = vmatmul.mubr.msk.f32.vlgmr.msra.gmra.mrb[8].mxu1 %vm494_vm4, %v6638_v9  ;;  %vm3310_vm4 = vcmask 1045509  }
  0xfb   :  { %5255 = vmatpush1.bf16.msra.mxu0 %v6756_v20  ;;  %5287 = vmatpush1.bf16.msra.mxu1 %v6758_v21 }
  0xfc   :  { %570 = vmatprep.mubr.f32.mxu0 %v6637_v5  ;;  %647 = vmatprep.mubr.f32.mxu1 %v6637_v5 }
  0xfd   :  { %5257 = vmatprep.subr.bf16.mxu0 %v6760_v25  ;;  %5289 = vmatprep.subr.bf16.mxu1 %v6764_v29 }
  0xfe   :  { %4496 = vmatmul.mubr.msk.f32.gmra.mrb[10].mxu0 %vm495_vm5, %v6638_v9  ;;  %4498 = vmatmul.mubr.msk.f32.gmra.mrb[10].mxu1 %vm495_vm5, %v6638_v9  ;;  %vm3313_vm5 = vcmask 1046534  }
  0xff   :  { %5259 = vmatpush1.bf16.msra.mxu0 %v6766_v30  ;;  %5291 = vmatpush1.bf16.msra.mxu1 %v6770_v34 }
 0x100   :  { %5261 = vmatprep.subr.bf16.mxu0 %v6776_v39  ;;  %5293 = vmatprep.subr.bf16.mxu1 %v6778_v40 }
 0x101   :  { %742 = vmatprep.mubr.f32.mxu0 %v6637_v5  ;;  %819 = vmatprep.mubr.f32.mxu1 %v6637_v5 }
 0x103   :  { %5263 = vmatpush1.bf16.msra.mxu0 %v6784_v48  ;;  %5295 = vmatpush1.bf16.msra.mxu1 %v6788_v51 }
 0x104   :  { %5265 = vmatprep.subr.bf16.mxu0 %v6790_v52  ;;  %5297 = vmatprep.subr.bf16.mxu1 %v6793_v56 }
 0x107   :  { %5267 = vmatpush1.bf16.msra.mxu0 %v6802_v0  ;;  %5299 = vmatpush1.bf16.msra.mxu1 %v6806_v1 }
 0x108   :  { %5269 = vmatprep.subr.bf16.mxu0 %v6808_v2  ;;  %5301 = vmatprep.subr.bf16.mxu1 %v6811_v7 }
 0x10b   :  { %5271 = vmatpush1.bf16.msra.mxu0 %v6820_v17  ;;  %5303 = vmatpush1.bf16.msra.mxu1 %v6824_v18 }
 0x10c   :  { %5273 = vmatprep.subr.bf16.mxu0 %v6826_v19  ;;  %5305 = vmatprep.subr.bf16.mxu1 %v6829_v26 }
 0x10f   :  { %5275 = vmatpush1.bf16.msra.mxu0 %v6838_v37  ;;  %5307 = vmatpush1.bf16.msra.mxu1 %v6842_v38 }
 0x110   :  { %5277 = vmatprep.subr.bf16.mxu0 %v6844_v41  ;;  %5309 = vmatprep.subr.bf16.mxu1 %v6847_v45 }
 0x113   :  { %5279 = vmatpush1.bf16.msra.mxu0 %v6850_v54  ;;  %5311 = vmatpush1.bf16.msra.mxu1 %v6854_v55 }
 0x114   :  { %5281 = vmatprep.subr.bf16.mxu0 %v6856_v57  ;;  %5313 = vmatprep.subr.bf16.mxu1 %v6859_v60 }
 0x117   :  { %5283 = vmatpush1.bf16.msra.mxu0 %v6862_v63  ;;  %5315 = vmatpush1.bf16.msra.mxu1 %v6866_v3 }
 0x118   :  { %5317 = vmatprep.subr.bf16.mxu0 %v6745_v10  ;;  %5349 = vmatprep.subr.bf16.mxu1 %v6747_v14 }
 0x11a   :  { %4503 = vmatmul.mubr.msk.f32.vlgmr.msra.gmra.mrb[12].mxu0 %vm672_vm6, %v6638_v9  ;;  %4505 = vmatmul.mubr.msk.f32.vlgmr.msra.gmra.mrb[12].mxu1 %vm672_vm6, %v6638_v9  ;;  %vm6640_vm6 = vmmov 0  }
 0x11b   :  { %5319 = vmatpush1.bf16.msra.mxu0 %v6756_v20  ;;  %5351 = vmatpush1.bf16.msra.mxu1 %v6758_v21 }
 0x11c   :  { %748 = vmatprep.mubr.f32.mxu0 %v6637_v5  ;;  %825 = vmatprep.mubr.f32.mxu1 %v6637_v5 }
 0x11d   :  { %5321 = vmatprep.subr.bf16.mxu0 %v6760_v25  ;;  %5353 = vmatprep.subr.bf16.mxu1 %v6764_v29 }
 0x11e   :  { %4504 = vmatmul.mubr.msk.f32.gmra.mrb[14].mxu0 %vm673_vm7, %v6638_v9  ;;  %4506 = vmatmul.mubr.msk.f32.gmra.mrb[14].mxu1 %vm673_vm7, %v6638_v9  ;;  %vm3316_vm7 = vcmask 1047559  }
 0x11f   :  { %5323 = vmatpush1.bf16.msra.mxu0 %v6766_v30  ;;  %5355 = vmatpush1.bf16.msra.mxu1 %v6770_v34 }
 0x120   :  { %5325 = vmatprep.subr.bf16.mxu0 %v6776_v39  ;;  %5357 = vmatprep.subr.bf16.mxu1 %v6778_v40 }
 0x121   :  { %920 = vmatprep.mubr.f32.mxu0 %v6637_v5  ;;  %997 = vmatprep.mubr.f32.mxu1 %v6637_v5 }
 0x123   :  { %5327 = vmatpush1.bf16.msra.mxu0 %v6784_v48  ;;  %5359 = vmatpush1.bf16.msra.mxu1 %v6788_v51 }
 0x124   :  { %5329 = vmatprep.subr.bf16.mxu0 %v6790_v52  ;;  %5361 = vmatprep.subr.bf16.mxu1 %v6793_v56 }
 0x127   :  { %5331 = vmatpush1.bf16.msra.mxu0 %v6802_v0  ;;  %5363 = vmatpush1.bf16.msra.mxu1 %v6806_v1 }
 0x128   :  { %5333 = vmatprep.subr.bf16.mxu0 %v6808_v2  ;;  %5365 = vmatprep.subr.bf16.mxu1 %v6811_v7 }
 0x12b   :  { %5335 = vmatpush1.bf16.msra.mxu0 %v6820_v17  ;;  %5367 = vmatpush1.bf16.msra.mxu1 %v6824_v18 }
 0x12c   :  { %5337 = vmatprep.subr.bf16.mxu0 %v6826_v19  ;;  %5369 = vmatprep.subr.bf16.mxu1 %v6829_v26 }
 0x12f   :  { %5339 = vmatpush1.bf16.msra.mxu0 %v6838_v37  ;;  %5371 = vmatpush1.bf16.msra.mxu1 %v6842_v38 }
 0x130   :  { %5341 = vmatprep.subr.bf16.mxu0 %v6844_v41  ;;  %5373 = vmatprep.subr.bf16.mxu1 %v6847_v45 }
 0x133   :  { %5343 = vmatpush1.bf16.msra.mxu0 %v6850_v54  ;;  %5375 = vmatpush1.bf16.msra.mxu1 %v6854_v55 }
 0x134   :  { %5345 = vmatprep.subr.bf16.mxu0 %v6856_v57  ;;  %5377 = vmatprep.subr.bf16.mxu1 %v6859_v60 }
 0x137   :  { %5347 = vmatpush1.bf16.msra.mxu0 %v6862_v63  ;;  %5379 = vmatpush1.bf16.msra.mxu1 %v6866_v3 }
 0x138   :  { %5381 = vmatprep.subr.bf16.mxu0 %v6745_v10  ;;  %5413 = vmatprep.subr.bf16.mxu1 %v6747_v14 }
 0x13a   :  { %4511 = vmatmul.mubr.msk.f32.vlgmr.msra.gmra.mrb[16].mxu0 %vm850_vm8, %v6638_v9  ;;  %4513 = vmatmul.mubr.msk.f32.vlgmr.msra.gmra.mrb[16].mxu1 %vm850_vm8, %v6638_v9 }
 0x13b   :  { %5383 = vmatpush1.bf16.msra.mxu0 %v6756_v20  ;;  %5415 = vmatpush1.bf16.msra.mxu1 %v6758_v21 }
 0x13c   :  { %926 = vmatprep.mubr.f32.mxu0 %v6637_v5  ;;  %1003 = vmatprep.mubr.f32.mxu1 %v6637_v5 }
 0x13d   :  { %5385 = vmatprep.subr.bf16.mxu0 %v6760_v25  ;;  %5417 = vmatprep.subr.bf16.mxu1 %v6764_v29 }
 0x13e   :  { %4512 = vmatmul.mubr.msk.f32.gmra.mrb[18].mxu0 %vm851_vm9, %v6638_v9  ;;  %4514 = vmatmul.mubr.msk.f32.gmra.mrb[18].mxu1 %vm851_vm9, %v6638_v9 }
 0x13f   :  { %5387 = vmatpush1.bf16.msra.mxu0 %v6766_v30  ;;  %5419 = vmatpush1.bf16.msra.mxu1 %v6770_v34 }
 0x140   :  { %5389 = vmatprep.subr.bf16.mxu0 %v6776_v39  ;;  %5421 = vmatprep.subr.bf16.mxu1 %v6778_v40 }
 0x141   :  { %1098 = vmatprep.mubr.f32.mxu0 %v6637_v5  ;;  %1175 = vmatprep.mubr.f32.mxu1 %v6637_v5 }
 0x143   :  { %5391 = vmatpush1.bf16.msra.mxu0 %v6784_v48  ;;  %5423 = vmatpush1.bf16.msra.mxu1 %v6788_v51 }
 0x144   :  { %5393 = vmatprep.subr.bf16.mxu0 %v6790_v52  ;;  %5425 = vmatprep.subr.bf16.mxu1 %v6793_v56 }
 0x147   :  { %5395 = vmatpush1.bf16.msra.mxu0 %v6802_v0  ;;  %5427 = vmatpush1.bf16.msra.mxu1 %v6806_v1 }
 0x148   :  { %5397 = vmatprep.subr.bf16.mxu0 %v6808_v2  ;;  %5429 = vmatprep.subr.bf16.mxu1 %v6811_v7 }
 0x14b   :  { %5399 = vmatpush1.bf16.msra.mxu0 %v6820_v17  ;;  %5431 = vmatpush1.bf16.msra.mxu1 %v6824_v18 }
 0x14c   :  { %5401 = vmatprep.subr.bf16.mxu0 %v6826_v19  ;;  %5433 = vmatprep.subr.bf16.mxu1 %v6829_v26 }
 0x14f   :  { %5403 = vmatpush1.bf16.msra.mxu0 %v6838_v37  ;;  %5435 = vmatpush1.bf16.msra.mxu1 %v6842_v38 }
 0x150   :  { %5405 = vmatprep.subr.bf16.mxu0 %v6844_v41  ;;  %5437 = vmatprep.subr.bf16.mxu1 %v6847_v45 }
 0x153   :  { %5407 = vmatpush1.bf16.msra.mxu0 %v6850_v54  ;;  %5439 = vmatpush1.bf16.msra.mxu1 %v6854_v55 }
 0x154   :  { %5409 = vmatprep.subr.bf16.mxu0 %v6856_v57  ;;  %5441 = vmatprep.subr.bf16.mxu1 %v6859_v60 }
 0x157   :  { %5411 = vmatpush1.bf16.msra.mxu0 %v6862_v63  ;;  %5443 = vmatpush1.bf16.msra.mxu1 %v6866_v3 }
 0x158   :  { %5445 = vmatprep.subr.bf16.mxu0 %v6745_v10  ;;  %5477 = vmatprep.subr.bf16.mxu1 %v6747_v14 }
 0x15a   :  { %4519 = vmatmul.mubr.msk.f32.vlgmr.msra.gmra.mrb[20].mxu0 %vm1028_vm10, %v6638_v9  ;;  %4521 = vmatmul.mubr.msk.f32.vlgmr.msra.gmra.mrb[20].mxu1 %vm1028_vm10, %v6638_v9 }
 0x15b   :  { %5447 = vmatpush1.bf16.msra.mxu0 %v6756_v20  ;;  %5479 = vmatpush1.bf16.msra.mxu1 %v6758_v21 }
 0x15c   :  { %1104 = vmatprep.mubr.f32.mxu0 %v6637_v5  ;;  %1181 = vmatprep.mubr.f32.mxu1 %v6637_v5 }
 0x15d   :  { %5449 = vmatprep.subr.bf16.mxu0 %v6760_v25  ;;  %5481 = vmatprep.subr.bf16.mxu1 %v6764_v29 }
 0x15e   :  { %4520 = vmatmul.mubr.msk.f32.gmra.mrb[22].mxu0 %vm1029_vm11, %v6638_v9  ;;  %4522 = vmatmul.mubr.msk.f32.gmra.mrb[22].mxu1 %vm1029_vm11, %v6638_v9 }
 0x15f   :  { %5451 = vmatpush1.bf16.msra.mxu0 %v6766_v30  ;;  %5483 = vmatpush1.bf16.msra.mxu1 %v6770_v34 }
 0x160   :  { %5453 = vmatprep.subr.bf16.mxu0 %v6776_v39  ;;  %5485 = vmatprep.subr.bf16.mxu1 %v6778_v40 }
 0x161   :  { %1276 = vmatprep.mubr.f32.mxu0 %v6637_v5  ;;  %1353 = vmatprep.mubr.f32.mxu1 %v6637_v5 }
 0x163   :  { %5455 = vmatpush1.bf16.msra.mxu0 %v6784_v48  ;;  %5487 = vmatpush1.bf16.msra.mxu1 %v6788_v51 }
 0x164   :  { %5457 = vmatprep.subr.bf16.mxu0 %v6790_v52  ;;  %5489 = vmatprep.subr.bf16.mxu1 %v6793_v56 }
 0x167   :  { %5459 = vmatpush1.bf16.msra.mxu0 %v6802_v0  ;;  %5491 = vmatpush1.bf16.msra.mxu1 %v6806_v1 }
 0x168   :  { %5461 = vmatprep.subr.bf16.mxu0 %v6808_v2  ;;  %5493 = vmatprep.subr.bf16.mxu1 %v6811_v7 }
 0x16b   :  { %5463 = vmatpush1.bf16.msra.mxu0 %v6820_v17  ;;  %5495 = vmatpush1.bf16.msra.mxu1 %v6824_v18 }
 0x16c   :  { %5465 = vmatprep.subr.bf16.mxu0 %v6826_v19  ;;  %5497 = vmatprep.subr.bf16.mxu1 %v6829_v26 }
 0x16f   :  { %5467 = vmatpush1.bf16.msra.mxu0 %v6838_v37  ;;  %5499 = vmatpush1.bf16.msra.mxu1 %v6842_v38 }
 0x170   :  { %5469 = vmatprep.subr.bf16.mxu0 %v6844_v41  ;;  %5501 = vmatprep.subr.bf16.mxu1 %v6847_v45 }
 0x173   :  { %5471 = vmatpush1.bf16.msra.mxu0 %v6850_v54  ;;  %5503 = vmatpush1.bf16.msra.mxu1 %v6854_v55 }
 0x174   :  { %5473 = vmatprep.subr.bf16.mxu0 %v6856_v57  ;;  %5505 = vmatprep.subr.bf16.mxu1 %v6859_v60 }
 0x177   :  { %5475 = vmatpush1.bf16.msra.mxu0 %v6862_v63  ;;  %5507 = vmatpush1.bf16.msra.mxu1 %v6866_v3 }
 0x178   :  { %5509 = vmatprep.subr.bf16.mxu0 %v6745_v10  ;;  %5541 = vmatprep.subr.bf16.mxu1 %v6747_v14  ;;  %v1554_v10 = vld [vmem:[#allocation7 + $0x8] sm:$0xff] }
 0x17a   :  { %4527 = vmatmul.mubr.msk.f32.vlgmr.msra.gmra.mrb[24].mxu0 %vm1206_vm12, %v6638_v9  ;;  %4529 = vmatmul.mubr.msk.f32.vlgmr.msra.gmra.mrb[24].mxu1 %vm1206_vm12, %v6638_v9 }
 0x17b   :  { %5511 = vmatpush1.bf16.msra.mxu0 %v6756_v20  ;;  %5543 = vmatpush1.bf16.msra.mxu1 %v6758_v21  ;;  %v1558_v21 = vld [vmem:[#allocation7 + $0x28] sm:$0xff] }
 0x17c   :  { %1282 = vmatprep.mubr.f32.mxu0 %v6637_v5  ;;  %1359 = vmatprep.mubr.f32.mxu1 %v6637_v5 }
 0x17d   :  { %5513 = vmatprep.subr.bf16.mxu0 %v6760_v25  ;;  %5545 = vmatprep.subr.bf16.mxu1 %v6764_v29  ;;  %v1556_v25 = vld [vmem:[#allocation7 + $0x18] sm:$0xff] }
 0x17e   :  { %4528 = vmatmul.mubr.msk.f32.gmra.mrb[26].mxu0 %vm1207_vm13, %v6638_v9  ;;  %4530 = vmatmul.mubr.msk.f32.gmra.mrb[26].mxu1 %vm1207_vm13, %v6638_v9  ;;  %v1560_v29 = vld [vmem:[#allocation7 + $0x38] sm:$0xff] }
 0x17f   :  { %5515 = vmatpush1.bf16.msra.mxu0 %v6766_v30  ;;  %5547 = vmatpush1.bf16.msra.mxu1 %v6770_v34 }
 0x180   :  { %5517 = vmatprep.subr.bf16.mxu0 %v6776_v39  ;;  %5549 = vmatprep.subr.bf16.mxu1 %v6778_v40  ;;  %v1553_v39 = vld [vmem:[#allocation7] sm:$0xff]  ;;  %v7165_v40 = vpack.c.bf16 %v1558_v21, %v1554_v10  ;;  %v1591_v10 = vld [vmem:[#allocation7 + $0x130] sm:$0xff]  ;;  %v1596_v21 = vld [vmem:[#allocation7 + $0x158] sm:$0xff] }
 0x181   :  { %1454 = vmatprep.mubr.f32.mxu0 %v6637_v5  ;;  %1531 = vmatprep.mubr.f32.mxu1 %v6637_v5 }
 0x183   :  { %5519 = vmatpush1.bf16.msra.mxu0 %v6784_v48  ;;  %5551 = vmatpush1.bf16.msra.mxu1 %v6788_v51  ;;  %v7167_v48 = vpack.c.bf16 %v1560_v29, %v1556_v25  ;;  %v1557_v51 = vld [vmem:[#allocation7 + $0x20] sm:$0xff]  ;;  %v1600_v25 = vld [vmem:[#allocation7 + $0x178] sm:$0xff]  ;;  %v7229_v29 = vpack.c.bf16 %v1589_v28, %v1585_v27 }
 0x184   :  { %5521 = vmatprep.subr.bf16.mxu0 %v6790_v52  ;;  %5553 = vmatprep.subr.bf16.mxu1 %v6793_v56  ;;  %v1555_v52 = vld [vmem:[#allocation7 + $0x10] sm:$0xff] }
 0x185   :  { %v1559_v56 = vld [vmem:[#allocation7 + $0x30] sm:$0xff] }
 0x187   :  { %5523 = vmatpush1.bf16.msra.mxu0 %v6802_v0  ;;  %5555 = vmatpush1.bf16.msra.mxu1 %v6806_v1  ;;  %v1562_v0 = vld [vmem:[#allocation7 + $0x48] sm:$0xff]  ;;  %v1380_v1 = vpop.permute.xlu0 %1379 }
 0x188   :  { %5525 = vmatprep.subr.bf16.mxu0 %v6808_v2  ;;  %5557 = vmatprep.subr.bf16.mxu1 %v6811_v7  ;;  %v1566_v2 = vld [vmem:[#allocation7 + $0x68] sm:$0xff]  ;;  %v1564_v7 = vld [vmem:[#allocation7 + $0x58] sm:$0xff]  ;;  %vm1384_vm14 = vcmp.eq.s32.totalorder %v6873_v6, %v1380_v1  ;;  %v1581_v6 = vld [vmem:[#allocation7 + $0xe0] sm:$0xff] }
 0x189   :  { %v7217_v23 = vpack.c.bf16 %v1581_v6, %v1577_v4  ;;  %v1602_v1 = vld [vmem:[#allocation7 + $0x188] sm:$0xff]  ;;  %v1613_v4 = vld [vmem:[#allocation7 + $0x1e0] sm:$0xff]  ;;  %v1611_v6 = vld [vmem:[#allocation7 + $0x1d0] sm:$0xff] }
 0x18b   :  { %5527 = vmatpush1.bf16.msra.mxu0 %v6820_v17  ;;  %5559 = vmatpush1.bf16.msra.mxu1 %v6824_v18  ;;  %v1568_v17 = vld [vmem:[#allocation7 + $0x78] sm:$0xff]  ;;  %v7171_v18 = vpack.c.bf16 %v1557_v51, %v1553_v39  ;;  %v1597_v39 = vld [vmem:[#allocation7 + $0x160] sm:$0xff] }
 0x18c   :  { %5529 = vmatprep.subr.bf16.mxu0 %v6826_v19  ;;  %5561 = vmatprep.subr.bf16.mxu1 %v6829_v26  ;;  %v7173_v19 = vpack.c.bf16 %v1559_v56, %v1555_v52  ;;  %v1561_v26 = vld [vmem:[#allocation7 + $0x40] sm:$0xff]  ;;  %v7180_v42 = vpack.c.bf16 %v1568_v17, %v1564_v7  ;;  %v7237_v52 = vpack.c.bf16 %v1600_v25, %v1596_v21  ;;  %v1595_v56 = vld [vmem:[#allocation7 + $0x150] sm:$0xff]  ;;  %v1604_v7 = vld [vmem:[#allocation7 + $0x198] sm:$0xff] }
 0x18d   :  { %v7186_v47 = vpack.c.bf16 %v1565_v35, %v1561_v26  ;;  %v1608_v17 = vld [vmem:[#allocation7 + $0x1b8] sm:$0xff] }
 0x18f   :  { %5531 = vmatpush1.bf16.msra.mxu0 %v6838_v37  ;;  %5563 = vmatpush1.bf16.msra.mxu1 %v6842_v38  ;;  %v1567_v37 = vld [vmem:[#allocation7 + $0x70] sm:$0xff]  ;;  %v1570_v38 = vld [vmem:[#allocation7 + $0x88] sm:$0xff] }
 0x190   :  { %5533 = vmatprep.subr.bf16.mxu0 %v6844_v41  ;;  %5565 = vmatprep.subr.bf16.mxu1 %v6847_v45  ;;  %v7178_v41 = vpack.c.bf16 %v1566_v2, %v1562_v0  ;;  %v1576_v45 = vld [vmem:[#allocation7 + $0xb8] sm:$0xff]  ;;  %v7188_v49 = vpack.c.bf16 %v1567_v37, %v1563_v36  ;;  %v1599_v0 = vld [vmem:[#allocation7 + $0x170] sm:$0xff]  ;;  %v1606_v2 = vld [vmem:[#allocation7 + $0x1a8] sm:$0xff] }
 0x191   :  { %v217_v14 = vpop.f32.mrb[2].mxu0  ;;  %v294_v20 = vpop.f32.mrb[2].mxu1  ;;  %v7243_v35 = vpack.c.bf16 %v1599_v0, %v1595_v56  ;;  %v1601_v36 = vld [vmem:[#allocation7 + $0x180] sm:$0xff] }
 0x192   :  { %303 = vst [vmem:[#allocation2 + $0x20] sm:$0x3] %v217_v14  ;;  %305 = vst [vmem:[#allocation2 + $0x30] sm:$0x3] %v294_v20  ;;  %v219_v30 = vpop.f32.mrb[3].mxu0  ;;  %v296_v34 = vpop.f32.mrb[3].mxu1 }
 0x193   :  { %304 = vst [vmem:[#allocation2 + $0x28] sm:$0x3] %v219_v30  ;;  %306 = vst [vmem:[#allocation2 + $0x38] sm:$0x3] %v296_v34  ;;  %5535 = vmatpush1.bf16.msra.mxu0 %v6850_v54  ;;  %5567 = vmatpush1.bf16.msra.mxu1 %v6854_v55  ;;  %v7192_v54 = vpack.c.bf16 %v1574_v43, %v1570_v38  ;;  %v7194_v55 = vpack.c.bf16 %v1576_v45, %v1572_v44  ;;  %v1594_v14 = vld [vmem:[#allocation7 + $0x148] sm:$0xff]  ;;  %v1593_v34 = vld [vmem:[#allocation7 + $0x140] sm:$0xff] }
 0x194   :  { %5537 = vmatprep.subr.bf16.mxu0 %v6856_v57  ;;  %5569 = vmatprep.subr.bf16.mxu1 %v6859_v60  ;;  %v1571_v57 = vld [vmem:[#allocation7 + $0x90] sm:$0xff]  ;;  %v1582_v60 = vld [vmem:[#allocation7 + $0xe8] sm:$0xff]  ;;  %v7231_v30 = vpack.c.bf16 %v1591_v10, %v1587_v33  ;;  %v7241_v26 = vpack.c.bf16 %v1597_v39, %v1593_v34  ;;  %v1605_v37 = vld [vmem:[#allocation7 + $0x1a0] sm:$0xff]  ;;  %v7247_v38 = vpack.c.bf16 %v1606_v2, %v1602_v1 }
 0x195   :  { %v7209_v8 = vpack.c.bf16 %v1582_v60, %v1578_v59  ;;  %v1598_v20 = vld [vmem:[#allocation7 + $0x168] sm:$0xff]  ;;  %v7249_v43 = vpack.c.bf16 %v1608_v17, %v1604_v7  ;;  %v1603_v44 = vld [vmem:[#allocation7 + $0x190] sm:$0xff]  ;;  %v1609_v60 = vld [vmem:[#allocation7 + $0x1c0] sm:$0xff] }
 0x196   :  { %v7235_v51 = vpack.c.bf16 %v1598_v20, %v1594_v14  ;;  %v1607_v45 = vld [vmem:[#allocation7 + $0x1b0] sm:$0xff]  ;;  %v7265_v22 = vpack.c.bf16 %v1613_v4, %v1609_v60 }
 0x197   :  { %5539 = vmatpush1.bf16.msra.mxu0 %v6862_v63  ;;  %5571 = vmatpush1.bf16.msra.mxu1 %v6866_v3  ;;  %v7203_v63 = vpack.c.bf16 %v1573_v53, %v1569_v50  ;;  %v7205_v3 = vpack.c.bf16 %v1575_v58, %v1571_v57  ;;  %v1614_v50 = vld [vmem:[#allocation7 + $0x1e8] sm:$0xff]  ;;  %v1612_v53 = vld [vmem:[#allocation7 + $0x1d8] sm:$0xff]  ;;  %v7253_v58 = vpack.c.bf16 %v1605_v37, %v1601_v36 }
 0x198   :  { %5573 = vmatprep.subr.bf16.mxu0 %v7165_v40  ;;  %5605 = vmatprep.subr.bf16.mxu1 %v7167_v48  ;;  %v1616_v57 = vld [vmem:[#allocation7 + $0x1f8] sm:$0xff]  ;;  %v7255_v59 = vpack.c.bf16 %v1607_v45, %v1603_v44  ;;  %v7259_v61 = vpack.c.bf16 %v1614_v50, %v1610_v46 }
 0x199   :  { %v7261_v62 = vpack.c.bf16 %v1616_v57, %v1612_v53 }
 0x19a   :  { %4535 = vmatmul.mubr.msk.f32.vlgmr.msra.gmra.mrb[28].mxu0 %vm1384_vm14, %v6638_v9  ;;  %4537 = vmatmul.mubr.msk.f32.vlgmr.msra.gmra.mrb[28].mxu1 %vm1384_vm14, %v6638_v9 }
 0x19b   :  { %5575 = vmatpush1.bf16.msra.mxu0 %v7171_v18  ;;  %5607 = vmatpush1.bf16.msra.mxu1 %v7173_v19 }
 0x19c   :  { %1460 = vmatprep.mubr.f32.mxu0 %v6637_v5  ;;  %1537 = vmatprep.mubr.f32.mxu1 %v6637_v5 }
 0x19d   :  { %5577 = vmatprep.subr.bf16.mxu0 %v7178_v41  ;;  %5609 = vmatprep.subr.bf16.mxu1 %v7180_v42 }
 0x19e   :  { %4536 = vmatmul.mubr.msk.f32.gmra.mrb[30].mxu0 %vm1385_vm15, %v6638_v9  ;;  %4538 = vmatmul.mubr.msk.f32.gmra.mrb[30].mxu1 %vm1385_vm15, %v6638_v9  ;;  %v1583_v9 = vld [vmem:[#allocation7 + $0xf0] sm:$0xff] }
 0x19f   :  { %5579 = vmatpush1.bf16.msra.mxu0 %v7186_v47  ;;  %5611 = vmatpush1.bf16.msra.mxu1 %v7188_v49  ;;  %v7219_v24 = vpack.c.bf16 %v1583_v9, %v1579_v12  ;;  %v1615_v12 = vld [vmem:[#allocation7 + $0x1f0] sm:$0xff] }
 0x1a0   :  { %5581 = vmatprep.subr.bf16.mxu0 %v7192_v54  ;;  %5613 = vmatprep.subr.bf16.mxu1 %v7194_v55  ;;  %v7267_v27 = vpack.c.bf16 %v1615_v12, %v1611_v6 }
 0x1a1   :  { %1689 = vmatprep.mubr.f32.mxu0 %v6637_v5  ;;  %1766 = vmatprep.mubr.f32.mxu1 %v6637_v5 }
 0x1a3   :  { %5583 = vmatpush1.bf16.msra.mxu0 %v7203_v63  ;;  %5615 = vmatpush1.bf16.msra.mxu1 %v7205_v3 }
 0x1a4   :  { %5585 = vmatprep.subr.bf16.mxu0 %v7209_v8  ;;  %5617 = vmatprep.subr.bf16.mxu1 %v7211_v11 }
 0x1a7   :  { %5587 = vmatpush1.bf16.msra.mxu0 %v7217_v23  ;;  %5619 = vmatpush1.bf16.msra.mxu1 %v7219_v24 }
 0x1a8   :  { %5589 = vmatprep.subr.bf16.mxu0 %v7223_v31  ;;  %5621 = vmatprep.subr.bf16.mxu1 %v7225_v32 }
 0x1ab   :  { %5591 = vmatpush1.bf16.msra.mxu0 %v7229_v29  ;;  %5623 = vmatpush1.bf16.msra.mxu1 %v7231_v30 }
 0x1ac   :  { %5593 = vmatprep.subr.bf16.mxu0 %v7235_v51  ;;  %5625 = vmatprep.subr.bf16.mxu1 %v7237_v52 }
 0x1af   :  { %5595 = vmatpush1.bf16.msra.mxu0 %v7241_v26  ;;  %5627 = vmatpush1.bf16.msra.mxu1 %v7243_v35 }
 0x1b0   :  { %5597 = vmatprep.subr.bf16.mxu0 %v7247_v38  ;;  %5629 = vmatprep.subr.bf16.mxu1 %v7249_v43 }
 0x1b1   :  { %v394_v9 = vpop.f32.mrb[6].mxu0  ;;  %v471_v13 = vpop.f32.mrb[6].mxu1 }
 0x1b2   :  { %481 = vst [vmem:[#allocation2 + $0x60] sm:$0x3] %v394_v9  ;;  %483 = vst [vmem:[#allocation2 + $0x70] sm:$0x3] %v471_v13  ;;  %v396_v15 = vpop.f32.mrb[7].mxu0  ;;  %v473_v16 = vpop.f32.mrb[7].mxu1 }
 0x1b3   :  { %482 = vst [vmem:[#allocation2 + $0x68] sm:$0x3] %v396_v15  ;;  %484 = vst [vmem:[#allocation2 + $0x78] sm:$0x3] %v473_v16  ;;  %5599 = vmatpush1.bf16.msra.mxu0 %v7253_v58  ;;  %5631 = vmatpush1.bf16.msra.mxu1 %v7255_v59  ;;  %v1621_v13 = vld [vmem:[#allocation2 + $0x20] sm:$0x3] }
 0x1b4   :  { %5601 = vmatprep.subr.bf16.mxu0 %v7259_v61  ;;  %5633 = vmatprep.subr.bf16.mxu1 %v7261_v62 }
 0x1b7   :  { %5603 = vmatpush1.bf16.msra.mxu0 %v7265_v22  ;;  %5635 = vmatpush1.bf16.msra.mxu1 %v7267_v27 }
 0x1b8   :  { %5637 = vmatprep.subr.bf16.mxu0 %v7165_v40  ;;  %5669 = vmatprep.subr.bf16.mxu1 %v7167_v48 }
 0x1ba   :  { %1690 = vmatmul.mubr.f32.vlgmr.msra.gmra.mrb[0].mxu0 %v6637_v5  ;;  %1767 = vmatmul.mubr.f32.vlgmr.msra.gmra.mrb[0].mxu1 %v6637_v5 }
 0x1bb   :  { %1695 = vmatprep.mubr.f32.mxu0 %v6637_v5  ;;  %1772 = vmatprep.mubr.f32.mxu1 %v6637_v5 }
 0x1bc   :  { %5639 = vmatpush1.bf16.msra.mxu0 %v7171_v18  ;;  %5671 = vmatpush1.bf16.msra.mxu1 %v7173_v19 }
 0x1bd   :  { %5641 = vmatprep.subr.bf16.mxu0 %v7178_v41  ;;  %5673 = vmatprep.subr.bf16.mxu1 %v7180_v42 }
 0x1be   :  { %1696 = vmatmul.mubr.f32.gmra.mrb[32].mxu0 %v6637_v5  ;;  %1773 = vmatmul.mubr.f32.gmra.mrb[32].mxu1 %v6637_v5 }
 0x1bf   :  { %1891 = vmatprep.mubr.f32.mxu0 %v6637_v5  ;;  %1968 = vmatprep.mubr.f32.mxu1 %v6637_v5 }
 0x1c0   :  { %5643 = vmatpush1.bf16.msra.mxu0 %v7186_v47  ;;  %5675 = vmatpush1.bf16.msra.mxu1 %v7188_v49 }
 0x1c1   :  { %5645 = vmatprep.subr.bf16.mxu0 %v7192_v54  ;;  %5677 = vmatprep.subr.bf16.mxu1 %v7194_v55 }
 0x1c4   :  { %5647 = vmatpush1.bf16.msra.mxu0 %v7203_v63  ;;  %5679 = vmatpush1.bf16.msra.mxu1 %v7205_v3 }
 0x1c5   :  { %5649 = vmatprep.subr.bf16.mxu0 %v7209_v8  ;;  %5681 = vmatprep.subr.bf16.mxu1 %v7211_v11 }
 0x1c8   :  { %5651 = vmatpush1.bf16.msra.mxu0 %v7217_v23  ;;  %5683 = vmatpush1.bf16.msra.mxu1 %v7219_v24 }
 0x1c9   :  { %5653 = vmatprep.subr.bf16.mxu0 %v7223_v31  ;;  %5685 = vmatprep.subr.bf16.mxu1 %v7225_v32 }
 0x1cc   :  { %5655 = vmatpush1.bf16.msra.mxu0 %v7229_v29  ;;  %5687 = vmatpush1.bf16.msra.mxu1 %v7231_v30 }
 0x1cd   :  { %5657 = vmatprep.subr.bf16.mxu0 %v7235_v51  ;;  %5689 = vmatprep.subr.bf16.mxu1 %v7237_v52 }
 0x1d0   :  { %5659 = vmatpush1.bf16.msra.mxu0 %v7241_v26  ;;  %5691 = vmatpush1.bf16.msra.mxu1 %v7243_v35 }
 0x1d1   :  { %v572_v28 = vpop.f32.mrb[10].mxu0  ;;  %v649_v33 = vpop.f32.mrb[10].mxu1  ;;  %5661 = vmatprep.subr.bf16.mxu0 %v7247_v38  ;;  %5693 = vmatprep.subr.bf16.mxu1 %v7249_v43 }
 0x1d2   :  { %659 = vst [vmem:[#allocation2 + $0xa0] sm:$0x3] %v572_v28  ;;  %661 = vst [vmem:[#allocation2 + $0xb0] sm:$0x3] %v649_v33  ;;  %v574_v10 = vpop.f32.mrb[11].mxu0  ;;  %v651_v14 = vpop.f32.mrb[11].mxu1 }
 0x1d3   :  { %660 = vst [vmem:[#allocation2 + $0xa8] sm:$0x3] %v574_v10  ;;  %662 = vst [vmem:[#allocation2 + $0xb8] sm:$0x3] %v651_v14  ;;  %v1622_v33 = vld [vmem:[#allocation2 + $0x28] sm:$0x3] }
 0x1d4   :  { %5663 = vmatpush1.bf16.msra.mxu0 %v7253_v58  ;;  %5695 = vmatpush1.bf16.msra.mxu1 %v7255_v59 }
 0x1d5   :  { %5665 = vmatprep.subr.bf16.mxu0 %v7259_v61  ;;  %5697 = vmatprep.subr.bf16.mxu1 %v7261_v62 }
 0x1d8   :  { %5667 = vmatpush1.bf16.msra.mxu0 %v7265_v22  ;;  %5699 = vmatpush1.bf16.msra.mxu1 %v7267_v27 }
 0x1d9   :  { %5701 = vmatprep.subr.bf16.mxu0 %v7165_v40  ;;  %5733 = vmatprep.subr.bf16.mxu1 %v7167_v48 }
 0x1f1   :  { %v750_v20 = vpop.f32.mrb[14].mxu0  ;;  %v827_v21 = vpop.f32.mrb[14].mxu1 }
 0x1f2   :  { %837 = vst [vmem:[#allocation2 + $0xe0] sm:$0x3] %v750_v20  ;;  %839 = vst [vmem:[#allocation2 + $0xf0] sm:$0x3] %v827_v21  ;;  %v752_v25 = vpop.f32.mrb[15].mxu0  ;;  %v829_v34 = vpop.f32.mrb[15].mxu1 }
 0x1f3   :  { %838 = vst [vmem:[#allocation2 + $0xe8] sm:$0x3] %v752_v25  ;;  %840 = vst [vmem:[#allocation2 + $0xf8] sm:$0x3] %v829_v34  ;;  %v1623_v20 = vld [vmem:[#allocation2 + $0x30] sm:$0x3] }
 0x211   :  { %v928_v39 = vpop.f32.mrb[18].mxu0  ;;  %v1005_v56 = vpop.f32.mrb[18].mxu1 }
 0x212   :  { %1015 = vst [vmem:[#allocation2 + $0x120] sm:$0x3] %v928_v39  ;;  %1017 = vst [vmem:[#allocation2 + $0x130] sm:$0x3] %v1005_v56  ;;  %v930_v0 = vpop.f32.mrb[19].mxu0  ;;  %v1007_v1 = vpop.f32.mrb[19].mxu1 }
 0x213   :  { %1016 = vst [vmem:[#allocation2 + $0x128] sm:$0x3] %v930_v0  ;;  %1018 = vst [vmem:[#allocation2 + $0x138] sm:$0x3] %v1007_v1 }
 0x231   :  { %v1106_v2 = vpop.f32.mrb[22].mxu0  ;;  %v1183_v7 = vpop.f32.mrb[22].mxu1 }
 0x232   :  { %1193 = vst [vmem:[#allocation2 + $0x160] sm:$0x3] %v1106_v2  ;;  %1195 = vst [vmem:[#allocation2 + $0x170] sm:$0x3] %v1183_v7  ;;  %v1108_v17 = vpop.f32.mrb[23].mxu0  ;;  %v1185_v36 = vpop.f32.mrb[23].mxu1 }
 0x233   :  { %1194 = vst [vmem:[#allocation2 + $0x168] sm:$0x3] %v1108_v17  ;;  %1196 = vst [vmem:[#allocation2 + $0x178] sm:$0x3] %v1185_v36  ;;  %v1624_v7 = vld [vmem:[#allocation2 + $0x38] sm:$0x3] }
 0x251   :  { %v1284_v37 = vpop.f32.mrb[26].mxu0  ;;  %v1361_v44 = vpop.f32.mrb[26].mxu1 }
 0x252   :  { %1371 = vst [vmem:[#allocation2 + $0x1a0] sm:$0x3] %v1284_v37  ;;  %1373 = vst [vmem:[#allocation2 + $0x1b0] sm:$0x3] %v1361_v44  ;;  %v1286_v45 = vpop.f32.mrb[27].mxu0  ;;  %v1363_v46 = vpop.f32.mrb[27].mxu1 }
 0x253   :  { %1372 = vst [vmem:[#allocation2 + $0x1a8] sm:$0x3] %v1286_v45  ;;  %1374 = vst [vmem:[#allocation2 + $0x1b8] sm:$0x3] %v1363_v46 }
 0x271   :  { %v1462_v50 = vpop.f32.mrb[30].mxu0  ;;  %v1539_v53 = vpop.f32.mrb[30].mxu1 }
 0x272   :  { %1549 = vst [vmem:[#allocation2 + $0x1e0] sm:$0x3] %v1462_v50  ;;  %1551 = vst [vmem:[#allocation2 + $0x1f0] sm:$0x3] %v1539_v53  ;;  %v1464_v57 = vpop.f32.mrb[31].mxu0  ;;  %v1541_v60 = vpop.f32.mrb[31].mxu1 }
 0x273   :  { %1550 = vst [vmem:[#allocation2 + $0x1e8] sm:$0x3] %v1464_v57  ;;  %1552 = vst [vmem:[#allocation2 + $0x1f8] sm:$0x3] %v1541_v60 }
 0x28d   :  { %v1691_v4 = vpop.f32.mrb[0].mxu0  ;;  %v1768_v6 = vpop.f32.mrb[0].mxu1 }
 0x28e   :  { %6371 = vtanh.f32 %v1691_v4  ;;  %v1693_v12 = vpop.f32.mrb[1].mxu0  ;;  %v1770_v9 = vpop.f32.mrb[1].mxu1 }
 0x28f   :  { %6373 = vtanh.f32 %v1693_v12 }
 0x290   :  { %6375 = vtanh.f32 %v1768_v6 }
 0x291   :  { %v1697_v15 = vpop.f32.mrb[32].mxu0  ;;  %v1774_v16 = vpop.f32.mrb[32].mxu1 }
 0x292   :  { %v1783_v28 = vadd.f32 %v1697_v15, %v1621_v13  ;;  %v1699_v10 = vpop.f32.mrb[33].mxu0  ;;  %v1776_v14 = vpop.f32.mrb[33].mxu1  ;;  %v1785_v25 = vadd.f32 %v1774_v16, %v1623_v20 }
 0x293   :  { %v1784_v21 = vadd.f32 %v1699_v10, %v1622_v33  ;;  %v1786_v37 = vadd.f32 %v1776_v14, %v1624_v7 }
 0x294   :  { %6377 = vtanh.f32 %v1783_v28 }
 0x295   :  { %6379 = vtanh.f32 %v1784_v21 }
 0x296   :  { %6381 = vtanh.f32 %v1785_v25 }
 0x297   :  { %6383 = vtanh.f32 %v1770_v9 }
 0x298   :  { %v6372_v34 = vpop.eup %6371  ;;  %6385 = vtanh.f32 %v1786_v37  ;;  %v1824_v37 = vld [vmem:[#allocation2 + $0x68] sm:$0x3] }
 0x299   :  { %v1795_v39 = vadd.f32 1.0, %v6372_v34  ;;  %v6374_v56 = vpop.eup %6373 }
 0x29a   :  { %v1799_v1 = vadd.f32 1.0, %v6374_v56  ;;  %v6376_v2 = vpop.eup %6375 }
 0x29b   :  { %v1797_v0 = vmul.f32 0.5, %v1795_v39 }
 0x29c   :  { %v1801_v17 = vmul.f32 0.5, %v1799_v1 }
 0x29d   :  { %v1809_v36 = vmul.f32 %v6376_v2, %v1797_v0  ;;  %v1823_v2 = vld [vmem:[#allocation2 + $0x60] sm:$0x3] }
 0x29e   :  { %v6378_v44 = vpop.eup %6377  ;;  %v1807_v45 = vmul.f32 0.0, %v1801_v17 }
 0x29f   :  { %v1796_v46 = vadd.f32 1.0, %v6378_v44  ;;  %v6380_v50 = vpop.eup %6379 }
 0x2a0   :  { %v7315_v53 = vadd.f32 %v1809_v36, %v1807_v45  ;;  %v1800_v60 = vadd.f32 1.0, %v6380_v50  ;;  %v6382_v4 = vpop.eup %6381 }
 0x2a1   :  { %v1798_v57 = vmul.f32 0.5, %v1796_v46  ;;  %v6384_v9 = vpop.eup %6383  ;;  %v1825_v46 = vld [vmem:[#allocation2 + $0x70] sm:$0x3] }
 0x2a2   :  { %6387 = vtanh.f32 %v7315_v53  ;;  %v1802_v6 = vmul.f32 0.5, %v1800_v60  ;;  %v1803_v16 = vadd.f32 1.0, %v6384_v9  ;;  %v6386_v28 = vpop.eup %6385 }
 0x2a3   :  { %v1810_v12 = vmul.f32 %v6382_v4, %v1798_v57  ;;  %v1804_v20 = vadd.f32 1.0, %v6386_v28 }
 0x2a4   :  { %v1808_v13 = vmul.f32 0.0, %v1802_v6  ;;  %v1805_v33 = vmul.f32 0.5, %v1803_v16 }
 0x2a5   :  { %v1806_v21 = vmul.f32 0.5, %v1804_v20 }
 0x2a6   :  { %v7318_v15 = vadd.f32 %v1810_v12, %v1808_v13 }
 0x2a8   :  { %6389 = vtanh.f32 %v7318_v15 }
 0x2ac   :  { %v6388_v10 = vpop.eup %6387 }
 0x2ad   :  { %v1815_v14 = vmul.f32 %v6388_v10, %v1805_v33  ;;  %v1826_v33 = vld [vmem:[#allocation2 + $0x78] sm:$0x3] }
 0x2af   :  { %1817 = vst [vmem:[#allocation3] sm:$0xff] %v1815_v14  ;;  %1892 = vmatmul.mubr.f32.vlgmr.msra.gmra.mrb[4].mxu0 %v1815_v14  ;;  %1969 = vmatmul.mubr.f32.vlgmr.msra.gmra.mrb[4].mxu1 %v1815_v14 }
 0x2b0   :  { %1897 = vmatprep.mubr.f32.mxu0 %v6637_v5  ;;  %1974 = vmatprep.mubr.f32.mxu1 %v6637_v5 }
 0x2b1   :  { %5703 = vmatpush1.bf16.msra.mxu0 %v7171_v18  ;;  %5735 = vmatpush1.bf16.msra.mxu1 %v7173_v19 }
 0x2b2   :  { %v6390_v25 = vpop.eup %6389  ;;  %5705 = vmatprep.subr.bf16.mxu0 %v7178_v41  ;;  %5737 = vmatprep.subr.bf16.mxu1 %v7180_v42 }
 0x2b3   :  { %v1816_v34 = vmul.f32 %v6390_v25, %v1806_v21 }
 0x2b5   :  { %1818 = vst [vmem:[#allocation3 + $0x8] sm:$0x3] %v1816_v34  ;;  %1898 = vmatmul.mubr.f32.gmra.mrb[34].mxu0 %v1816_v34  ;;  %1975 = vmatmul.mubr.f32.gmra.mrb[34].mxu1 %v1816_v34 }
 0x2b6   :  { %5707 = vmatpush1.bf16.msra.mxu0 %v7186_v47  ;;  %5739 = vmatpush1.bf16.msra.mxu1 %v7188_v49 }
 0x2b7   :  { %5709 = vmatprep.subr.bf16.mxu0 %v7192_v54  ;;  %5741 = vmatprep.subr.bf16.mxu1 %v7194_v55 }
 0x2b8   :  { %2094 = vmatprep.mubr.f32.mxu0 %v6637_v5  ;;  %2171 = vmatprep.mubr.f32.mxu1 %v6637_v5 }
 0x2ba   :  { %5711 = vmatpush1.bf16.msra.mxu0 %v7203_v63  ;;  %5743 = vmatpush1.bf16.msra.mxu1 %v7205_v3 }
 0x2bb   :  { %5713 = vmatprep.subr.bf16.mxu0 %v7209_v8  ;;  %5745 = vmatprep.subr.bf16.mxu1 %v7211_v11 }
 0x2be   :  { %5715 = vmatpush1.bf16.msra.mxu0 %v7217_v23  ;;  %5747 = vmatpush1.bf16.msra.mxu1 %v7219_v24 }
 0x2bf   :  { %5717 = vmatprep.subr.bf16.mxu0 %v7223_v31  ;;  %5749 = vmatprep.subr.bf16.mxu1 %v7225_v32 }
 0x2c2   :  { %5719 = vmatpush1.bf16.msra.mxu0 %v7229_v29  ;;  %5751 = vmatpush1.bf16.msra.mxu1 %v7231_v30 }
 0x2c3   :  { %5721 = vmatprep.subr.bf16.mxu0 %v7235_v51  ;;  %5753 = vmatprep.subr.bf16.mxu1 %v7237_v52 }
 0x2c6   :  { %5723 = vmatpush1.bf16.msra.mxu0 %v7241_v26  ;;  %5755 = vmatpush1.bf16.msra.mxu1 %v7243_v35 }
 0x2c7   :  { %5725 = vmatprep.subr.bf16.mxu0 %v7247_v38  ;;  %5757 = vmatprep.subr.bf16.mxu1 %v7249_v43 }
 0x2ca   :  { %5727 = vmatpush1.bf16.msra.mxu0 %v7253_v58  ;;  %5759 = vmatpush1.bf16.msra.mxu1 %v7255_v59 }
 0x2cb   :  { %5729 = vmatprep.subr.bf16.mxu0 %v7259_v61  ;;  %5761 = vmatprep.subr.bf16.mxu1 %v7261_v62 }
 0x2ce   :  { %5731 = vmatpush1.bf16.msra.mxu0 %v7265_v22  ;;  %5763 = vmatpush1.bf16.msra.mxu1 %v7267_v27 }
 0x2cf   :  { %5765 = vmatprep.subr.bf16.mxu0 %v7165_v40  ;;  %5797 = vmatprep.subr.bf16.mxu1 %v7167_v48 }
 0x382   :  { %v1893_v39 = vpop.f32.mrb[4].mxu0  ;;  %v1970_v56 = vpop.f32.mrb[4].mxu1 }
 0x383   :  { %6391 = vtanh.f32 %v1893_v39  ;;  %v1895_v0 = vpop.f32.mrb[5].mxu0  ;;  %v1972_v1 = vpop.f32.mrb[5].mxu1 }
 0x384   :  { %6393 = vtanh.f32 %v1895_v0 }
 0x385   :  { %6395 = vtanh.f32 %v1970_v56 }
 0x388   :  { %v1899_v7 = vpop.f32.mrb[34].mxu0  ;;  %v1976_v17 = vpop.f32.mrb[34].mxu1 }
 0x389   :  { %v1985_v36 = vadd.f32 %v1899_v7, %v1823_v2  ;;  %v1901_v44 = vpop.f32.mrb[35].mxu0  ;;  %v1978_v45 = vpop.f32.mrb[35].mxu1  ;;  %v1987_v57 = vadd.f32 %v1976_v17, %v1825_v46 }
 0x38a   :  { %v1986_v50 = vadd.f32 %v1901_v44, %v1824_v37  ;;  %v1988_v10 = vadd.f32 %v1978_v45, %v1826_v33 }
 0x38b   :  { %6397 = vtanh.f32 %v1985_v36 }
 0x38c   :  { %6399 = vtanh.f32 %v1986_v50 }
 0x38d   :  { %v6392_v60 = vpop.eup %6391  ;;  %6401 = vtanh.f32 %v1987_v57 }
 0x38e   :  { %v1997_v4 = vadd.f32 1.0, %v6392_v60  ;;  %v6394_v6 = vpop.eup %6393  ;;  %6403 = vtanh.f32 %v1972_v1 }
 0x38f   :  { %v2001_v9 = vadd.f32 1.0, %v6394_v6  ;;  %v6396_v13 = vpop.eup %6395  ;;  %6405 = vtanh.f32 %v1988_v10  ;;  %v2027_v10 = vld [vmem:[#allocation2 + $0xa8] sm:$0x3] }
 0x390   :  { %v1999_v12 = vmul.f32 0.5, %v1997_v4 }
 0x391   :  { %v2003_v16 = vmul.f32 0.5, %v2001_v9 }
 0x392   :  { %v2011_v28 = vmul.f32 %v6396_v13, %v1999_v12  ;;  %v2026_v13 = vld [vmem:[#allocation2 + $0xa0] sm:$0x3] }
 0x393   :  { %v2009_v14 = vmul.f32 %v2003_v16, %v7315_v53 }
 0x395   :  { %v6398_v20 = vpop.eup %6397  ;;  %v7358_v21 = vadd.f32 %v2011_v28, %v2009_v14 }
 0x396   :  { %v1998_v25 = vadd.f32 1.0, %v6398_v20  ;;  %v6400_v34 = vpop.eup %6399 }
 0x397   :  { %6407 = vtanh.f32 %v7358_v21  ;;  %v2002_v56 = vadd.f32 1.0, %v6400_v34  ;;  %v6402_v0 = vpop.eup %6401 }
 0x398   :  { %v2000_v39 = vmul.f32 0.5, %v1998_v25  ;;  %v6404_v2 = vpop.eup %6403  ;;  %v2028_v25 = vld [vmem:[#allocation2 + $0xb0] sm:$0x3] }
 0x399   :  { %v2004_v1 = vmul.f32 0.5, %v2002_v56  ;;  %v2005_v36 = vadd.f32 1.0, %v6404_v2  ;;  %v6406_v53 = vpop.eup %6405 }
 0x39a   :  { %v2012_v7 = vmul.f32 %v6402_v0, %v2000_v39  ;;  %v2006_v50 = vadd.f32 1.0, %v6406_v53 }
 0x39b   :  { %v2010_v17 = vmul.f32 %v2004_v1, %v7318_v15  ;;  %v2007_v44 = vmul.f32 0.5, %v2005_v36 }
 0x39c   :  { %v2008_v15 = vmul.f32 0.5, %v2006_v50 }
 0x39d   :  { %v7362_v37 = vadd.f32 %v2012_v7, %v2010_v17 }
 0x39f   :  { %6409 = vtanh.f32 %v7362_v37 }
 0x3a1   :  { %v6408_v45 = vpop.eup %6407 }
 0x3a2   :  { %v2017_v46 = vmul.f32 %v6408_v45, %v2007_v44  ;;  %v2029_v45 = vld [vmem:[#allocation2 + $0xb8] sm:$0x3] }
 0x3a4   :  { %2020 = vst [vmem:[#allocation3 + $0x10] sm:$0xff] %v2017_v46  ;;  %2095 = vmatmul.mubr.f32.vlgmr.msra.gmra.mrb[8].mxu0 %v2017_v46  ;;  %2172 = vmatmul.mubr.f32.vlgmr.msra.gmra.mrb[8].mxu1 %v2017_v46 }
 0x3a5   :  { %2100 = vmatprep.mubr.f32.mxu0 %v6637_v5  ;;  %2177 = vmatprep.mubr.f32.mxu1 %v6637_v5 }
 0x3a6   :  { %5767 = vmatpush1.bf16.msra.mxu0 %v7171_v18  ;;  %5799 = vmatpush1.bf16.msra.mxu1 %v7173_v19 }
 0x3a7   :  { %5769 = vmatprep.subr.bf16.mxu0 %v7178_v41  ;;  %5801 = vmatprep.subr.bf16.mxu1 %v7180_v42 }
 0x3a9   :  { %v6410_v57 = vpop.eup %6409 }
 0x3aa   :  { %v2018_v60 = vmul.f32 %v6410_v57, %v2008_v15  ;;  %5771 = vmatpush1.bf16.msra.mxu0 %v7186_v47  ;;  %5803 = vmatpush1.bf16.msra.mxu1 %v7188_v49 }
 0x3ab   :  { %5773 = vmatprep.subr.bf16.mxu0 %v7192_v54  ;;  %5805 = vmatprep.subr.bf16.mxu1 %v7194_v55 }
 0x3ac   :  { %2021 = vst [vmem:[#allocation3 + $0x18] sm:$0x3] %v2018_v60  ;;  %2101 = vmatmul.mubr.f32.gmra.mrb[36].mxu0 %v2018_v60  ;;  %2178 = vmatmul.mubr.f32.gmra.mrb[36].mxu1 %v2018_v60 }
 0x3ad   :  { %2297 = vmatprep.mubr.f32.mxu0 %v6637_v5  ;;  %2374 = vmatprep.mubr.f32.mxu1 %v6637_v5 }
 0x3ae   :  { %5775 = vmatpush1.bf16.msra.mxu0 %v7203_v63  ;;  %5807 = vmatpush1.bf16.msra.mxu1 %v7205_v3 }
 0x3af   :  { %5777 = vmatprep.subr.bf16.mxu0 %v7209_v8  ;;  %5809 = vmatprep.subr.bf16.mxu1 %v7211_v11 }
 0x3b2   :  { %5779 = vmatpush1.bf16.msra.mxu0 %v7217_v23  ;;  %5811 = vmatpush1.bf16.msra.mxu1 %v7219_v24 }
 0x3b3   :  { %5781 = vmatprep.subr.bf16.mxu0 %v7223_v31  ;;  %5813 = vmatprep.subr.bf16.mxu1 %v7225_v32 }
 0x3b6   :  { %5783 = vmatpush1.bf16.msra.mxu0 %v7229_v29  ;;  %5815 = vmatpush1.bf16.msra.mxu1 %v7231_v30 }
 0x3b7   :  { %5785 = vmatprep.subr.bf16.mxu0 %v7235_v51  ;;  %5817 = vmatprep.subr.bf16.mxu1 %v7237_v52 }
 0x3ba   :  { %5787 = vmatpush1.bf16.msra.mxu0 %v7241_v26  ;;  %5819 = vmatpush1.bf16.msra.mxu1 %v7243_v35 }
 0x3bb   :  { %5789 = vmatprep.subr.bf16.mxu0 %v7247_v38  ;;  %5821 = vmatprep.subr.bf16.mxu1 %v7249_v43 }
 0x3be   :  { %5791 = vmatpush1.bf16.msra.mxu0 %v7253_v58  ;;  %5823 = vmatpush1.bf16.msra.mxu1 %v7255_v59 }
 0x3bf   :  { %5793 = vmatprep.subr.bf16.mxu0 %v7259_v61  ;;  %5825 = vmatprep.subr.bf16.mxu1 %v7261_v62 }
 0x3c2   :  { %5795 = vmatpush1.bf16.msra.mxu0 %v7265_v22  ;;  %5827 = vmatpush1.bf16.msra.mxu1 %v7267_v27 }
 0x3c3   :  { %5829 = vmatprep.subr.bf16.mxu0 %v7165_v40  ;;  %5861 = vmatprep.subr.bf16.mxu1 %v7167_v48 }
 0x477   :  { %v2096_v4 = vpop.f32.mrb[8].mxu0  ;;  %v2173_v6 = vpop.f32.mrb[8].mxu1 }
 0x478   :  { %6411 = vtanh.f32 %v2096_v4  ;;  %v2098_v12 = vpop.f32.mrb[9].mxu0  ;;  %v2175_v9 = vpop.f32.mrb[9].mxu1 }
 0x479   :  { %6413 = vtanh.f32 %v2098_v12 }
 0x47a   :  { %6415 = vtanh.f32 %v2173_v6 }
 0x47f   :  { %v2102_v16 = vpop.f32.mrb[36].mxu0  ;;  %v2179_v28 = vpop.f32.mrb[36].mxu1 }
 0x480   :  { %v2188_v33 = vadd.f32 %v2102_v16, %v2026_v13  ;;  %v2104_v14 = vpop.f32.mrb[37].mxu0  ;;  %v2181_v20 = vpop.f32.mrb[37].mxu1  ;;  %v2190_v56 = vadd.f32 %v2179_v28, %v2028_v25 }
 0x481   :  { %v2189_v34 = vadd.f32 %v2104_v14, %v2027_v10  ;;  %v2191_v50 = vadd.f32 %v2181_v20, %v2029_v45 }
 0x482   :  { %v6412_v39 = vpop.eup %6411  ;;  %6417 = vtanh.f32 %v2188_v33 }
 0x483   :  { %v2200_v0 = vadd.f32 1.0, %v6412_v39  ;;  %v6414_v2 = vpop.eup %6413  ;;  %6419 = vtanh.f32 %v2189_v34  ;;  %v3390_v39 = vld [vmem:[#allocation3 + $0x12] sm:$0x1] }
 0x484   :  { %v2204_v7 = vadd.f32 1.0, %v6414_v2  ;;  %6421 = vtanh.f32 %v2175_v9  ;;  %v6416_v17 = vpop.eup %6415 }
 0x485   :  { %v2202_v1 = vmul.f32 0.5, %v2200_v0  ;;  %6423 = vtanh.f32 %v2190_v56  ;;  %v3533_v56 = vld [vmem:[#allocation3 + $0x14] sm:$0x1]  ;;  %v3676_v0 = vld [vmem:[#allocation3 + $0x16] sm:$0x1] }
 0x486   :  { %v2206_v36 = vmul.f32 0.5, %v2204_v7  ;;  %v4155_v45 = vrot.slane %v3533_v56, 7 }
 0x487   :  { %v2214_v53 = vmul.f32 %v6416_v17, %v2202_v1  ;;  %v4062_v17 = vrot.slane %v3390_v39, 7 }
 0x488   :  { %v2212_v44 = vmul.f32 %v2206_v36, %v7358_v21 }
 0x48a   :  { %v7402_v46 = vadd.f32 %v2214_v53, %v2212_v44  ;;  %v3240_v53 = vld [vmem:[#allocation3] sm:$0x1]  ;;  %v3389_v44 = vld [vmem:[#allocation3 + $0x2] sm:$0x1] }
 0x48c   :  { %v6418_v15 = vpop.eup %6417  ;;  %6425 = vtanh.f32 %v7402_v46 }
 0x48d   :  { %v2201_v57 = vadd.f32 1.0, %v6418_v15  ;;  %v6420_v60 = vpop.eup %6419  ;;  %6427 = vtanh.f32 %v2191_v50  ;;  %v4248_v50 = vrot.slane %v3676_v0, 7 }
 0x48e   :  { %v6422_v4 = vpop.eup %6421  ;;  %v2205_v12 = vadd.f32 1.0, %v6420_v60  ;;  %v3532_v60 = vld [vmem:[#allocation3 + $0x4] sm:$0x1] }
 0x48f   :  { %v2203_v6 = vmul.f32 0.5, %v2201_v57  ;;  %v6424_v9 = vpop.eup %6423  ;;  %v2208_v28 = vadd.f32 1.0, %v6422_v4 }
 0x490   :  { %v2207_v13 = vmul.f32 0.5, %v2205_v12 }
 0x491   :  { %v2215_v16 = vmul.f32 %v6424_v9, %v2203_v6  ;;  %v2210_v10 = vmul.f32 0.5, %v2208_v28 }
 0x492   :  { %v2213_v33 = vmul.f32 %v2207_v13, %v7362_v37  ;;  %v3241_v37 = vld [vmem:[#allocation3 + $0x10] sm:$0x1]  ;;  %v4063_v13 = vsel %vm3298_vm0, %v4062_v17, %v3389_v44  ;;  %v3818_v44 = vld [vmem:[#allocation3 + $0x8] sm:$0x1] }
 0x493   :  { %v3969_v1 = vrot.slane %v3241_v37, 7  ;;  %v3819_v37 = vld [vmem:[#allocation3 + $0x18] sm:$0x1] }
 0x494   :  { %v7406_v21 = vadd.f32 %v2215_v16, %v2213_v33  ;;  %v3675_v33 = vld [vmem:[#allocation3 + $0x6] sm:$0x1] }
 0x495   :  { %v3970_v4 = vsel %vm3298_vm0, %v3969_v1, %v3240_v53  ;;  %v4341_v1 = vrot.slane %v3819_v37, 7 }
 0x496   :  { %v6426_v14 = vpop.eup %6425  ;;  %6429 = vtanh.f32 %v7406_v21 }
 0x497   :  { %v2220_v20 = vmul.f32 %v6426_v14, %v2210_v10  ;;  %v6428_v25 = vpop.eup %6427  ;;  %v3844_v14 = vld [vmem:[#allocation3 + $0x19] sm:$0x1] }
 0x498   :  { %v2209_v34 = vadd.f32 1.0, %v6428_v25  ;;  %v4156_v25 = vsel %vm3298_vm0, %v4155_v45, %v3532_v60 }
 0x499   :  { %2223 = vst [vmem:[#allocation3 + $0x20] sm:$0xff] %v2220_v20  ;;  %2298 = vmatmul.mubr.f32.vlgmr.msra.gmra.mrb[12].mxu0 %v2220_v20  ;;  %2375 = vmatmul.mubr.f32.vlgmr.msra.gmra.mrb[12].mxu1 %v2220_v20 }
 0x49a   :  { %2303 = vmatprep.mubr.f32.mxu0 %v6637_v5  ;;  %2380 = vmatprep.mubr.f32.mxu1 %v6637_v5  ;;  %v2211_v2 = vmul.f32 0.5, %v2209_v34  ;;  %v4249_v34 = vsel %vm3298_vm0, %v4248_v50, %v3675_v33 }
 0x49b   :  { %5831 = vmatpush1.bf16.msra.mxu0 %v7171_v18  ;;  %5863 = vmatpush1.bf16.msra.mxu1 %v7173_v19 }
 0x49c   :  { %5833 = vmatprep.subr.bf16.mxu0 %v7178_v41  ;;  %5865 = vmatprep.subr.bf16.mxu1 %v7180_v42 }
 0x49f   :  { %5835 = vmatpush1.bf16.msra.mxu0 %v7186_v47  ;;  %5867 = vmatpush1.bf16.msra.mxu1 %v7188_v49 }
 0x4a0   :  { %v6430_v7 = vpop.eup %6429  ;;  %5837 = vmatprep.subr.bf16.mxu0 %v7192_v54  ;;  %5869 = vmatprep.subr.bf16.mxu1 %v7194_v55  ;;  %v3242_v15 = vld [vmem:[#allocation3 + $0x20] sm:$0x1]  ;;  %v3391_v57 = vld [vmem:[#allocation3 + $0x22] sm:$0x1]  ;;  %v3534_v12 = vld [vmem:[#allocation3 + $0x24] sm:$0x1] }
 0x4a1   :  { %v2221_v36 = vmul.f32 %v6430_v7, %v2211_v2  ;;  %v3971_v6 = vrot.slane %v3242_v15, 6  ;;  %v3677_v9 = vld [vmem:[#allocation3 + $0x26] sm:$0x1]  ;;  %v4064_v16 = vrot.slane %v3391_v57, 6  ;;  %v4157_v28 = vrot.slane %v3534_v12, 6 }
 0x4a2   :  { %v4250_v10 = vrot.slane %v3677_v9, 6  ;;  %v3876_v2 = vrot.slane %v3844_v14, 7  ;;  %v4342_v15 = vsel %vm3298_vm0, %v4341_v1, %v3818_v44  ;;  %v2230_v14 = vld [vmem:[#allocation2 + $0xe8] sm:$0x3] }
 0x4a3   :  { %2224 = vst [vmem:[#allocation3 + $0x28] sm:$0x3] %v2221_v36  ;;  %2304 = vmatmul.mubr.f32.gmra.mrb[38].mxu0 %v2221_v36  ;;  %2381 = vmatmul.mubr.f32.gmra.mrb[38].mxu1 %v2221_v36  ;;  %v7426_v20 = vsel %vm3301_vm1, %v3971_v6, %v3970_v4  ;;  %v7433_v39 = vsel %vm3301_vm1, %v4064_v16, %v4063_v13  ;;  %v3843_v36 = vld [vmem:[#allocation3 + $0x9] sm:$0x1]  ;;  %v2229_v13 = vld [vmem:[#allocation2 + $0xe0] sm:$0x3] }
 0x4a4   :  { %5839 = vmatpush1.bf16.msra.mxu0 %v7203_v63  ;;  %5871 = vmatpush1.bf16.msra.mxu1 %v7205_v3  ;;  %v7436_v56 = vsel %vm3301_vm1, %v4157_v28, %v4156_v25  ;;  %v7439_v0 = vsel %vm3301_vm1, %v4250_v10, %v4249_v34  ;;  %v3877_v50 = vsel %vm3298_vm0, %v3876_v2, %v3843_v36  ;;  %v2231_v2 = vld [vmem:[#allocation2 + $0xf0] sm:$0x3] }
 0x4a5   :  { %5841 = vmatprep.subr.bf16.mxu0 %v7209_v8  ;;  %5873 = vmatprep.subr.bf16.mxu1 %v7211_v11 }
 0x4a6   :  { %2500 = vmatprep.mubr.f32.mxu0 %v6637_v5  ;;  %2577 = vmatprep.mubr.f32.mxu1 %v6637_v5 }
 0x4a8   :  { %5843 = vmatpush1.bf16.msra.mxu0 %v7217_v23  ;;  %5875 = vmatpush1.bf16.msra.mxu1 %v7219_v24 }
 0x4a9   :  { %5845 = vmatprep.subr.bf16.mxu0 %v7223_v31  ;;  %5877 = vmatprep.subr.bf16.mxu1 %v7225_v32 }
 0x4aa   :  { %v3845_v7 = vld [vmem:[#allocation3 + $0x29] sm:$0x1]  ;;  %v3820_v17 = vld [vmem:[#allocation3 + $0x28] sm:$0x1] }
 0x4ab   :  { %v3878_v53 = vrot.slane %v3845_v7, 6  ;;  %v4343_v45 = vrot.slane %v3820_v17, 6 }
 0x4ac   :  { %5847 = vmatpush1.bf16.msra.mxu0 %v7229_v29  ;;  %5879 = vmatpush1.bf16.msra.mxu1 %v7231_v30 }
 0x4ad   :  { %5849 = vmatprep.subr.bf16.mxu0 %v7235_v51  ;;  %5881 = vmatprep.subr.bf16.mxu1 %v7237_v52  ;;  %v7452_v57 = vsel %vm3301_vm1, %v3878_v53, %v3877_v50  ;;  %v7455_v60 = vsel %vm3301_vm1, %v4343_v45, %v4342_v15 }
 0x4b0   :  { %5851 = vmatpush1.bf16.msra.mxu0 %v7241_v26  ;;  %5883 = vmatpush1.bf16.msra.mxu1 %v7243_v35 }
 0x4b1   :  { %5853 = vmatprep.subr.bf16.mxu0 %v7247_v38  ;;  %5885 = vmatprep.subr.bf16.mxu1 %v7249_v43 }
 0x4b4   :  { %5855 = vmatpush1.bf16.msra.mxu0 %v7253_v58  ;;  %5887 = vmatpush1.bf16.msra.mxu1 %v7255_v59 }
 0x4b5   :  { %5857 = vmatprep.subr.bf16.mxu0 %v7259_v61  ;;  %5889 = vmatprep.subr.bf16.mxu1 %v7261_v62 }
 0x4b8   :  { %5859 = vmatpush1.bf16.msra.mxu0 %v7265_v22  ;;  %5891 = vmatpush1.bf16.msra.mxu1 %v7267_v27 }
 0x4b9   :  { %5893 = vmatprep.subr.bf16.mxu0 %v7165_v40  ;;  %5925 = vmatprep.subr.bf16.mxu1 %v7167_v48 }
 0x56c   :  { %v2299_v4 = vpop.f32.mrb[12].mxu0  ;;  %v2376_v6 = vpop.f32.mrb[12].mxu1 }
 0x56d   :  { %6431 = vtanh.f32 %v2299_v4  ;;  %v2301_v12 = vpop.f32.mrb[13].mxu0  ;;  %v2378_v9 = vpop.f32.mrb[13].mxu1 }
 0x56e   :  { %6433 = vtanh.f32 %v2301_v12 }
 0x56f   :  { %6435 = vtanh.f32 %v2376_v6  ;;  %v2232_v6 = vld [vmem:[#allocation2 + $0xf8] sm:$0x3] }
 0x576   :  { %v2305_v16 = vpop.f32.mrb[38].mxu0  ;;  %v2382_v28 = vpop.f32.mrb[38].mxu1 }
 0x577   :  { %v6432_v33 = vpop.eup %6431  ;;  %v2391_v10 = vadd.f32 %v2305_v16, %v2229_v13  ;;  %v2307_v25 = vpop.f32.mrb[39].mxu0  ;;  %v2393_v17 = vadd.f32 %v2382_v28, %v2231_v2 }
 0x578   :  { %v2384_v34 = vpop.f32.mrb[39].mxu1  ;;  %v2403_v37 = vadd.f32 1.0, %v6432_v33  ;;  %v2392_v1 = vadd.f32 %v2307_v25, %v2230_v14  ;;  %v6434_v7 = vpop.eup %6433 }
 0x579   :  { %6437 = vtanh.f32 %v2391_v10  ;;  %v2407_v53 = vadd.f32 1.0, %v6434_v7  ;;  %v6436_v44 = vpop.eup %6435  ;;  %v2394_v12 = vadd.f32 %v2384_v34, %v2232_v6 }
 0x57a   :  { %v2405_v36 = vmul.f32 0.5, %v2403_v37  ;;  %6439 = vtanh.f32 %v2378_v9 }
 0x57b   :  { %6441 = vtanh.f32 %v2392_v1  ;;  %v2409_v45 = vmul.f32 0.5, %v2407_v53 }
 0x57c   :  { %v2417_v50 = vmul.f32 %v6436_v44, %v2405_v36  ;;  %6443 = vtanh.f32 %v2393_v17 }
 0x57d   :  { %v2415_v15 = vmul.f32 %v2409_v45, %v7402_v46 }
 0x57f   :  { %v7470_v4 = vadd.f32 %v2417_v50, %v2415_v15 }
 0x581   :  { %6445 = vtanh.f32 %v7470_v4 }
 0x582   :  { %6447 = vtanh.f32 %v2394_v12 }
 0x583   :  { %v6438_v13 = vpop.eup %6437 }
 0x584   :  { %v6440_v16 = vpop.eup %6439  ;;  %v2404_v33 = vadd.f32 1.0, %v6438_v13 }
 0x585   :  { %v6442_v28 = vpop.eup %6441  ;;  %v2411_v25 = vadd.f32 1.0, %v6440_v16 }
 0x586   :  { %v2406_v10 = vmul.f32 0.5, %v2404_v33  ;;  %v2408_v14 = vadd.f32 1.0, %v6442_v28  ;;  %v6444_v9 = vpop.eup %6443 }
 0x587   :  { %v2413_v46 = vmul.f32 0.5, %v2411_v25 }
 0x588   :  { %v2410_v37 = vmul.f32 0.5, %v2408_v14  ;;  %v2418_v2 = vmul.f32 %v6444_v9, %v2406_v10 }
 0x58a   :  { %v2416_v1 = vmul.f32 %v2410_v37, %v7406_v21 }
 0x58b   :  { %v6446_v7 = vpop.eup %6445 }
 0x58c   :  { %v7474_v17 = vadd.f32 %v2418_v2, %v2416_v1  ;;  %v2423_v36 = vmul.f32 %v6446_v7, %v2413_v46  ;;  %v6448_v34 = vpop.eup %6447 }
 0x58d   :  { %v2412_v21 = vadd.f32 1.0, %v6448_v34  ;;  %v2432_v34 = vld [vmem:[#allocation2 + $0x120] sm:$0x3] }
 0x58e   :  { %6449 = vtanh.f32 %v7474_v17  ;;  %2426 = vst [vmem:[#allocation3 + $0x30] sm:$0xff] %v2423_v36  ;;  %2501 = vmatmul.mubr.f32.vlgmr.msra.gmra.mrb[16].mxu0 %v2423_v36  ;;  %2578 = vmatmul.mubr.f32.vlgmr.msra.gmra.mrb[16].mxu1 %v2423_v36 }
 0x58f   :  { %2506 = vmatprep.mubr.f32.mxu0 %v6637_v5  ;;  %2583 = vmatprep.mubr.f32.mxu1 %v6637_v5  ;;  %v2414_v53 = vmul.f32 0.5, %v2412_v21 }
 0x590   :  { %5895 = vmatpush1.bf16.msra.mxu0 %v7171_v18  ;;  %5927 = vmatpush1.bf16.msra.mxu1 %v7173_v19 }
 0x591   :  { %5897 = vmatprep.subr.bf16.mxu0 %v7178_v41  ;;  %5929 = vmatprep.subr.bf16.mxu1 %v7180_v42 }
 0x594   :  { %5899 = vmatpush1.bf16.msra.mxu0 %v7186_v47  ;;  %5931 = vmatpush1.bf16.msra.mxu1 %v7188_v49 }
 0x595   :  { %5901 = vmatprep.subr.bf16.mxu0 %v7192_v54  ;;  %5933 = vmatprep.subr.bf16.mxu1 %v7194_v55  ;;  %v3243_v45 = vld [vmem:[#allocation3 + $0x30] sm:$0x1]  ;;  %v3392_v50 = vld [vmem:[#allocation3 + $0x32] sm:$0x1]  ;;  %v3535_v12 = vld [vmem:[#allocation3 + $0x34] sm:$0x1] }
 0x596   :  { %v3973_v6 = vrot.slane %v3243_v45, 5  ;;  %v3678_v13 = vld [vmem:[#allocation3 + $0x36] sm:$0x1]  ;;  %v4066_v16 = vrot.slane %v3392_v50, 5  ;;  %v4159_v33 = vrot.slane %v3535_v12, 5 }
 0x597   :  { %v4252_v10 = vrot.slane %v3678_v13, 5  ;;  %v2433_v50 = vld [vmem:[#allocation2 + $0x128] sm:$0x3] }
 0x598   :  { %v6450_v44 = vpop.eup %6449  ;;  %5903 = vmatpush1.bf16.msra.mxu0 %v7203_v63  ;;  %5935 = vmatpush1.bf16.msra.mxu1 %v7205_v3  ;;  %v7493_v28 = vsel %vm3304_vm2, %v3973_v6, %v7426_v20  ;;  %v7499_v14 = vsel %vm3304_vm2, %v4066_v16, %v7433_v39  ;;  %v7503_v9 = vsel %vm3304_vm2, %v4159_v33, %v7436_v56  ;;  %v2434_v16 = vld [vmem:[#allocation2 + $0x130] sm:$0x3] }
 0x599   :  { %v2424_v15 = vmul.f32 %v6450_v44, %v2414_v53  ;;  %5905 = vmatprep.subr.bf16.mxu0 %v7209_v8  ;;  %5937 = vmatprep.subr.bf16.mxu1 %v7211_v11  ;;  %v7509_v20 = vsel %vm3304_vm2, %v4252_v10, %v7439_v0 }
 0x59b   :  { %2427 = vst [vmem:[#allocation3 + $0x38] sm:$0x3] %v2424_v15  ;;  %2507 = vmatmul.mubr.f32.gmra.mrb[40].mxu0 %v2424_v15  ;;  %2584 = vmatmul.mubr.f32.gmra.mrb[40].mxu1 %v2424_v15 }
 0x59c   :  { %2703 = vmatprep.mubr.f32.mxu0 %v6637_v5  ;;  %2780 = vmatprep.mubr.f32.mxu1 %v6637_v5 }
 0x59d   :  { %5907 = vmatpush1.bf16.msra.mxu0 %v7217_v23  ;;  %5939 = vmatpush1.bf16.msra.mxu1 %v7219_v24 }
 0x59e   :  { %5909 = vmatprep.subr.bf16.mxu0 %v7223_v31  ;;  %5941 = vmatprep.subr.bf16.mxu1 %v7225_v32 }
 0x5a1   :  { %5911 = vmatpush1.bf16.msra.mxu0 %v7229_v29  ;;  %5943 = vmatpush1.bf16.msra.mxu1 %v7231_v30 }
 0x5a2   :  { %5913 = vmatprep.subr.bf16.mxu0 %v7235_v51  ;;  %5945 = vmatprep.subr.bf16.mxu1 %v7237_v52  ;;  %v3846_v39 = vld [vmem:[#allocation3 + $0x39] sm:$0x1]  ;;  %v3821_v56 = vld [vmem:[#allocation3 + $0x38] sm:$0x1] }
 0x5a3   :  { %v3880_v25 = vrot.slane %v3846_v39, 5  ;;  %v4345_v37 = vrot.slane %v3821_v56, 5 }
 0x5a5   :  { %5915 = vmatpush1.bf16.msra.mxu0 %v7241_v26  ;;  %5947 = vmatpush1.bf16.msra.mxu1 %v7243_v35  ;;  %v7521_v0 = vsel %vm3304_vm2, %v3880_v25, %v7452_v57  ;;  %v7525_v2 = vsel %vm3304_vm2, %v4345_v37, %v7455_v60 }
 0x5a6   :  { %5917 = vmatprep.subr.bf16.mxu0 %v7247_v38  ;;  %5949 = vmatprep.subr.bf16.mxu1 %v7249_v43 }
 0x5a9   :  { %5919 = vmatpush1.bf16.msra.mxu0 %v7253_v58  ;;  %5951 = vmatpush1.bf16.msra.mxu1 %v7255_v59 }
 0x5aa   :  { %5921 = vmatprep.subr.bf16.mxu0 %v7259_v61  ;;  %5953 = vmatprep.subr.bf16.mxu1 %v7261_v62 }
 0x5ad   :  { %5923 = vmatpush1.bf16.msra.mxu0 %v7265_v22  ;;  %5955 = vmatpush1.bf16.msra.mxu1 %v7267_v27 }
 0x5ae   :  { %5957 = vmatprep.subr.bf16.mxu0 %v7165_v40  ;;  %5989 = vmatprep.subr.bf16.mxu1 %v7167_v48 }
 0x661   :  { %v2502_v57 = vpop.f32.mrb[16].mxu0  ;;  %v2579_v60 = vpop.f32.mrb[16].mxu1 }
 0x662   :  { %6451 = vtanh.f32 %v2502_v57  ;;  %v2504_v1 = vpop.f32.mrb[17].mxu0  ;;  %v2581_v46 = vpop.f32.mrb[17].mxu1 }
 0x663   :  { %6453 = vtanh.f32 %v2504_v1 }
 0x664   :  { %6455 = vtanh.f32 %v2579_v60  ;;  %v2435_v60 = vld [vmem:[#allocation2 + $0x138] sm:$0x3] }
 0x665   :  { %6457 = vtanh.f32 %v2581_v46 }
 0x66c   :  { %v6452_v7 = vpop.eup %6451 }
 0x66d   :  { %v2606_v36 = vadd.f32 1.0, %v6452_v7  ;;  %v6454_v44 = vpop.eup %6453 }
 0x66e   :  { %v2508_v21 = vpop.f32.mrb[40].mxu0  ;;  %v2585_v53 = vpop.f32.mrb[40].mxu1  ;;  %v2610_v13 = vadd.f32 1.0, %v6454_v44 }
 0x66f   :  { %v2594_v45 = vadd.f32 %v2508_v21, %v2432_v34  ;;  %v2510_v15 = vpop.f32.mrb[41].mxu0  ;;  %v2587_v6 = vpop.f32.mrb[41].mxu1  ;;  %v2608_v12 = vmul.f32 0.5, %v2606_v36  ;;  %v2596_v39 = vadd.f32 %v2585_v53, %v2434_v16 }
 0x670   :  { %v2595_v33 = vadd.f32 %v2510_v15, %v2433_v50  ;;  %v6456_v10 = vpop.eup %6455  ;;  %v2612_v56 = vmul.f32 0.5, %v2610_v13  ;;  %v2597_v7 = vadd.f32 %v2587_v6, %v2435_v60 }
 0x671   :  { %6459 = vtanh.f32 %v2594_v45  ;;  %v2620_v25 = vmul.f32 %v6456_v10, %v2608_v12  ;;  %v6458_v1 = vpop.eup %6457 }
 0x672   :  { %6461 = vtanh.f32 %v2595_v33  ;;  %v2618_v37 = vmul.f32 %v2612_v56, %v7470_v4  ;;  %v2614_v21 = vadd.f32 1.0, %v6458_v1 }
 0x673   :  { %6463 = vtanh.f32 %v2596_v39 }
 0x674   :  { %v7538_v57 = vadd.f32 %v2620_v25, %v2618_v37  ;;  %v2616_v12 = vmul.f32 0.5, %v2614_v21 }
 0x676   :  { %6465 = vtanh.f32 %v7538_v57 }
 0x677   :  { %6467 = vtanh.f32 %v2597_v7 }
 0x67b   :  { %v6460_v36 = vpop.eup %6459 }
 0x67c   :  { %v2607_v46 = vadd.f32 1.0, %v6460_v36  ;;  %v6462_v34 = vpop.eup %6461 }
 0x67d   :  { %v2611_v45 = vadd.f32 1.0, %v6462_v34  ;;  %v6464_v53 = vpop.eup %6463 }
 0x67e   :  { %v2609_v44 = vmul.f32 0.5, %v2607_v46 }
 0x67f   :  { %v2613_v50 = vmul.f32 0.5, %v2611_v45 }
 0x680   :  { %v2621_v15 = vmul.f32 %v6464_v53, %v2609_v44  ;;  %v6466_v4 = vpop.eup %6465 }
 0x681   :  { %v2619_v13 = vmul.f32 %v2613_v50, %v7474_v17  ;;  %v2626_v16 = vmul.f32 %v6466_v4, %v2616_v12  ;;  %v6468_v6 = vpop.eup %6467 }
 0x682   :  { %v2615_v17 = vadd.f32 1.0, %v6468_v6 }
 0x683   :  { %v7542_v33 = vadd.f32 %v2621_v15, %v2619_v13  ;;  %2629 = vst [vmem:[#allocation3 + $0x40] sm:$0xff] %v2626_v16  ;;  %2704 = vmatmul.mubr.f32.vlgmr.msra.gmra.mrb[20].mxu0 %v2626_v16  ;;  %2781 = vmatmul.mubr.f32.vlgmr.msra.gmra.mrb[20].mxu1 %v2626_v16 }
 0x684   :  { %2709 = vmatprep.mubr.f32.mxu0 %v6637_v5  ;;  %2786 = vmatprep.mubr.f32.mxu1 %v6637_v5  ;;  %v2617_v56 = vmul.f32 0.5, %v2615_v17 }
 0x685   :  { %6469 = vtanh.f32 %v7542_v33  ;;  %5959 = vmatpush1.bf16.msra.mxu0 %v7171_v18  ;;  %5991 = vmatpush1.bf16.msra.mxu1 %v7173_v19 }
 0x686   :  { %5961 = vmatprep.subr.bf16.mxu0 %v7178_v41  ;;  %5993 = vmatprep.subr.bf16.mxu1 %v7180_v42 }
 0x689   :  { %5963 = vmatpush1.bf16.msra.mxu0 %v7186_v47  ;;  %5995 = vmatpush1.bf16.msra.mxu1 %v7188_v49 }
 0x68a   :  { %5965 = vmatprep.subr.bf16.mxu0 %v7192_v54  ;;  %5997 = vmatprep.subr.bf16.mxu1 %v7194_v55  ;;  %v3244_v10 = vld [vmem:[#allocation3 + $0x40] sm:$0x1]  ;;  %v3393_v39 = vld [vmem:[#allocation3 + $0x42] sm:$0x1]  ;;  %v3536_v37 = vld [vmem:[#allocation3 + $0x44] sm:$0x1] }
 0x68b   :  { %v3975_v25 = vrot.slane %v3244_v10, 4  ;;  %v3679_v60 = vld [vmem:[#allocation3 + $0x46] sm:$0x1]  ;;  %v4068_v7 = vrot.slane %v3393_v39, 4  ;;  %v4161_v36 = vrot.slane %v3536_v37, 4 }
 0x68c   :  { %v4254_v46 = vrot.slane %v3679_v60, 4  ;;  %v2635_v39 = vld [vmem:[#allocation2 + $0x160] sm:$0x3]  ;;  %v2636_v60 = vld [vmem:[#allocation2 + $0x168] sm:$0x3] }
 0x68d   :  { %5967 = vmatpush1.bf16.msra.mxu0 %v7203_v63  ;;  %5999 = vmatpush1.bf16.msra.mxu1 %v7205_v3  ;;  %v7561_v21 = vsel %vm3307_vm3, %v3975_v25, %v7493_v28  ;;  %v7565_v44 = vsel %vm3307_vm3, %v4068_v7, %v7499_v14  ;;  %v7569_v45 = vsel %vm3307_vm3, %v4161_v36, %v7503_v9 }
 0x68e   :  { %5969 = vmatprep.subr.bf16.mxu0 %v7209_v8  ;;  %6001 = vmatprep.subr.bf16.mxu1 %v7211_v11  ;;  %v7573_v53 = vsel %vm3307_vm3, %v4254_v46, %v7509_v20  ;;  %v2637_v46 = vld [vmem:[#allocation2 + $0x170] sm:$0x3] }
 0x68f   :  { %v6470_v1 = vpop.eup %6469 }
 0x690   :  { %v2627_v34 = vmul.f32 %v6470_v1, %v2617_v56 }
 0x691   :  { %5971 = vmatpush1.bf16.msra.mxu0 %v7217_v23  ;;  %6003 = vmatpush1.bf16.msra.mxu1 %v7219_v24 }
 0x692   :  { %2630 = vst [vmem:[#allocation3 + $0x48] sm:$0x3] %v2627_v34  ;;  %2710 = vmatmul.mubr.f32.gmra.mrb[42].mxu0 %v2627_v34  ;;  %2787 = vmatmul.mubr.f32.gmra.mrb[42].mxu1 %v2627_v34 }
 0x693   :  { %5973 = vmatprep.subr.bf16.mxu0 %v7223_v31  ;;  %6005 = vmatprep.subr.bf16.mxu1 %v7225_v32 }
 0x694   :  { %2906 = vmatprep.mubr.f32.mxu0 %v6637_v5  ;;  %2983 = vmatprep.mubr.f32.mxu1 %v6637_v5 }
 0x695   :  { %5975 = vmatpush1.bf16.msra.mxu0 %v7229_v29  ;;  %6007 = vmatpush1.bf16.msra.mxu1 %v7231_v30 }
 0x696   :  { %5977 = vmatprep.subr.bf16.mxu0 %v7235_v51  ;;  %6009 = vmatprep.subr.bf16.mxu1 %v7237_v52 }
 0x699   :  { %v3847_v28 = vld [vmem:[#allocation3 + $0x49] sm:$0x1]  ;;  %v3822_v14 = vld [vmem:[#allocation3 + $0x48] sm:$0x1]  ;;  %5979 = vmatpush1.bf16.msra.mxu0 %v7241_v26  ;;  %6011 = vmatpush1.bf16.msra.mxu1 %v7243_v35 }
 0x69a   :  { %v3882_v9 = vrot.slane %v3847_v28, 4  ;;  %v4347_v20 = vrot.slane %v3822_v14, 4  ;;  %5981 = vmatprep.subr.bf16.mxu0 %v7247_v38  ;;  %6013 = vmatprep.subr.bf16.mxu1 %v7249_v43 }
 0x69c   :  { %v7591_v50 = vsel %vm3307_vm3, %v3882_v9, %v7521_v0  ;;  %v7595_v15 = vsel %vm3307_vm3, %v4347_v20, %v7525_v2 }
 0x69d   :  { %5983 = vmatpush1.bf16.msra.mxu0 %v7253_v58  ;;  %6015 = vmatpush1.bf16.msra.mxu1 %v7255_v59 }
 0x69e   :  { %5985 = vmatprep.subr.bf16.mxu0 %v7259_v61  ;;  %6017 = vmatprep.subr.bf16.mxu1 %v7261_v62 }
 0x6a1   :  { %5987 = vmatpush1.bf16.msra.mxu0 %v7265_v22  ;;  %6019 = vmatpush1.bf16.msra.mxu1 %v7267_v27 }
 0x6a2   :  { %6021 = vmatprep.subr.bf16.mxu0 %v7165_v40  ;;  %6053 = vmatprep.subr.bf16.mxu1 %v7167_v48 }
 0x756   :  { %v2705_v0 = vpop.f32.mrb[20].mxu0  ;;  %v2782_v12 = vpop.f32.mrb[20].mxu1 }
 0x757   :  { %6471 = vtanh.f32 %v2705_v0  ;;  %v2707_v2 = vpop.f32.mrb[21].mxu0  ;;  %v2784_v4 = vpop.f32.mrb[21].mxu1  ;;  %v2638_v0 = vld [vmem:[#allocation2 + $0x178] sm:$0x3] }
 0x758   :  { %6473 = vtanh.f32 %v2707_v2 }
 0x759   :  { %6475 = vtanh.f32 %v2782_v12 }
 0x75a   :  { %6477 = vtanh.f32 %v2784_v4 }
 0x761   :  { %v6472_v13 = vpop.eup %6471 }
 0x762   :  { %v2809_v16 = vadd.f32 1.0, %v6472_v13  ;;  %v6474_v6 = vpop.eup %6473 }
 0x763   :  { %v2813_v10 = vadd.f32 1.0, %v6474_v6  ;;  %v6476_v37 = vpop.eup %6475 }
 0x764   :  { %v2811_v17 = vmul.f32 0.5, %v2809_v16  ;;  %v6478_v20 = vpop.eup %6477 }
 0x765   :  { %v2711_v56 = vpop.f32.mrb[42].mxu0  ;;  %v2788_v25 = vpop.f32.mrb[42].mxu1  ;;  %v2815_v7 = vmul.f32 0.5, %v2813_v10  ;;  %v2817_v4 = vadd.f32 1.0, %v6478_v20 }
 0x766   :  { %v2797_v40 = vadd.f32 %v2711_v56, %v2635_v39  ;;  %v2713_v48 = vpop.f32.mrb[43].mxu0  ;;  %v2790_v1 = vpop.f32.mrb[43].mxu1  ;;  %v2823_v36 = vmul.f32 %v6476_v37, %v2811_v17  ;;  %v2799_v28 = vadd.f32 %v2788_v25, %v2637_v46 }
 0x767   :  { %v2798_v34 = vadd.f32 %v2713_v48, %v2636_v60  ;;  %v2821_v14 = vmul.f32 %v2815_v7, %v7538_v57  ;;  %v2800_v12 = vadd.f32 %v2790_v1, %v2638_v0  ;;  %v2819_v39 = vmul.f32 0.5, %v2817_v4  ;;  %v2841_v4 = vld [vmem:[#allocation2 + $0x1b8] sm:$0x3] }
 0x768   :  { %6479 = vtanh.f32 %v2797_v40 }
 0x769   :  { %6481 = vtanh.f32 %v2798_v34  ;;  %v7606_v9 = vadd.f32 %v2823_v36, %v2821_v14 }
 0x76a   :  { %6483 = vtanh.f32 %v2799_v28  ;;  %v2840_v28 = vld [vmem:[#allocation2 + $0x1b0] sm:$0x3] }
 0x76b   :  { %6485 = vtanh.f32 %v7606_v9 }
 0x76c   :  { %6487 = vtanh.f32 %v2800_v12 }
 0x772   :  { %v6480_v2 = vpop.eup %6479 }
 0x773   :  { %v2810_v13 = vadd.f32 1.0, %v6480_v2  ;;  %v6482_v16 = vpop.eup %6481 }
 0x774   :  { %v2814_v17 = vadd.f32 1.0, %v6482_v16  ;;  %v6484_v10 = vpop.eup %6483 }
 0x775   :  { %v2812_v6 = vmul.f32 0.5, %v2810_v13  ;;  %v6486_v56 = vpop.eup %6485 }
 0x776   :  { %v2816_v57 = vmul.f32 0.5, %v2814_v17  ;;  %v2829_v37 = vmul.f32 %v6486_v56, %v2819_v39 }
 0x777   :  { %v2824_v25 = vmul.f32 %v6484_v10, %v2812_v6 }
 0x778   :  { %v2822_v40 = vmul.f32 %v2816_v57, %v7542_v33  ;;  %2832 = vst [vmem:[#allocation3 + $0x50] sm:$0xff] %v2829_v37  ;;  %2907 = vmatmul.mubr.f32.vlgmr.msra.gmra.mrb[24].mxu0 %v2829_v37  ;;  %2984 = vmatmul.mubr.f32.vlgmr.msra.gmra.mrb[24].mxu1 %v2829_v37  ;;  %v6488_v33 = vpop.eup %6487 }
 0x779   :  { %2912 = vmatprep.mubr.f32.mxu0 %v6637_v5  ;;  %2989 = vmatprep.mubr.f32.mxu1 %v6637_v5  ;;  %v2818_v48 = vadd.f32 1.0, %v6488_v33 }
 0x77a   :  { %v7610_v60 = vadd.f32 %v2824_v25, %v2822_v40  ;;  %6023 = vmatpush1.bf16.msra.mxu0 %v7171_v18  ;;  %6055 = vmatpush1.bf16.msra.mxu1 %v7173_v19 }
 0x77b   :  { %6025 = vmatprep.subr.bf16.mxu0 %v7178_v41  ;;  %6057 = vmatprep.subr.bf16.mxu1 %v7180_v42  ;;  %v2820_v7 = vmul.f32 0.5, %v2818_v48 }
 0x77c   :  { %6489 = vtanh.f32 %v7610_v60 }
 0x77e   :  { %6027 = vmatpush1.bf16.msra.mxu0 %v7186_v47  ;;  %6059 = vmatpush1.bf16.msra.mxu1 %v7188_v49 }
 0x77f   :  { %6029 = vmatprep.subr.bf16.mxu0 %v7192_v54  ;;  %6061 = vmatprep.subr.bf16.mxu1 %v7194_v55  ;;  %v3245_v18 = vld [vmem:[#allocation3 + $0x50] sm:$0x1]  ;;  %v3394_v1 = vld [vmem:[#allocation3 + $0x52] sm:$0x1]  ;;  %v3537_v41 = vld [vmem:[#allocation3 + $0x54] sm:$0x1] }
 0x780   :  { %v3977_v19 = vrot.slane %v3245_v18, 3  ;;  %v3680_v42 = vld [vmem:[#allocation3 + $0x56] sm:$0x1]  ;;  %v4070_v47 = vrot.slane %v3394_v1, 3  ;;  %v4163_v49 = vrot.slane %v3537_v41, 3 }
 0x781   :  { %v4256_v54 = vrot.slane %v3680_v42, 3 }
 0x782   :  { %6031 = vmatpush1.bf16.msra.mxu0 %v7203_v63  ;;  %6063 = vmatpush1.bf16.msra.mxu1 %v7205_v3  ;;  %v7629_v55 = vsel %vm3310_vm4, %v3977_v19, %v7561_v21  ;;  %v7633_v63 = vsel %vm3310_vm4, %v4070_v47, %v7565_v44  ;;  %v7637_v3 = vsel %vm3310_vm4, %v4163_v49, %v7569_v45  ;;  %v2838_v45 = vld [vmem:[#allocation2 + $0x1a0] sm:$0x3] }
 0x783   :  { %6033 = vmatprep.subr.bf16.mxu0 %v7209_v8  ;;  %6065 = vmatprep.subr.bf16.mxu1 %v7211_v11  ;;  %v7641_v8 = vsel %vm3310_vm4, %v4256_v54, %v7573_v53 }
 0x786   :  { %v6490_v36 = vpop.eup %6489  ;;  %6035 = vmatpush1.bf16.msra.mxu0 %v7217_v23  ;;  %6067 = vmatpush1.bf16.msra.mxu1 %v7219_v24 }
 0x787   :  { %v2830_v11 = vmul.f32 %v6490_v36, %v2820_v7  ;;  %6037 = vmatprep.subr.bf16.mxu0 %v7223_v31  ;;  %6069 = vmatprep.subr.bf16.mxu1 %v7225_v32 }
 0x789   :  { %2833 = vst [vmem:[#allocation3 + $0x58] sm:$0x3] %v2830_v11  ;;  %2913 = vmatmul.mubr.f32.gmra.mrb[44].mxu0 %v2830_v11  ;;  %2990 = vmatmul.mubr.f32.gmra.mrb[44].mxu1 %v2830_v11 }
 0x78a   :  { %3109 = vmatprep.mubr.f32.mxu0 %v6637_v5  ;;  %3186 = vmatprep.mubr.f32.mxu1 %v6637_v5 }
 0x78b   :  { %6039 = vmatpush1.bf16.msra.mxu0 %v7229_v29  ;;  %6071 = vmatpush1.bf16.msra.mxu1 %v7231_v30 }
 0x78c   :  { %6041 = vmatprep.subr.bf16.mxu0 %v7235_v51  ;;  %6073 = vmatprep.subr.bf16.mxu1 %v7237_v52 }
 0x78f   :  { %6043 = vmatpush1.bf16.msra.mxu0 %v7241_v26  ;;  %6075 = vmatpush1.bf16.msra.mxu1 %v7243_v35 }
 0x790   :  { %6045 = vmatprep.subr.bf16.mxu0 %v7247_v38  ;;  %6077 = vmatprep.subr.bf16.mxu1 %v7249_v43  ;;  %v3848_v23 = vld [vmem:[#allocation3 + $0x59] sm:$0x1]  ;;  %v3823_v24 = vld [vmem:[#allocation3 + $0x58] sm:$0x1] }
 0x791   :  { %v3884_v31 = vrot.slane %v3848_v23, 3  ;;  %v4349_v32 = vrot.slane %v3823_v24, 3 }
 0x793   :  { %6047 = vmatpush1.bf16.msra.mxu0 %v7253_v58  ;;  %6079 = vmatpush1.bf16.msra.mxu1 %v7255_v59  ;;  %v7661_v29 = vsel %vm3310_vm4, %v3884_v31, %v7591_v50  ;;  %v7665_v30 = vsel %vm3310_vm4, %v4349_v32, %v7595_v15  ;;  %v2839_v50 = vld [vmem:[#allocation2 + $0x1a8] sm:$0x3] }
 0x794   :  { %6049 = vmatprep.subr.bf16.mxu0 %v7259_v61  ;;  %6081 = vmatprep.subr.bf16.mxu1 %v7261_v62 }
 0x797   :  { %6051 = vmatpush1.bf16.msra.mxu0 %v7265_v22  ;;  %6083 = vmatpush1.bf16.msra.mxu1 %v7267_v27 }
 0x84b   :  { %v2908_v51 = vpop.f32.mrb[24].mxu0  ;;  %v2985_v52 = vpop.f32.mrb[24].mxu1 }
 0x84c   :  { %6491 = vtanh.f32 %v2908_v51  ;;  %v2910_v26 = vpop.f32.mrb[25].mxu0  ;;  %v2987_v35 = vpop.f32.mrb[25].mxu1 }
 0x84d   :  { %6493 = vtanh.f32 %v2910_v26 }
 0x84e   :  { %6495 = vtanh.f32 %v2985_v52 }
 0x84f   :  { %6497 = vtanh.f32 %v2987_v35 }
 0x856   :  { %v6492_v38 = vpop.eup %6491 }
 0x857   :  { %v3012_v43 = vadd.f32 1.0, %v6492_v38  ;;  %v6494_v58 = vpop.eup %6493  ;;  %v3274_v38 = vld [vmem:[#allocation9 + $0x88] sm:$0xff] }
 0x858   :  { %v3016_v21 = vadd.f32 1.0, %v6494_v58  ;;  %v6496_v61 = vpop.eup %6495 }
 0x859   :  { %v3014_v59 = vmul.f32 0.5, %v3012_v43  ;;  %v6498_v12 = vpop.eup %6497  ;;  %v3423_v43 = vld [vmem:[#allocation9 + $0x180] sm:$0xff] }
 0x85a   :  { %v3018_v44 = vmul.f32 0.5, %v3016_v21  ;;  %v3020_v2 = vadd.f32 1.0, %v6498_v12  ;;  %v6639_v21 = vmov 0.0|0.0  }
 0x85b   :  { %v3026_v62 = vmul.f32 %v6496_v61, %v3014_v59  ;;  %v3424_v59 = vld [vmem:[#allocation9 + $0x188] sm:$0xff]  ;;  %6084 = vmatprep.subr.bf16.mxu0 %v6639_v21  ;;  %6108 = vmatprep.subr.bf16.mxu1 %v6639_v21 }
 0x85c   :  { %v2914_v22 = vpop.f32.mrb[44].mxu0  ;;  %v2991_v53 = vpop.f32.mrb[44].mxu1  ;;  %v3024_v34 = vmul.f32 %v3018_v44, %v7606_v9  ;;  %v3022_v10 = vmul.f32 0.5, %v3020_v2  ;;  %v6109_v61 = vpack.c.bf16 %v3424_v59, %v3423_v43  ;;  %v3276_v44 = vld [vmem:[#allocation9 + $0x98] sm:$0xff] }
 0x85d   :  { %v3000_v27 = vadd.f32 %v2914_v22, %v2838_v45  ;;  %v2916_v15 = vpop.f32.mrb[45].mxu0  ;;  %v2993_v46 = vpop.f32.mrb[45].mxu1  ;;  %v3002_v20 = vadd.f32 %v2991_v53, %v2840_v28  ;;  %v3426_v45 = vld [vmem:[#allocation9 + $0x198] sm:$0xff]  ;;  %v3277_v53 = vld [vmem:[#allocation9 + $0xa0] sm:$0xff]  ;;  %v3279_v28 = vld [vmem:[#allocation9 + $0xb0] sm:$0xff] }
 0x85e   :  { %v3001_v14 = vadd.f32 %v2916_v15, %v2839_v50  ;;  %v7672_v0 = vadd.f32 %v3026_v62, %v3024_v34  ;;  %v3003_v13 = vadd.f32 %v2993_v46, %v2841_v4  ;;  %v3425_v62 = vld [vmem:[#allocation9 + $0x190] sm:$0xff]  ;;  %v3427_v50 = vld [vmem:[#allocation9 + $0x1a0] sm:$0xff]  ;;  %v3428_v46 = vld [vmem:[#allocation9 + $0x1a8] sm:$0xff] }
 0x85f   :  { %6499 = vtanh.f32 %v3000_v27  ;;  %v6112_v22 = vpack.c.bf16 %v3426_v45, %v3425_v62  ;;  %v3278_v27 = vld [vmem:[#allocation9 + $0xa8] sm:$0xff]  ;;  %v6115_v34 = vpack.c.bf16 %v3428_v46, %v3427_v50  ;;  %v3430_v2 = vld [vmem:[#allocation9 + $0x1b8] sm:$0xff] }
 0x860   :  { %6501 = vtanh.f32 %v3001_v14  ;;  %v6091_v15 = vpack.c.bf16 %v3278_v27, %v3277_v53  ;;  %v3280_v14 = vld [vmem:[#allocation9 + $0xb8] sm:$0xff] }
 0x861   :  { %6503 = vtanh.f32 %v7672_v0  ;;  %v6094_v12 = vpack.c.bf16 %v3280_v14, %v3279_v28  ;;  %v3044_v14 = vld [vmem:[#allocation2 + $0x1f8] sm:$0x3] }
 0x862   :  { %6505 = vtanh.f32 %v3002_v20  ;;  %v3429_v20 = vld [vmem:[#allocation9 + $0x1b0] sm:$0xff] }
 0x863   :  { %6507 = vtanh.f32 %v3003_v13  ;;  %v6118_v4 = vpack.c.bf16 %v3430_v2, %v3429_v20  ;;  %v3281_v13 = vld [vmem:[#allocation9 + $0xc0] sm:$0xff]  ;;  %v3265_v20 = vld [vmem:[#allocation3 + $0x11] sm:$0x1] }
 0x869   :  { %v6500_v16 = vpop.eup %6499 }
 0x86a   :  { %v3013_v6 = vadd.f32 1.0, %v6500_v16  ;;  %v6502_v17 = vpop.eup %6501  ;;  %v3282_v16 = vld [vmem:[#allocation9 + $0xc8] sm:$0xff] }
 0x86b   :  { %v6504_v39 = vpop.eup %6503  ;;  %v3017_v56 = vadd.f32 1.0, %v6502_v17  ;;  %v6097_v17 = vpack.c.bf16 %v3282_v16, %v3281_v13  ;;  %v3266_v13 = vld [vmem:[#allocation3 + $0x21] sm:$0x1]  ;;  %v3415_v16 = vld [vmem:[#allocation3 + $0x13] sm:$0x1] }
 0x86c   :  { %v3015_v9 = vmul.f32 0.5, %v3013_v6  ;;  %v6506_v57 = vpop.eup %6505  ;;  %v3032_v25 = vmul.f32 %v6504_v39, %v3022_v10  ;;  %v3431_v6 = vld [vmem:[#allocation9 + $0x1c0] sm:$0xff]  ;;  %v3432_v10 = vld [vmem:[#allocation9 + $0x1c8] sm:$0xff] }
 0x86d   :  { %v3019_v37 = vmul.f32 0.5, %v3017_v56  ;;  %v6508_v18 = vpop.eup %6507  ;;  %v6121_v39 = vpack.c.bf16 %v3432_v10, %v3431_v6  ;;  %v3284_v56 = vld [vmem:[#allocation9 + $0xd8] sm:$0xff]  ;;  %v3416_v10 = vld [vmem:[#allocation3 + $0x23] sm:$0x1] }
 0x86e   :  { %v3027_v40 = vmul.f32 %v6506_v57, %v3015_v9  ;;  %3035 = vst [vmem:[#allocation3 + $0x60] sm:$0xff] %v3032_v25  ;;  %3110 = vmatmul.mubr.f32.vlgmr.msra.gmra.mrb[28].mxu0 %v3032_v25  ;;  %3187 = vmatmul.mubr.f32.vlgmr.msra.gmra.mrb[28].mxu1 %v3032_v25  ;;  %v3021_v41 = vadd.f32 1.0, %v6508_v18  ;;  %v3283_v9 = vld [vmem:[#allocation9 + $0xd0] sm:$0xff]  ;;  %v3286_v18 = vld [vmem:[#allocation9 + $0xe8] sm:$0xff] }
 0x86f   :  { %v3025_v33 = vmul.f32 %v3019_v37, %v7610_v60  ;;  %3115 = vmatprep.mubr.f32.mxu0 %v6637_v5  ;;  %3192 = vmatprep.mubr.f32.mxu1 %v6637_v5  ;;  %v3433_v57 = vld [vmem:[#allocation9 + $0x1d0] sm:$0xff]  ;;  %v6100_v25 = vpack.c.bf16 %v3284_v56, %v3283_v9  ;;  %v3434_v37 = vld [vmem:[#allocation9 + $0x1d8] sm:$0xff]  ;;  %v3268_v56 = vld [vmem:[#allocation3 + $0x41] sm:$0x1] }
 0x870   :  { %v3023_v31 = vmul.f32 0.5, %v3021_v41  ;;  %6110 = vmatpush3.bf16.msra.mxu1 %v6109_v61  ;;  %v3436_v41 = vld [vmem:[#allocation9 + $0x1e8] sm:$0xff]  ;;  %v3267_v9 = vld [vmem:[#allocation3 + $0x31] sm:$0x1] }
 0x871   :  { %v7678_v48 = vadd.f32 %v3027_v40, %v3025_v33  ;;  %6111 = vmatprep.subr.bf16.mxu1 %v6639_v21  ;;  %v6124_v40 = vpack.c.bf16 %v3434_v37, %v3433_v57  ;;  %v3285_v33 = vld [vmem:[#allocation9 + $0xe0] sm:$0xff]  ;;  %v3417_v57 = vld [vmem:[#allocation3 + $0x33] sm:$0x1] }
 0x873   :  { %6509 = vtanh.f32 %v7678_v48 }
 0x874   :  { %6113 = vmatpush3.bf16.msra.mxu1 %v6112_v22  ;;  %v3042_v22 = vld [vmem:[#allocation2 + $0x1e8] sm:$0x3] }
 0x875   :  { %v3246_v1 = vld [vmem:[#allocation3 + $0x60] sm:$0x1]  ;;  %v3395_v19 = vld [vmem:[#allocation3 + $0x62] sm:$0x1]  ;;  %v3538_v47 = vld [vmem:[#allocation3 + $0x64] sm:$0x1]  ;;  %6114 = vmatprep.subr.bf16.mxu1 %v6639_v21 }
 0x876   :  { %v3979_v42 = vrot.slane %v3246_v1, 2  ;;  %v3681_v49 = vld [vmem:[#allocation3 + $0x66] sm:$0x1]  ;;  %v4072_v54 = vrot.slane %v3395_v19, 2  ;;  %v4165_v7 = vrot.slane %v3538_v47, 2  ;;  %v6103_v19 = vpack.c.bf16 %v3286_v18, %v3285_v33  ;;  %v3287_v47 = vld [vmem:[#allocation9 + $0xf0] sm:$0xff] }
 0x877   :  { %v4258_v36 = vrot.slane %v3681_v49, 2  ;;  %v3435_v1 = vld [vmem:[#allocation9 + $0x1e0] sm:$0xff]  ;;  %v3288_v49 = vld [vmem:[#allocation9 + $0xf8] sm:$0xff]  ;;  %v3300_v33 = vrot.slane %v3266_v13, 6  ;;  %v3568_v13 = vld [vmem:[#allocation9 + $0x290] sm:$0xff] }
 0x878   :  { %v7683_v60 = vsel %vm3313_vm5, %v3979_v42, %v7629_v55  ;;  %v7687_v11 = vsel %vm3313_vm5, %v4072_v54, %v7633_v63  ;;  %v7691_v23 = vsel %vm3313_vm5, %v4165_v7, %v7637_v3  ;;  %6116 = vmatpush3.bf16.msra.mxu1 %v6115_v34  ;;  %v6127_v42 = vpack.c.bf16 %v3436_v41, %v3435_v1  ;;  %v3437_v54 = vld [vmem:[#allocation9 + $0x1f0] sm:$0xff]  ;;  %v3418_v18 = vld [vmem:[#allocation3 + $0x43] sm:$0x1] }
 0x879   :  { %v7695_v24 = vsel %vm3313_vm5, %v4258_v36, %v7641_v8  ;;  %v3273_v8 = vld [vmem:[#allocation9 + $0x80] sm:$0xff]  ;;  %6117 = vmatprep.subr.bf16.mxu1 %v6639_v21  ;;  %v6106_v7 = vpack.c.bf16 %v3288_v49, %v3287_v47  ;;  %v3438_v36 = vld [vmem:[#allocation9 + $0x1f8] sm:$0xff]  ;;  %v3447_v1 = vrot.slane %v3415_v16, 7  ;;  %v3269_v47 = vld [vmem:[#allocation3 + $0x51] sm:$0x1] }
 0x87a   :  { %v6085_v58 = vpack.c.bf16 %v3274_v38, %v3273_v8  ;;  %v3419_v49 = vld [vmem:[#allocation3 + $0x53] sm:$0x1]  ;;  %v3569_v16 = vld [vmem:[#allocation9 + $0x298] sm:$0xff] }
 0x87c   :  { %6086 = vmatpush3.bf16.msra.mxu0 %v6085_v58  ;;  %6119 = vmatpush3.bf16.msra.mxu1 %v6118_v4 }
 0x87d   :  { %v6510_v32 = vpop.eup %6509  ;;  %6087 = vmatprep.subr.bf16.mxu0 %v6639_v21  ;;  %6120 = vmatprep.subr.bf16.mxu1 %v6639_v21 }
 0x87e   :  { %v3033_v51 = vmul.f32 %v6510_v32, %v3023_v31  ;;  %v6130_v31 = vpack.c.bf16 %v3438_v36, %v3437_v54  ;;  %v3449_v54 = vrot.slane %v3416_v10, 6  ;;  %v3303_v36 = vrot.slane %v3267_v9, 5 }
 0x880   :  { %3036 = vst [vmem:[#allocation3 + $0x68] sm:$0x3] %v3033_v51  ;;  %3116 = vmatmul.mubr.f32.gmra.mrb[46].mxu0 %v3033_v51  ;;  %3193 = vmatmul.mubr.f32.gmra.mrb[46].mxu1 %v3033_v51 }
 0x881   :  { %6122 = vmatpush3.bf16.msra.mxu1 %v6121_v39  ;;  %4742 = vmatprep.mubr.msk.f32.mxu0 %vm6640_vm6, %v6637_v5 }
 0x882   :  { %6123 = vmatprep.subr.bf16.mxu1 %v6639_v21  ;;  %4777 = vmatprep.mubr.msk.f32.mxu1 %vm6640_vm6, %v6637_v5 }
 0x885   :  { %6125 = vmatpush3.bf16.msra.mxu1 %v6124_v40  ;;  %v3297_v40 = vrot.slane %v3265_v20, 7 }
 0x886   :  { %6126 = vmatprep.subr.bf16.mxu1 %v6639_v21 }
 0x887   :  { %v3849_v55 = vld [vmem:[#allocation3 + $0x69] sm:$0x1]  ;;  %v3824_v52 = vld [vmem:[#allocation3 + $0x68] sm:$0x1] }
 0x888   :  { %v3886_v26 = vrot.slane %v3849_v55, 2  ;;  %v4351_v35 = vrot.slane %v3824_v52, 2 }
 0x889   :  { %6128 = vmatpush3.bf16.msra.mxu1 %v6127_v42  ;;  %v3264_v42 = vld [vmem:[#allocation3 + $0x1] sm:$0x1] }
 0x88a   :  { %v7699_v63 = vsel %vm3313_vm5, %v3886_v26, %v7661_v29  ;;  %v7703_v3 = vsel %vm3313_vm5, %v4351_v35, %v7665_v30  ;;  %v3275_v29 = vld [vmem:[#allocation9 + $0x90] sm:$0xff]  ;;  %6129 = vmatprep.subr.bf16.mxu1 %v6639_v21 }
 0x88b   :  { %v6088_v30 = vpack.c.bf16 %v3276_v44, %v3275_v29  ;;  %v3041_v44 = vld [vmem:[#allocation2 + $0x1e0] sm:$0x3] }
 0x88d   :  { %6089 = vmatpush3.bf16.msra.mxu0 %v6088_v30  ;;  %6131 = vmatpush3.bf16.msra.mxu1 %v6130_v31  ;;  %v3306_v31 = vrot.slane %v3268_v56, 4 }
 0x88e   :  { %6090 = vmatprep.subr.bf16.mxu0 %v6639_v21  ;;  %6156 = vmatprep.subr.bf16.mxu1 %v6639_v21 }
 0x891   :  { %6092 = vmatpush3.bf16.msra.mxu0 %v6091_v15  ;;  %v3043_v15 = vld [vmem:[#allocation2 + $0x1f0] sm:$0x3] }
 0x892   :  { %6093 = vmatprep.subr.bf16.mxu0 %v6639_v21 }
 0x895   :  { %6095 = vmatpush3.bf16.msra.mxu0 %v6094_v12 }
 0x896   :  { %6096 = vmatprep.subr.bf16.mxu0 %v6639_v21 }
 0x899   :  { %6098 = vmatpush3.bf16.msra.mxu0 %v6097_v17 }
 0x89a   :  { %6099 = vmatprep.subr.bf16.mxu0 %v6639_v21 }
 0x89d   :  { %6101 = vmatpush3.bf16.msra.mxu0 %v6100_v25 }
 0x89e   :  { %6102 = vmatprep.subr.bf16.mxu0 %v6639_v21 }
 0x8a1   :  { %6104 = vmatpush3.bf16.msra.mxu0 %v6103_v19 }
 0x8a2   :  { %6105 = vmatprep.subr.bf16.mxu0 %v6639_v21 }
 0x8a5   :  { %6107 = vmatpush3.bf16.msra.mxu0 %v6106_v7 }
 0x8a6   :  { %6132 = vmatprep.subr.bf16.mxu0 %v6639_v21 }
 0x941   :  { %v3111_v32 = vpop.f32.mrb[28].mxu0  ;;  %v3188_v51 = vpop.f32.mrb[28].mxu1 }
 0x942   :  { %6511 = vtanh.f32 %v3111_v32  ;;  %v3113_v55 = vpop.f32.mrb[29].mxu0  ;;  %v3190_v52 = vpop.f32.mrb[29].mxu1  ;;  %v3414_v32 = vld [vmem:[#allocation3 + $0x3] sm:$0x1] }
 0x943   :  { %6513 = vtanh.f32 %v3113_v55 }
 0x944   :  { %6515 = vtanh.f32 %v3188_v51  ;;  %v3451_v51 = vrot.slane %v3417_v57, 5 }
 0x945   :  { %6517 = vtanh.f32 %v3190_v52  ;;  %v3270_v52 = vld [vmem:[#allocation3 + $0x61] sm:$0x1] }
 0x94c   :  { %v6512_v26 = vpop.eup %6511 }
 0x94d   :  { %v3215_v35 = vadd.f32 1.0, %v6512_v26  ;;  %v6514_v8 = vpop.eup %6513  ;;  %v3420_v26 = vld [vmem:[#allocation3 + $0x63] sm:$0x1] }
 0x94e   :  { %v3219_v43 = vadd.f32 1.0, %v6514_v8  ;;  %v6516_v58 = vpop.eup %6515  ;;  %v3299_v8 = vsel %vm3298_vm0, %v3297_v40, %v3264_v42 }
 0x94f   :  { %v3217_v38 = vmul.f32 0.5, %v3215_v35  ;;  %v6518_v28 = vpop.eup %6517  ;;  %v3453_v35 = vrot.slane %v3418_v18, 4 }
 0x950   :  { %v3221_v59 = vmul.f32 0.5, %v3219_v43  ;;  %v3448_v43 = vsel %vm3298_vm0, %v3447_v1, %v3414_v32  ;;  %v3714_v32 = vld [vmem:[#allocation9 + $0x3a8] sm:$0xff] }
 0x951   :  { %v3229_v61 = vmul.f32 %v6516_v58, %v3217_v38  ;;  %v3309_v38 = vrot.slane %v3269_v47, 3  ;;  %v3455_v58 = vrot.slane %v3419_v49, 3  ;;  %v3570_v47 = vld [vmem:[#allocation9 + $0x2a0] sm:$0xff] }
 0x952   :  { %v3227_v29 = vmul.f32 %v3221_v59, %v7672_v0  ;;  %v3223_v0 = vadd.f32 1.0, %v6518_v28 }
 0x953   :  { %v3117_v62 = vpop.f32.mrb[46].mxu0  ;;  %v3194_v30 = vpop.f32.mrb[46].mxu1 }
 0x954   :  { %v3203_v45 = vadd.f32 %v3117_v62, %v3041_v44  ;;  %v3119_v53 = vpop.f32.mrb[47].mxu0  ;;  %v3196_v27 = vpop.f32.mrb[47].mxu1  ;;  %v3231_v50 = vadd.f32 %v3229_v61, %v3227_v29  ;;  %v3205_v34 = vadd.f32 %v3194_v30, %v3043_v15  ;;  %v3225_v2 = vmul.f32 0.5, %v3223_v0  ;;  %v3566_v44 = vld [vmem:[#allocation9 + $0x280] sm:$0xff]  ;;  %v3567_v62 = vld [vmem:[#allocation9 + $0x288] sm:$0xff] }
 0x955   :  { %v3204_v46 = vadd.f32 %v3119_v53, %v3042_v22  ;;  %v3206_v4 = vadd.f32 %v3196_v27, %v3044_v14  ;;  %v3302_v61 = vsel %vm3301_vm1, %v3300_v33, %v3299_v8  ;;  %v3450_v29 = vsel %vm3301_vm1, %v3449_v54, %v3448_v43  ;;  %v3709_v27 = vld [vmem:[#allocation9 + $0x380] sm:$0xff]  ;;  %v3715_v8 = vld [vmem:[#allocation9 + $0x3b0] sm:$0xff] }
 0x956   :  { %6519 = vtanh.f32 %v3203_v45  ;;  %4451 = vst [vmem:[%s7899_s7] sm:$0xff] %v3231_v50  ;;  %v3305_v30 = vsel %vm3304_vm2, %v3303_v36, %v3302_v61  ;;  %v3312_v45 = vrot.slane %v3270_v52, 2  ;;  %v3452_v22 = vsel %vm3304_vm2, %v3451_v51, %v3450_v29  ;;  %v3571_v36 = vld [vmem:[#allocation9 + $0x2a8] sm:$0xff]  ;;  %v3574_v61 = vld [vmem:[#allocation9 + $0x2c0] sm:$0xff] }
 0x957   :  { %6521 = vtanh.f32 %v3231_v50  ;;  %v3457_v53 = vrot.slane %v3420_v26, 2  ;;  %v3710_v50 = vld [vmem:[#allocation9 + $0x388] sm:$0xff]  ;;  %v6133_v20 = vpack.c.bf16 %v3567_v62, %v3566_v44  ;;  %v6139_v52 = vpack.c.bf16 %v3571_v36, %v3570_v47  ;;  %v3717_v44 = vld [vmem:[#allocation9 + $0x3c0] sm:$0xff]  ;;  %v3705_v47 = vld [vmem:[#allocation3 + $0x57] sm:$0x1] }
 0x958   :  { %6523 = vtanh.f32 %v3204_v46  ;;  %v3308_v46 = vsel %vm3307_vm3, %v3306_v31, %v3305_v30  ;;  %v3713_v31 = vld [vmem:[#allocation9 + $0x3a0] sm:$0xff]  ;;  %v3575_v29 = vld [vmem:[#allocation9 + $0x2c8] sm:$0xff] }
 0x959   :  { %6525 = vtanh.f32 %v3205_v34  ;;  %v3454_v34 = vsel %vm3307_vm3, %v3453_v35, %v3452_v22  ;;  %v3311_v28 = vsel %vm3310_vm4, %v3309_v38, %v3308_v46  ;;  %v6163_v26 = vpack.c.bf16 %v3714_v32, %v3713_v31  ;;  %v3716_v38 = vld [vmem:[#allocation9 + $0x3b8] sm:$0xff]  ;;  %v3718_v62 = vld [vmem:[#allocation9 + $0x3c8] sm:$0xff]  ;;  %v3576_v22 = vld [vmem:[#allocation9 + $0x2d0] sm:$0xff] }
 0x95a   :  { %6527 = vtanh.f32 %v3206_v4  ;;  %v3456_v14 = vsel %vm3310_vm4, %v3455_v58, %v3454_v34  ;;  %v6157_v4 = vpack.c.bf16 %v3710_v50, %v3709_v27  ;;  %v6145_v30 = vpack.c.bf16 %v3575_v29, %v3574_v61  ;;  %v3719_v27 = vld [vmem:[#allocation9 + $0x3d0] sm:$0xff]  ;;  %v3720_v50 = vld [vmem:[#allocation9 + $0x3d8] sm:$0xff]  ;;  %v3559_v46 = vld [vmem:[#allocation3 + $0x25] sm:$0x1] }
 0x95b   :  { %v3458_v10 = vsel %vm3313_vm5, %v3457_v53, %v3456_v14  ;;  %v3577_v53 = vld [vmem:[#allocation9 + $0x2d8] sm:$0xff]  ;;  %v3701_v34 = vld [vmem:[#allocation3 + $0x17] sm:$0x1]  ;;  %v3563_v31 = vld [vmem:[#allocation3 + $0x65] sm:$0x1]  ;;  %v3741_v61 = vrot.slane %v3705_v47, 3 }
 0x95c   :  { %v3852_v29 = vld [vmem:[#allocation9 + $0x480] sm:$0xff]  ;;  %v3255_v47 = vld [vmem:[#allocation9 + $0x38] sm:$0xff] }
 0x960   :  { %v6520_v12 = vpop.eup %6519 }
 0x961   :  { %v6522_v6 = vpop.eup %6521  ;;  %v3216_v17 = vadd.f32 1.0, %v6520_v12 }
 0x962   :  { %v3235_v39 = vmul.f32 %v6522_v6, %v3225_v2  ;;  %v6524_v25 = vpop.eup %6523  ;;  %v3711_v6 = vld [vmem:[#allocation9 + $0x390] sm:$0xff] }
 0x963   :  { %v3218_v37 = vmul.f32 0.5, %v3216_v17  ;;  %v6526_v19 = vpop.eup %6525  ;;  %v3220_v41 = vadd.f32 1.0, %v6524_v25  ;;  %v3314_v17 = vsel %vm3313_vm5, %v3312_v45, %v3311_v28  ;;  %v6169_v45 = vpack.c.bf16 %v3718_v62, %v3717_v44 }
 0x964   :  { %3238 = vst [vmem:[#allocation3 + $0x70] sm:$0xff] %v3235_v39  ;;  %4449 = vst [vmem:[%s7898_s6] sm:$0xff] %v3235_v39  ;;  %v3712_v39 = vld [vmem:[#allocation9 + $0x398] sm:$0xff]  ;;  %v6528_v57 = vpop.eup %6527  ;;  %v6172_v28 = vpack.c.bf16 %v3720_v50, %v3719_v27  ;;  %v3600_v62 = vrot.slane %v3563_v31, 2  ;;  %v3249_v27 = vld [vmem:[#allocation9 + $0x8] sm:$0xff] }
 0x965   :  { %v3230_v7 = vmul.f32 %v6526_v19, %v3218_v37  ;;  %v3222_v55 = vmul.f32 0.5, %v3220_v41  ;;  %v6136_v41 = vpack.c.bf16 %v3569_v16, %v3568_v13  ;;  %v6160_v42 = vpack.c.bf16 %v3712_v39, %v3711_v6  ;;  %v3560_v6 = vld [vmem:[#allocation3 + $0x35] sm:$0x1]  ;;  %v3257_v31 = vld [vmem:[#allocation9 + $0x48] sm:$0xff] }
 0x966   :  { %v3733_v39 = vrot.slane %v3701_v34, 7  ;;  %v3594_v36 = vrot.slane %v3560_v6, 5  ;;  %v3251_v6 = vld [vmem:[#allocation9 + $0x18] sm:$0xff] }
 0x967   :  { %v3228_v59 = vmul.f32 %v3222_v55, %v7678_v48 }
 0x969   :  { %v3232_v15 = vadd.f32 %v3230_v7, %v3228_v59  ;;  %v3224_v7 = vadd.f32 1.0, %v6528_v57  ;;  %v3704_v57 = vld [vmem:[#allocation3 + $0x47] sm:$0x1] }
 0x96b   :  { %v3271_v48 = vld [vmem:[#allocation3 + $0x71] sm:$0x1]  ;;  %v3421_v0 = vld [vmem:[#allocation3 + $0x73] sm:$0x1]  ;;  %6529 = vtanh.f32 %v3232_v15  ;;  %4452 = vst [vmem:[%s7899_s7 + $0x8] sm:$0x3] %v3232_v15 }
 0x96c   :  { %v3315_v12 = vrot.slane %v3271_v48, 1  ;;  %v3459_v2 = vrot.slane %v3421_v0, 1  ;;  %v3247_v9 = vld [vmem:[#allocation3 + $0x70] sm:$0x1]  ;;  %v3396_v56 = vld [vmem:[#allocation3 + $0x72] sm:$0x1]  ;;  %v6148_v48 = vpack.c.bf16 %v3577_v53, %v3576_v22 }
 0x96d   :  { %v3981_v40 = vrot.slane %v3247_v9, 1  ;;  %v3539_v33 = vld [vmem:[#allocation3 + $0x74] sm:$0x1]  ;;  %v3682_v18 = vld [vmem:[#allocation3 + $0x76] sm:$0x1]  ;;  %v4074_v1 = vrot.slane %v3396_v56, 1 }
 0x96e   :  { %v3317_v25 = vsel %vm3316_vm7, %v3315_v12, %v3314_v17  ;;  %v3460_v37 = vsel %vm3316_vm7, %v3459_v2, %v3458_v10  ;;  %v4167_v19 = vrot.slane %v3539_v33, 1  ;;  %v4260_v54 = vrot.slane %v3682_v18, 1  ;;  %v3558_v15 = vld [vmem:[#allocation3 + $0x15] sm:$0x1]  ;;  %v3578_v0 = vld [vmem:[#allocation9 + $0x2e0] sm:$0xff]  ;;  %v3579_v12 = vld [vmem:[#allocation9 + $0x2e8] sm:$0xff] }
 0x96f   :  { %4743 = vmatmul.mubr.f32.vlgmr.msra.gmra.mrb[48].mxu0 %v3317_v25  ;;  %4778 = vmatmul.mubr.f32.vlgmr.msra.gmra.mrb[48].mxu1 %v3460_v37  ;;  %v7754_v49 = vsel %vm3316_vm7, %v3981_v40, %v7683_v60  ;;  %v7760_v51 = vsel %vm3316_vm7, %v4074_v1, %v7687_v11  ;;  %v3572_v11 = vld [vmem:[#allocation9 + $0x2b0] sm:$0xff]  ;;  %v3226_v35 = vmul.f32 0.5, %v3224_v7  ;;  %v3721_v2 = vld [vmem:[#allocation9 + $0x3e0] sm:$0xff]  ;;  %v3590_v17 = vrot.slane %v3558_v15, 7  ;;  %v3724_v7 = vld [vmem:[#allocation9 + $0x3f8] sm:$0xff] }
 0x970   :  { %6134 = vmatpush3.bf16.msra.mxu0 %v6133_v20  ;;  %6158 = vmatpush3.bf16.msra.mxu1 %v6157_v4  ;;  %v7764_v55 = vsel %vm3316_vm7, %v4167_v19, %v7691_v23  ;;  %v7772_v60 = vsel %vm3316_vm7, %v4260_v54, %v7695_v24  ;;  %v3573_v23 = vld [vmem:[#allocation9 + $0x2b8] sm:$0xff]  ;;  %v6166_v24 = vpack.c.bf16 %v3716_v38, %v3715_v8  ;;  %v3722_v4 = vld [vmem:[#allocation9 + $0x3e8] sm:$0xff]  ;;  %v3702_v10 = vld [vmem:[#allocation3 + $0x27] sm:$0x1] }
 0x971   :  { %6135 = vmatprep.subr.bf16.mxu0 %v6639_v21  ;;  %6159 = vmatprep.subr.bf16.mxu1 %v6639_v21  ;;  %v6142_v59 = vpack.c.bf16 %v3573_v23, %v3572_v11  ;;  %v3561_v9 = vld [vmem:[#allocation3 + $0x45] sm:$0x1]  ;;  %v3703_v56 = vld [vmem:[#allocation3 + $0x37] sm:$0x1]  ;;  %v6151_v40 = vpack.c.bf16 %v3579_v12, %v3578_v0  ;;  %v6175_v33 = vpack.c.bf16 %v3722_v4, %v3721_v2  ;;  %v3562_v19 = vld [vmem:[#allocation3 + $0x55] sm:$0x1] }
 0x972   :  { %4812 = vmatprep.mubr.msk.f32.mxu0 %vm6640_vm6, %v6637_v5  ;;  %4847 = vmatprep.mubr.msk.f32.mxu1 %vm6640_vm6, %v6637_v5  ;;  %v3580_v18 = vld [vmem:[#allocation9 + $0x2f0] sm:$0xff]  ;;  %v3557_v1 = vld [vmem:[#allocation3 + $0x5] sm:$0x1]  ;;  %v3596_v32 = vrot.slane %v3561_v9, 4  ;;  %v3598_v23 = vrot.slane %v3562_v19, 3  ;;  %v3853_v22 = vld [vmem:[#allocation9 + $0x488] sm:$0xff] }
 0x973   :  { %v3723_v54 = vld [vmem:[#allocation9 + $0x3f0] sm:$0xff]  ;;  %v3248_v53 = vld [vmem:[#allocation9] sm:$0xff] }
 0x974   :  { %6137 = vmatpush3.bf16.msra.mxu0 %v6136_v41  ;;  %6161 = vmatpush3.bf16.msra.mxu1 %v6160_v42  ;;  %v3592_v41 = vrot.slane %v3559_v46, 6  ;;  %v3700_v42 = vld [vmem:[#allocation3 + $0x7] sm:$0x1]  ;;  %v3564_v11 = vld [vmem:[#allocation3 + $0x75] sm:$0x1] }
 0x975   :  { %6138 = vmatprep.subr.bf16.mxu0 %v6639_v21  ;;  %6162 = vmatprep.subr.bf16.mxu1 %v6639_v21  ;;  %v6530_v43 = vpop.eup %6529  ;;  %v3707_v8 = vld [vmem:[#allocation3 + $0x77] sm:$0x1]  ;;  %v3734_v38 = vsel %vm3298_vm0, %v3733_v39, %v3700_v42  ;;  %v3602_v15 = vrot.slane %v3564_v11, 1  ;;  %v3863_v11 = vld [vmem:[#allocation9 + $0x4d8] sm:$0xff] }
 0x976   :  { %v3236_v58 = vmul.f32 %v6530_v43, %v3226_v35  ;;  %v3591_v35 = vsel %vm3298_vm0, %v3590_v17, %v3557_v1  ;;  %v3739_v43 = vrot.slane %v3704_v57, 4  ;;  %v3745_v34 = vrot.slane %v3707_v8, 1  ;;  %v3854_v12 = vld [vmem:[#allocation9 + $0x490] sm:$0xff]  ;;  %v3857_v57 = vld [vmem:[#allocation9 + $0x4a8] sm:$0xff] }
 0x977   :  { %v3858_v19 = vld [vmem:[#allocation9 + $0x4b0] sm:$0xff] }
 0x978   :  { %6140 = vmatpush3.bf16.msra.mxu0 %v6139_v52  ;;  %6164 = vmatpush3.bf16.msra.mxu1 %v6163_v26  ;;  %3239 = vst [vmem:[#allocation3 + $0x78] sm:$0x3] %v3236_v58  ;;  %4450 = vst [vmem:[%s7898_s6 + $0x8] sm:$0x3] %v3236_v58  ;;  %v3706_v52 = vld [vmem:[#allocation3 + $0x67] sm:$0x1] }
 0x979   :  { %6141 = vmatprep.subr.bf16.mxu0 %v6639_v21  ;;  %6165 = vmatprep.subr.bf16.mxu1 %v6639_v21  ;;  %v3737_v26 = vrot.slane %v3703_v56, 5  ;;  %v3856_v56 = vld [vmem:[#allocation9 + $0x4a0] sm:$0xff]  ;;  %v3254_v42 = vld [vmem:[#allocation9 + $0x30] sm:$0xff] }
 0x97c   :  { %6143 = vmatpush3.bf16.msra.mxu0 %v6142_v59  ;;  %6167 = vmatpush3.bf16.msra.mxu1 %v6166_v24  ;;  %v6178_v59 = vpack.c.bf16 %v3724_v7, %v3723_v54  ;;  %v3593_v24 = vsel %vm3301_vm1, %v3592_v41, %v3591_v35  ;;  %v3859_v41 = vld [vmem:[#allocation9 + $0x4b8] sm:$0xff]  ;;  %v6214_v54 = vpack.c.bf16 %v3255_v47, %v3254_v42  ;;  %v3860_v7 = vld [vmem:[#allocation9 + $0x4c0] sm:$0xff]  ;;  %v3258_v35 = vld [vmem:[#allocation9 + $0x50] sm:$0xff] }
 0x97d   :  { %6144 = vmatprep.subr.bf16.mxu0 %v6639_v21  ;;  %6168 = vmatprep.subr.bf16.mxu1 %v6639_v21  ;;  %v3595_v44 = vsel %vm3304_vm2, %v3594_v36, %v3593_v24  ;;  %v3861_v36 = vld [vmem:[#allocation9 + $0x4c8] sm:$0xff]  ;;  %v3408_v42 = vld [vmem:[#allocation9 + $0x150] sm:$0xff]  ;;  %v3409_v47 = vld [vmem:[#allocation9 + $0x158] sm:$0xff] }
 0x97e   :  { %v3597_v50 = vsel %vm3307_vm3, %v3596_v32, %v3595_v44  ;;  %v6193_v32 = vpack.c.bf16 %v3861_v36, %v3860_v7  ;;  %v3261_v24 = vld [vmem:[#allocation9 + $0x68] sm:$0xff]  ;;  %v3866_v44 = vld [vmem:[#allocation9 + $0x4f0] sm:$0xff]  ;;  %v6244_v7 = vpack.c.bf16 %v3409_v47, %v3408_v42  ;;  %v3699_v42 = vld [vmem:[#allocation9 + $0x378] sm:$0xff] }
 0x97f   :  { %v3850_v14 = vld [vmem:[#allocation3 + $0x79] sm:$0x1]  ;;  %v3825_v20 = vld [vmem:[#allocation3 + $0x78] sm:$0x1]  ;;  %v3841_v47 = vld [vmem:[#allocation9 + $0x470] sm:$0xff] }
 0x980   :  { %6146 = vmatpush3.bf16.msra.mxu0 %v6145_v30  ;;  %6170 = vmatpush3.bf16.msra.mxu1 %v6169_v45  ;;  %v3888_v13 = vrot.slane %v3850_v14, 1  ;;  %v4353_v16 = vrot.slane %v3825_v20, 1  ;;  %v3743_v45 = vrot.slane %v3706_v52, 2  ;;  %v6181_v14 = vpack.c.bf16 %v3853_v22, %v3852_v29 }
 0x981   :  { %6147 = vmatprep.subr.bf16.mxu0 %v6639_v21  ;;  %6171 = vmatprep.subr.bf16.mxu1 %v6639_v21  ;;  %v6205_v20 = vpack.c.bf16 %v3249_v27, %v3248_v53  ;;  %v3398_v27 = vld [vmem:[#allocation9 + $0x100] sm:$0xff] }
 0x982   :  { %v7787_v25 = vsel %vm3316_vm7, %v3888_v13, %v7699_v63  ;;  %v7791_v37 = vsel %vm3316_vm7, %v4353_v16, %v7703_v3  ;;  %v3581_v63 = vld [vmem:[#allocation9 + $0x2f8] sm:$0xff]  ;;  %v3735_v3 = vrot.slane %v3702_v10, 6  ;;  %v3250_v16 = vld [vmem:[#allocation9 + $0x10] sm:$0xff] }
 0x983   :  { %v6154_v58 = vpack.c.bf16 %v3581_v63, %v3580_v18  ;;  %v3855_v13 = vld [vmem:[#allocation9 + $0x498] sm:$0xff]  ;;  %v6208_v9 = vpack.c.bf16 %v3251_v6, %v3250_v16  ;;  %v6187_v18 = vpack.c.bf16 %v3857_v57, %v3856_v56  ;;  %v6190_v63 = vpack.c.bf16 %v3859_v41, %v3858_v19  ;;  %v3545_v16 = vld [vmem:[#allocation9 + $0x220] sm:$0xff]  ;;  %v3546_v6 = vld [vmem:[#allocation9 + $0x228] sm:$0xff] }
 0x984   :  { %6149 = vmatpush3.bf16.msra.mxu0 %v6148_v48  ;;  %6173 = vmatpush3.bf16.msra.mxu1 %v6172_v28  ;;  %v3736_v30 = vsel %vm3301_vm1, %v3735_v3, %v3734_v38  ;;  %v3599_v48 = vsel %vm3310_vm4, %v3598_v23, %v3597_v50  ;;  %v6184_v39 = vpack.c.bf16 %v3855_v13, %v3854_v12  ;;  %v3256_v3 = vld [vmem:[#allocation9 + $0x40] sm:$0xff]  ;;  %v3259_v23 = vld [vmem:[#allocation9 + $0x58] sm:$0xff]  ;;  %v3399_v50 = vld [vmem:[#allocation9 + $0x108] sm:$0xff] }
 0x985   :  { %6150 = vmatprep.subr.bf16.mxu0 %v6639_v21  ;;  %6174 = vmatprep.subr.bf16.mxu1 %v6639_v21  ;;  %v3738_v46 = vsel %vm3304_vm2, %v3737_v26, %v3736_v30  ;;  %v3601_v2 = vsel %vm3313_vm5, %v3600_v62, %v3599_v48  ;;  %v6217_v52 = vpack.c.bf16 %v3257_v31, %v3256_v3  ;;  %v3862_v26 = vld [vmem:[#allocation9 + $0x4d0] sm:$0xff]  ;;  %v3867_v62 = vld [vmem:[#allocation9 + $0x4f8] sm:$0xff]  ;;  %v3403_v13 = vld [vmem:[#allocation9 + $0x128] sm:$0xff] }
 0x986   :  { %v3740_v28 = vsel %vm3307_vm3, %v3739_v43, %v3738_v46  ;;  %v3603_v17 = vsel %vm3316_vm7, %v3602_v15, %v3601_v2  ;;  %v6196_v8 = vpack.c.bf16 %v3863_v11, %v3862_v26  ;;  %v6220_v38 = vpack.c.bf16 %v3259_v23, %v3258_v35  ;;  %v3864_v43 = vld [vmem:[#allocation9 + $0x4e0] sm:$0xff]  ;;  %v3262_v30 = vld [vmem:[#allocation9 + $0x70] sm:$0xff]  ;;  %v3542_v46 = vld [vmem:[#allocation9 + $0x208] sm:$0xff] }
 0x987   :  { %v3742_v0 = vsel %vm3310_vm4, %v3741_v61, %v3740_v28  ;;  %v6202_v22 = vpack.c.bf16 %v3867_v62, %v3866_v44  ;;  %v3541_v15 = vld [vmem:[#allocation9 + $0x200] sm:$0xff]  ;;  %v3400_v28 = vld [vmem:[#allocation9 + $0x110] sm:$0xff]  ;;  %v3411_v31 = vld [vmem:[#allocation9 + $0x168] sm:$0xff] }
 0x988   :  { %6152 = vmatpush3.bf16.msra.mxu0 %v6151_v40  ;;  %6176 = vmatpush3.bf16.msra.mxu1 %v6175_v33  ;;  %v3744_v4 = vsel %vm3313_vm5, %v3743_v45, %v3742_v0  ;;  %v3252_v40 = vld [vmem:[#allocation9 + $0x20] sm:$0xff]  ;;  %v3253_v33 = vld [vmem:[#allocation9 + $0x28] sm:$0xff]  ;;  %v3263_v45 = vld [vmem:[#allocation9 + $0x78] sm:$0xff]  ;;  %v6253_v48 = vpack.c.bf16 %v3542_v46, %v3541_v15 }
 0x989   :  { %6153 = vmatprep.subr.bf16.mxu0 %v6639_v21  ;;  %6177 = vmatprep.subr.bf16.mxu1 %v6639_v21  ;;  %v3746_v10 = vsel %vm3316_vm7, %v3745_v34, %v3744_v4  ;;  %v6211_v1 = vpack.c.bf16 %v3253_v33, %v3252_v40  ;;  %v6226_v53 = vpack.c.bf16 %v3263_v45, %v3262_v30  ;;  %v3401_v0 = vld [vmem:[#allocation9 + $0x118] sm:$0xff]  ;;  %v3402_v4 = vld [vmem:[#allocation9 + $0x120] sm:$0xff]  ;;  %v3407_v33 = vld [vmem:[#allocation9 + $0x148] sm:$0xff] }
 0x98a   :  { %v6229_v34 = vpack.c.bf16 %v3399_v50, %v3398_v27  ;;  %v6232_v12 = vpack.c.bf16 %v3401_v0, %v3400_v28  ;;  %v3406_v40 = vld [vmem:[#allocation9 + $0x140] sm:$0xff]  ;;  %v3412_v35 = vld [vmem:[#allocation9 + $0x170] sm:$0xff]  ;;  %v3413_v23 = vld [vmem:[#allocation9 + $0x178] sm:$0xff] }
 0x98b   :  { %v6241_v19 = vpack.c.bf16 %v3407_v33, %v3406_v40  ;;  %v3410_v3 = vld [vmem:[#allocation9 + $0x160] sm:$0xff]  ;;  %v3686_v30 = vld [vmem:[#allocation9 + $0x310] sm:$0xff]  ;;  %v3687_v45 = vld [vmem:[#allocation9 + $0x318] sm:$0xff] }
 0x98c   :  { %6155 = vmatpush3.bf16.msra.mxu0 %v6154_v58  ;;  %6179 = vmatpush3.bf16.msra.mxu1 %v6178_v59  ;;  %v3865_v58 = vld [vmem:[#allocation9 + $0x4e8] sm:$0xff]  ;;  %v3260_v59 = vld [vmem:[#allocation9 + $0x60] sm:$0xff]  ;;  %v6247_v26 = vpack.c.bf16 %v3411_v31, %v3410_v3  ;;  %v6280_v27 = vpack.c.bf16 %v3687_v45, %v3686_v30  ;;  %v3690_v28 = vld [vmem:[#allocation9 + $0x330] sm:$0xff] }
 0x98d   :  { %6180 = vmatprep.subr.bf16.mxu0 %v6639_v21  ;;  %6204 = vmatprep.subr.bf16.mxu1 %v6639_v21  ;;  %v6199_v61 = vpack.c.bf16 %v3865_v58, %v3864_v43  ;;  %v6223_v29 = vpack.c.bf16 %v3261_v24, %v3260_v59  ;;  %v6250_v43 = vpack.c.bf16 %v3413_v23, %v3412_v35  ;;  %v3684_v59 = vld [vmem:[#allocation9 + $0x300] sm:$0xff]  ;;  %v3685_v24 = vld [vmem:[#allocation9 + $0x308] sm:$0xff]  ;;  %v3691_v0 = vld [vmem:[#allocation9 + $0x338] sm:$0xff] }
 0x98e   :  { %v6277_v44 = vpack.c.bf16 %v3685_v24, %v3684_v59  ;;  %v3688_v15 = vld [vmem:[#allocation9 + $0x320] sm:$0xff]  ;;  %v3689_v46 = vld [vmem:[#allocation9 + $0x328] sm:$0xff] }
 0x98f   :  { %4813 = vmatmul.mubr.f32.vlgmr.msra.gmra.mrb[50].mxu0 %v3603_v17  ;;  %4848 = vmatmul.mubr.f32.vlgmr.msra.gmra.mrb[50].mxu1 %v3746_v10  ;;  %v3404_v17 = vld [vmem:[#allocation9 + $0x130] sm:$0xff]  ;;  %v3405_v10 = vld [vmem:[#allocation9 + $0x138] sm:$0xff]  ;;  %v3697_v40 = vld [vmem:[#allocation9 + $0x368] sm:$0xff] }
 0x990   :  { %6182 = vmatpush3.bf16.msra.mxu0 %v6181_v14  ;;  %6206 = vmatpush3.bf16.msra.mxu1 %v6205_v20  ;;  %v3543_v14 = vld [vmem:[#allocation9 + $0x210] sm:$0xff]  ;;  %v3544_v20 = vld [vmem:[#allocation9 + $0x218] sm:$0xff]  ;;  %v6238_v56 = vpack.c.bf16 %v3405_v10, %v3404_v17  ;;  %v3839_v33 = vld [vmem:[#allocation9 + $0x460] sm:$0xff] }
 0x991   :  { %6183 = vmatprep.subr.bf16.mxu0 %v6639_v21  ;;  %6207 = vmatprep.subr.bf16.mxu1 %v6639_v21  ;;  %v6256_v2 = vpack.c.bf16 %v3544_v20, %v3543_v14  ;;  %v3833_v14 = vld [vmem:[#allocation9 + $0x430] sm:$0xff]  ;;  %v3834_v20 = vld [vmem:[#allocation9 + $0x438] sm:$0xff] }
 0x992   :  { %4882 = vmatprep.mubr.msk.f32.mxu0 %vm6640_vm6, %v6637_v5  ;;  %4917 = vmatprep.mubr.msk.f32.mxu1 %vm6640_vm6, %v6637_v5  ;;  %v3695_v17 = vld [vmem:[#allocation9 + $0x358] sm:$0xff]  ;;  %v3837_v10 = vld [vmem:[#allocation9 + $0x450] sm:$0xff] }
 0x994   :  { %6185 = vmatpush3.bf16.msra.mxu0 %v6184_v39  ;;  %6209 = vmatpush3.bf16.msra.mxu1 %v6208_v9  ;;  %v3547_v39 = vld [vmem:[#allocation9 + $0x230] sm:$0xff]  ;;  %v3548_v9 = vld [vmem:[#allocation9 + $0x238] sm:$0xff] }
 0x995   :  { %6186 = vmatprep.subr.bf16.mxu0 %v6639_v21  ;;  %6210 = vmatprep.subr.bf16.mxu1 %v6639_v21  ;;  %v6262_v57 = vpack.c.bf16 %v3548_v9, %v3547_v39  ;;  %v3838_v39 = vld [vmem:[#allocation9 + $0x458] sm:$0xff] }
 0x998   :  { %6188 = vmatpush3.bf16.msra.mxu0 %v6187_v18  ;;  %6212 = vmatpush3.bf16.msra.mxu1 %v6211_v1  ;;  %v3549_v18 = vld [vmem:[#allocation9 + $0x240] sm:$0xff]  ;;  %v3550_v1 = vld [vmem:[#allocation9 + $0x248] sm:$0xff] }
 0x999   :  { %6189 = vmatprep.subr.bf16.mxu0 %v6639_v21  ;;  %6213 = vmatprep.subr.bf16.mxu1 %v6639_v21  ;;  %v6265_v41 = vpack.c.bf16 %v3550_v1, %v3549_v18  ;;  %v3840_v18 = vld [vmem:[#allocation9 + $0x468] sm:$0xff] }
 0x99c   :  { %6191 = vmatpush3.bf16.msra.mxu0 %v6190_v63  ;;  %6215 = vmatpush3.bf16.msra.mxu1 %v6214_v54  ;;  %v3551_v63 = vld [vmem:[#allocation9 + $0x250] sm:$0xff]  ;;  %v3552_v54 = vld [vmem:[#allocation9 + $0x258] sm:$0xff] }
 0x99d   :  { %6192 = vmatprep.subr.bf16.mxu0 %v6639_v21  ;;  %6216 = vmatprep.subr.bf16.mxu1 %v6639_v21  ;;  %v6268_v36 = vpack.c.bf16 %v3552_v54, %v3551_v63  ;;  %v3842_v63 = vld [vmem:[#allocation9 + $0x478] sm:$0xff] }
 0x9a0   :  { %6194 = vmatpush3.bf16.msra.mxu0 %v6193_v32  ;;  %6218 = vmatpush3.bf16.msra.mxu1 %v6217_v52  ;;  %v3553_v32 = vld [vmem:[#allocation9 + $0x260] sm:$0xff]  ;;  %v3554_v52 = vld [vmem:[#allocation9 + $0x268] sm:$0xff] }
 0x9a1   :  { %6195 = vmatprep.subr.bf16.mxu0 %v6639_v21  ;;  %6219 = vmatprep.subr.bf16.mxu1 %v6639_v21  ;;  %v6271_v11 = vpack.c.bf16 %v3554_v52, %v3553_v32 }
 0x9a4   :  { %6197 = vmatpush3.bf16.msra.mxu0 %v6196_v8  ;;  %6221 = vmatpush3.bf16.msra.mxu1 %v6220_v38  ;;  %v3555_v8 = vld [vmem:[#allocation9 + $0x270] sm:$0xff]  ;;  %v3556_v38 = vld [vmem:[#allocation9 + $0x278] sm:$0xff] }
 0x9a5   :  { %6198 = vmatprep.subr.bf16.mxu0 %v6639_v21  ;;  %6222 = vmatprep.subr.bf16.mxu1 %v6639_v21  ;;  %v6274_v58 = vpack.c.bf16 %v3556_v38, %v3555_v8 }
 0x9a8   :  { %6200 = vmatpush3.bf16.msra.mxu0 %v6199_v61  ;;  %6224 = vmatpush3.bf16.msra.mxu1 %v6223_v29  ;;  %v3827_v61 = vld [vmem:[#allocation9 + $0x400] sm:$0xff]  ;;  %v3828_v29 = vld [vmem:[#allocation9 + $0x408] sm:$0xff] }
 0x9a9   :  { %6201 = vmatprep.subr.bf16.mxu0 %v6639_v21  ;;  %6225 = vmatprep.subr.bf16.mxu1 %v6639_v21  ;;  %v6301_v62 = vpack.c.bf16 %v3828_v29, %v3827_v61 }
 0x9ac   :  { %6203 = vmatpush3.bf16.msra.mxu0 %v6202_v22  ;;  %6227 = vmatpush3.bf16.msra.mxu1 %v6226_v53  ;;  %v3829_v22 = vld [vmem:[#allocation9 + $0x410] sm:$0xff]  ;;  %v3830_v53 = vld [vmem:[#allocation9 + $0x418] sm:$0xff] }
 0x9ad   :  { %6228 = vmatprep.subr.bf16.mxu0 %v6639_v21  ;;  %6252 = vmatprep.subr.bf16.mxu1 %v6639_v21  ;;  %v6304_v50 = vpack.c.bf16 %v3830_v53, %v3829_v22 }
 0x9af   :  { %4883 = vmatmul.mubr.f32.vlgmr.msra.gmra.mrb[52].mxu0 %v7787_v25  ;;  %4918 = vmatmul.mubr.f32.vlgmr.msra.gmra.mrb[52].mxu1 %v7754_v49  ;;  %v6235_v49 = vpack.c.bf16 %v3403_v13, %v3402_v4  ;;  %v6259_v25 = vpack.c.bf16 %v3546_v6, %v3545_v16  ;;  %v3692_v4 = vld [vmem:[#allocation9 + $0x340] sm:$0xff]  ;;  %v3836_v16 = vld [vmem:[#allocation9 + $0x448] sm:$0xff] }
 0x9b0   :  { %6230 = vmatpush3.bf16.msra.mxu0 %v6229_v34  ;;  %6254 = vmatpush3.bf16.msra.mxu1 %v6253_v48  ;;  %v3831_v34 = vld [vmem:[#allocation9 + $0x420] sm:$0xff]  ;;  %v3832_v48 = vld [vmem:[#allocation9 + $0x428] sm:$0xff] }
 0x9b1   :  { %6231 = vmatprep.subr.bf16.mxu0 %v6639_v21  ;;  %6255 = vmatprep.subr.bf16.mxu1 %v6639_v21  ;;  %v3835_v13 = vld [vmem:[#allocation9 + $0x440] sm:$0xff] }
 0x9b2   :  { %4952 = vmatprep.mubr.msk.f32.mxu0 %vm6640_vm6, %v6637_v5  ;;  %4987 = vmatprep.mubr.msk.f32.mxu1 %vm6640_vm6, %v6637_v5 }
 0x9b4   :  { %6233 = vmatpush3.bf16.msra.mxu0 %v6232_v12  ;;  %6257 = vmatpush3.bf16.msra.mxu1 %v6256_v2  ;;  %v6286_v12 = vpack.c.bf16 %v3691_v0, %v3690_v28  ;;  %v6310_v2 = vpack.c.bf16 %v3834_v20, %v3833_v14 }
 0x9b5   :  { %6234 = vmatprep.subr.bf16.mxu0 %v6639_v21  ;;  %6258 = vmatprep.subr.bf16.mxu1 %v6639_v21 }
 0x9b8   :  { %6236 = vmatpush3.bf16.msra.mxu0 %v6235_v49  ;;  %6260 = vmatpush3.bf16.msra.mxu1 %v6259_v25  ;;  %v6313_v49 = vpack.c.bf16 %v3836_v16, %v3835_v13  ;;  %v3694_v25 = vld [vmem:[#allocation9 + $0x350] sm:$0xff] }
 0x9b9   :  { %6237 = vmatprep.subr.bf16.mxu0 %v6639_v21  ;;  %6261 = vmatprep.subr.bf16.mxu1 %v6639_v21  ;;  %v6292_v9 = vpack.c.bf16 %v3695_v17, %v3694_v25 }
 0x9bc   :  { %6239 = vmatpush3.bf16.msra.mxu0 %v6238_v56  ;;  %6263 = vmatpush3.bf16.msra.mxu1 %v6262_v57  ;;  %v6316_v56 = vpack.c.bf16 %v3838_v39, %v3837_v10  ;;  %v3696_v57 = vld [vmem:[#allocation9 + $0x360] sm:$0xff] }
 0x9bd   :  { %6240 = vmatprep.subr.bf16.mxu0 %v6639_v21  ;;  %6264 = vmatprep.subr.bf16.mxu1 %v6639_v21  ;;  %v6295_v1 = vpack.c.bf16 %v3697_v40, %v3696_v57 }
 0x9c0   :  { %6242 = vmatpush3.bf16.msra.mxu0 %v6241_v19  ;;  %6266 = vmatpush3.bf16.msra.mxu1 %v6265_v41  ;;  %v6319_v19 = vpack.c.bf16 %v3840_v18, %v3839_v33  ;;  %v3698_v41 = vld [vmem:[#allocation9 + $0x370] sm:$0xff] }
 0x9c1   :  { %6243 = vmatprep.subr.bf16.mxu0 %v6639_v21  ;;  %6267 = vmatprep.subr.bf16.mxu1 %v6639_v21  ;;  %v6298_v54 = vpack.c.bf16 %v3699_v42, %v3698_v41 }
 0x9c4   :  { %6245 = vmatpush3.bf16.msra.mxu0 %v6244_v7  ;;  %6269 = vmatpush3.bf16.msra.mxu1 %v6268_v36  ;;  %v6322_v7 = vpack.c.bf16 %v3842_v63, %v3841_v47 }
 0x9c5   :  { %6246 = vmatprep.subr.bf16.mxu0 %v6639_v21  ;;  %6270 = vmatprep.subr.bf16.mxu1 %v6639_v21 }
 0x9c8   :  { %6248 = vmatpush3.bf16.msra.mxu0 %v6247_v26  ;;  %6272 = vmatpush3.bf16.msra.mxu1 %v6271_v11 }
 0x9c9   :  { %6249 = vmatprep.subr.bf16.mxu0 %v6639_v21  ;;  %6273 = vmatprep.subr.bf16.mxu1 %v6639_v21 }
 0x9cc   :  { %6251 = vmatpush3.bf16.msra.mxu0 %v6250_v43  ;;  %6275 = vmatpush3.bf16.msra.mxu1 %v6274_v58 }
 0x9cd   :  { %6276 = vmatprep.subr.bf16.mxu0 %v6639_v21  ;;  %6300 = vmatprep.subr.bf16.mxu1 %v6639_v21 }
 0x9cf   :  { %4953 = vmatmul.mubr.f32.vlgmr.msra.gmra.mrb[54].mxu0 %v7760_v51  ;;  %4988 = vmatmul.mubr.f32.vlgmr.msra.gmra.mrb[54].mxu1 %v7764_v55  ;;  %v6283_v51 = vpack.c.bf16 %v3689_v46, %v3688_v15  ;;  %v6307_v55 = vpack.c.bf16 %v3832_v48, %v3831_v34  ;;  %v4539_v15 = vld [vmem:[%s7896_s4] ss:$0 sm:$0xff] }
 0x9d0   :  { %6278 = vmatpush3.bf16.msra.mxu0 %v6277_v44  ;;  %6302 = vmatpush3.bf16.msra.mxu1 %v6301_v62 }
 0x9d1   :  { %6279 = vmatprep.subr.bf16.mxu0 %v6639_v21  ;;  %6303 = vmatprep.subr.bf16.mxu1 %v6639_v21 }
 0x9d2   :  { %5022 = vmatprep.mubr.msk.f32.mxu0 %vm6640_vm6, %v6637_v5  ;;  %5057 = vmatprep.mubr.msk.f32.mxu1 %vm6640_vm6, %v6637_v5  ;;  %v3693_v5 = vld [vmem:[#allocation9 + $0x348] sm:$0xff] }
 0x9d3   :  { %v6289_v6 = vpack.c.bf16 %v3693_v5, %v3692_v4 }
 0x9d4   :  { %6281 = vmatpush3.bf16.msra.mxu0 %v6280_v27  ;;  %6305 = vmatpush3.bf16.msra.mxu1 %v6304_v50 }
 0x9d5   :  { %6282 = vmatprep.subr.bf16.mxu0 %v6639_v21  ;;  %6306 = vmatprep.subr.bf16.mxu1 %v6639_v21 }
 0x9d8   :  { %6284 = vmatpush3.bf16.msra.mxu0 %v6283_v51  ;;  %6308 = vmatpush3.bf16.msra.mxu1 %v6307_v55 }
 0x9d9   :  { %6285 = vmatprep.subr.bf16.mxu0 %v6639_v21  ;;  %6309 = vmatprep.subr.bf16.mxu1 %v6639_v21 }
 0x9dc   :  { %6287 = vmatpush3.bf16.msra.mxu0 %v6286_v12  ;;  %6311 = vmatpush3.bf16.msra.mxu1 %v6310_v2 }
 0x9dd   :  { %6288 = vmatprep.subr.bf16.mxu0 %v6639_v21  ;;  %6312 = vmatprep.subr.bf16.mxu1 %v6639_v21 }
 0x9e0   :  { %6290 = vmatpush3.bf16.msra.mxu0 %v6289_v6  ;;  %6314 = vmatpush3.bf16.msra.mxu1 %v6313_v49 }
 0x9e1   :  { %6291 = vmatprep.subr.bf16.mxu0 %v6639_v21  ;;  %6315 = vmatprep.subr.bf16.mxu1 %v6639_v21 }
 0x9e4   :  { %6293 = vmatpush3.bf16.msra.mxu0 %v6292_v9  ;;  %6317 = vmatpush3.bf16.msra.mxu1 %v6316_v56 }
 0x9e5   :  { %6294 = vmatprep.subr.bf16.mxu0 %v6639_v21  ;;  %6318 = vmatprep.subr.bf16.mxu1 %v6639_v21 }
 0x9e8   :  { %6296 = vmatpush3.bf16.msra.mxu0 %v6295_v1  ;;  %6320 = vmatpush3.bf16.msra.mxu1 %v6319_v19 }
 0x9e9   :  { %6297 = vmatprep.subr.bf16.mxu0 %v6639_v21  ;;  %6321 = vmatprep.subr.bf16.mxu1 %v6639_v21 }
 0x9ec   :  { %6299 = vmatpush3.bf16.msra.mxu0 %v6298_v54  ;;  %6323 = vmatpush3.bf16.msra.mxu1 %v6322_v7 }
 0x9ef   :  { %5023 = vmatmul.mubr.f32.vlgmr.msra.gmra.mrb[56].mxu0 %v7772_v60  ;;  %5058 = vmatmul.mubr.f32.vlgmr.msra.gmra.mrb[56].mxu1 %v7791_v37 }
 0xa42   :  { %v3385_v36 = vpop.f32.mrb[48].mxu0  ;;  %v3528_v3 = vpop.f32.mrb[48].mxu1 }
 0xa43   :  { %v4744_v31 = vpop.f32.mrb[49].mxu0  ;;  %v4779_v32 = vpop.f32.mrb[49].mxu1 }
 0xa62   :  { %v3671_v52 = vpop.f32.mrb[50].mxu0  ;;  %v3814_v26 = vpop.f32.mrb[50].mxu1 }
 0xa63   :  { %v4814_v11 = vpop.f32.mrb[51].mxu0  ;;  %v4849_v35 = vpop.f32.mrb[51].mxu1 }
 0xa82   :  { %v3957_v23 = vpop.f32.mrb[52].mxu0  ;;  %v4050_v8 = vpop.f32.mrb[52].mxu1 }
 0xa83   :  { %v4051_v38 = vadd.f32 %v4050_v8, %v3385_v36  ;;  %v4884_v43 = vpop.f32.mrb[53].mxu0  ;;  %v4919_v58 = vpop.f32.mrb[53].mxu1 }
 0xaa2   :  { %v4143_v21 = vpop.f32.mrb[54].mxu0  ;;  %v4236_v59 = vpop.f32.mrb[54].mxu1 }
 0xaa3   :  { %v4144_v24 = vadd.f32 %v4143_v21, %v3528_v3  ;;  %v4237_v61 = vadd.f32 %v4236_v59, %v3671_v52  ;;  %v4954_v60 = vpop.f32.mrb[55].mxu0  ;;  %v4989_v29 = vpop.f32.mrb[55].mxu1 }
 0xaa5   :  { %v4426_v37 = vadd.f32 %v4144_v24, %v4051_v38 }
 0xac2   :  { %v4329_v44 = vpop.f32.mrb[56].mxu0  ;;  %v4422_v62 = vpop.f32.mrb[56].mxu1 }
 0xac3   :  { %v4330_v30 = vadd.f32 %v4329_v44, %v3814_v26  ;;  %v4423_v45 = vadd.f32 %v4422_v62, %v3957_v23  ;;  %v5024_v22 = vpop.f32.mrb[57].mxu0  ;;  %v5059_v53 = vpop.f32.mrb[57].mxu1 }
 0xac5   :  { %v4427_v27 = vadd.f32 %v4330_v30, %v4237_v61 }
 0xac7   :  { %v4428_v50 = vadd.f32 %v4427_v27, %v4426_v37 }
 0xac9   :  { %v4429_v46 = vadd.f32 %v4428_v50, %v4423_v45 }
 0xacb   :  { %v4437_v34 = vadd.f32 %v4539_v15, %v4429_v46 }
 0xacd   :  { %4438 = vmax.xlane.f32.xlu0 %v4437_v34 }
 0xb5a   :  { %v4439_v48 = vpop.xlane.xlu0 %4438 }
 0xb5b   :  { %v4440_v51 = vsub.f32 %v4437_v34, %v4439_v48 }
 0xb5d   :  { %v4441_v55 = vmul.f32 1.442695, %v4440_v51 }
 0xb5f   :  { %6531 = vpow2.f32 %v4441_v55 }
 0xb69   :  { %v6532_v28 = vpop.eup %6531 }
 0xb6a   :  { %4443 = vadd.xlane.f32.xlu1 %v6532_v28 }
 0xbf7   :  { %v4444_v0 = vpop.xlane.xlu1 %4443 }
 0xbf8   :  { %6533 = vlog2.f32 %v4444_v0 }
 0xc02   :  { %v6534_v14 = vpop.eup %6533 }
 0xc03   :  { %v4446_v20 = vmul.f32 0.6931472, %v6534_v14 }
 0xc05   :  { %v4447_v12 = vsub.f32 %v4440_v51, %v4446_v20 }
 0xc07   :  { %4448 = vst [vmem:[#allocation10] sm:$0xff] %v4447_v12 }
 0xc08   :  { %6612 = shalt.err (!%p6609_p0)
}
 0xc09   :  { %s6613_s9 = scalar_lea.hbm %s7897_s5, 128 }
 0xc0a   :  { %p6614_p1 = scmp.ne.s32.totalorder %s7897_s5, %s6613_s9  ;;  %p6617_p2 = scmp.lt.u32.totalorder %s6613_s9, %s7897_s5 }
 0xc0c   :  { %p6619_p3 = pnand %p6617_p2, %p6614_p1 }
 0xc0e   :  { %6622 = shalt.err (!%p6619_p3)
}
 0xc0f   :  { %4462 = dma.vmem_to_hbm [thread:$0]  %s4460_s29, 128, %s7897_s5, [#allocation6]  }
 0xc10   :  { %6627 = dma.done.wait [#allocation6], 128  }
 0xc11   :  { %6628 = vsyncadd [#allocation6], 4294967168 }
 0xc12   :  { %4474 = vsyncpa [#allocation5], 1 }
 0xc13   :  { %4475 = vsyncpa [#allocation8], 1 }
 0xc14   :  { %4476 = vsyncpa [#allocation6], 1 }

</bundles_post_ra>
